<compile_context>
chip_gen: v7x
topology: tpu7x:2x2x1
jax: 0.10.0
libtpu: 0.0.40
codegen_flags: <defaults>
</compile_context>

<pallas_src>
import math

import jax
import jax.numpy as jnp
from jax.experimental import pallas as pl
from jax.experimental.pallas import tpu as pltpu

FREQ = 256  # TimestepEmbedder.frequency_embedding_size default

PACKED_ORDER = [
    "w_xc", "b_xc",            # fused input_proj + cond_embed (block-diagonal, K padded to 128)
    "te_w1", "te_b1",          # time_embed.mlp[0]
    "te_w2", "te_b2",          # time_embed.mlp[2]
    "w_ada", "b_ada",          # ALL adaLN modulations concatenated [MC, R*3MC + 2MC]
    "r_ln_w", "r_ln_b",        # per-ResBlock LayerNorm affine   [R, 1, MC]
    "r_mw1", "r_mb1",          # per-ResBlock mlp[0]             [R, MC, MC], [R, 1, MC]
    "r_mw2", "r_mb2",          # per-ResBlock mlp[2]
    "f_lw", "f_lb",            # final linear (padded to lane-dense cout)
]


def _round_up(x, m):
    return ((x + m - 1) // m) * m


# ------------------------------- kernel --------------------------------------
def _make_kernel(use_bf16_silu):
    def kernel(xc_ref, tf_ref,
               w_xc, b_xc, te_w1, te_b1, te_w2, te_b2,
               w_ada, b_ada, r_ln_w, r_ln_b, r_mw1, r_mb1, r_mw2, r_mb2,
               f_lw, f_lb,
               out_ref, ada_ref):
        eps = 1e-6
        num_blocks = r_mw1.shape[0]
        mc = r_mw1.shape[1]

        def bdot(a, w):
            # bf16 MXU matmul (weights pre-cast to bf16 at pack time), f32 accumulation.
            return jnp.dot(a.astype(jnp.bfloat16), w,
                           preferred_element_type=jnp.float32)

        def silu_to_bf16(v):
            # v is f32; result is bf16 (it always feeds a bf16 matmul next).
            if use_bf16_silu:
                vb = v.astype(jnp.bfloat16)          # halves EUP/VPU element count (v6e/v7x)
                return vb * jax.nn.sigmoid(vb)
            return (v * jax.nn.sigmoid(v)).astype(jnp.bfloat16)   # f32 EUP path (v5e)

        def layer_norm(v, w=None, b=None):
            # two-pass statistics in f32 (robust vs. E[x^2]-mu^2 cancellation)
            mu = jnp.mean(v, axis=-1, keepdims=True)
            d = v - mu
            var = jnp.mean(d * d, axis=-1, keepdims=True)
            h = d * jax.lax.rsqrt(var + eps)
            if w is not None:
                h = h * w + b
            return h

        # fused input_proj + cond_embed: [x | c | 0-pad] @ blockdiag(ip_w, ce_w)
        xc = bdot(xc_ref[...], w_xc[...]) + b_xc[...]
        x = xc[:, :mc]            # residual stream (f32)
        c_emb = xc[:, mc:]

        # time embedding MLP
        t_h = silu_to_bf16(bdot(tf_ref[...], te_w1[...]) + te_b1[...])
        t_emb = bdot(t_h, te_w2[...]) + te_b2[...]
        y = t_emb + c_emb
        sy = silu_to_bf16(y)      # loop-invariant SiLU(y) feeding every adaLN

        # ALL adaLN modulations (R blocks * [shift|scale|gate] + final [shift|scale]) via one
        # wide lane-dense matmul, written to VMEM scratch so its live range is bounded:
        # per-block slices are re-loaded from the ref instead of pinning the whole f32 tensor
        # in vregs across the unrolled loop.
        ada_ref[...] = bdot(sy, w_ada[...]) + b_ada[...]

        # Residual blocks (statically unrolled; R is small for MAR's DiffLoss MLP).
        # TODO(synk): for production widths (MC >= 512, R >= 6) stream per-block weights over
        # a second "arbitrary" grid axis (weights no longer all-resident; v7x has 64 MiB VMEM).
        for i in range(num_blocks):
            base = 3 * mc * i
            shift = ada_ref[:, base:base + mc]
            scale = ada_ref[:, base + mc:base + 2 * mc]
            gate = ada_ref[:, base + 2 * mc:base + 3 * mc]
            h = layer_norm(x, r_ln_w[i], r_ln_b[i]) * (1.0 + scale) + shift
            h = bdot(silu_to_bf16(bdot(h, r_mw1[i]) + r_mb1[i]), r_mw2[i]) + r_mb2[i]
            x = x + gate * h

        # final layer: LayerNorm (no affine) + adaLN modulate + linear (cout padded to 128)
        fbase = 3 * mc * num_blocks
        shift = ada_ref[:, fbase:fbase + mc]
        scale = ada_ref[:, fbase + mc:fbase + 2 * mc]
        h = layer_norm(x) * (1.0 + scale) + shift
        out_ref[...] = (bdot(h, f_lw[...]) + f_lb[...]).astype(out_ref.dtype)

    return kernel


# ------------------------------ glue / packing --------------------------------
def timestep_embedding(t, dim, max_period=10000.0):
    half = dim // 2
    freqs = jnp.exp(-math.log(max_period) * jnp.arange(half, dtype=jnp.float32) / half)
    args = t.astype(jnp.float32)[:, None] * freqs[None]
    emb = jnp.concatenate([jnp.cos(args), jnp.sin(args)], axis=-1)
    if dim % 2:
        emb = jnp.concatenate([emb, jnp.zeros_like(emb[:, :1])], axis=-1)
    return emb


def pack_params(p):
    """Fuse / pad / cast the raw parameters into the kernel's packed layout (run ONCE)."""
    num_blocks, mc, _ = p["r_mw1"].shape
    cin = p["ip_w"].shape[0]
    cz = p["ce_w"].shape[0]
    cout = p["f_lw"].shape[1]
    cout_pad = _round_up(cout, 128)
    k_in = cin + cz
    k_pad = _round_up(k_in, 128)    # lane-dense K for the fused first matmul
    bf16 = jnp.bfloat16

    # block-diagonal fusion of input_proj and cond_embed (zero rows for the K padding)
    w_xc = jnp.zeros((k_pad, 2 * mc), jnp.float32)
    w_xc = w_xc.at[:cin, :mc].set(p["ip_w"]).at[cin:k_in, mc:].set(p["ce_w"])
    b_xc = jnp.concatenate([p["ip_b"], p["ce_b"]], axis=-1)

    # one wide adaLN weight: [r_aw[0] | r_aw[1] | ... | f_aw]
    w_ada = jnp.concatenate(
        [jnp.transpose(p["r_aw"], (1, 0, 2)).reshape(mc, num_blocks * 3 * mc), p["f_aw"]],
        axis=-1)
    b_ada = jnp.concatenate(
        [p["r_ab"].reshape(1, num_blocks * 3 * mc), p["f_ab"]], axis=-1)

    # lane-dense (128-padded) final linear
    f_lw = jnp.zeros((mc, cout_pad), jnp.float32).at[:, :cout].set(p["f_lw"])
    f_lb = jnp.zeros((1, cout_pad), jnp.float32).at[:, :cout].set(p["f_lb"])

    packed = dict(
        w_xc=w_xc.astype(bf16), b_xc=b_xc,
        te_w1=p["te_w1"].astype(bf16), te_b1=p["te_b1"],
        te_w2=p["te_w2"].astype(bf16), te_b2=p["te_b2"],
        w_ada=w_ada.astype(bf16), b_ada=b_ada,
        r_ln_w=p["r_ln_w"], r_ln_b=p["r_ln_b"],
        r_mw1=p["r_mw1"].astype(bf16), r_mb1=p["r_mb1"],
        r_mw2=p["r_mw2"].astype(bf16), r_mb2=p["r_mb2"],
        f_lw=f_lw.astype(bf16), f_lb=f_lb,
    )
    meta = dict(mc=mc, num_blocks=num_blocks, k_in=k_in, k_pad=k_pad,
                cout=cout, cout_pad=cout_pad,
                ada_w=num_blocks * 3 * mc + 2 * mc)
    return packed, meta


# ---------------------------- hardware heuristics ------------------------------
def _device_kind():
    try:
        return jax.devices()[0].device_kind.lower()
    except Exception:
        return ""


def _vmem_capacity_bytes():
    try:
        return int(pltpu.get_tpu_info().vmem_capacity_bytes)
    except Exception:
        return 64 * 1024 * 1024   # conservative (v7x-sized) fallback


def _single_tensorcore(kind):
    # v5e / v6e expose 1 TensorCore per device; v4/v5p (megacore) and v7x have 2.
    return any(s in kind for s in ("v5 lite", "v5e", "v5lite", "v6 lite", "v6e", "v6lite"))


def _supports_bf16_vpu(kind):
    # v5e (and earlier) VPU/EUP lack a bf16 path.
    return not any(s in kind for s in ("v2", "v3", "v4", "v5"))


def _pick_tile_n(n, kind):
    if n <= 8:
        return n
    tile = min(512, n)
    if (not _single_tensorcore(kind)) and n >= 16:
        # keep >= 2 grid steps so both TensorCores get work
        tile = min(tile, max(8, ((n // 2) // 8) * 8))
    if tile != n:
        tile = max(8, (tile // 8) * 8)
    return tile


# ------------------------------- forward wrapper -------------------------------
def make_forward(params, *, out_dtype=jnp.float32):
    """Pack weights once, return a jit-able forward(x, t, c)."""
    packed, meta = pack_params(params)
    weights = [packed[k] for k in PACKED_ORDER]
    kind = _device_kind()
    kernel = _make_kernel(_supports_bf16_vpu(kind))

    weight_bytes = sum(int(w.size) * w.dtype.itemsize for w in weights)
    vmem_cap = _vmem_capacity_bytes()

    mc = meta["mc"]
    k_in, k_pad = meta["k_in"], meta["k_pad"]
    cout, cout_pad = meta["cout"], meta["cout_pad"]
    ada_w = meta["ada_w"]

    def forward(x, t, c):
        n = x.shape[0]
        tile_n = _pick_tile_n(n, kind)
        grid = (pl.cdiv(n, tile_n),)

        # lane-dense fused input: [x | c | zero-pad] -> (n, k_pad)
        xc = jnp.concatenate([x, c], axis=-1)
        if k_pad != k_in:
            xc = jnp.pad(xc, ((0, 0), (0, k_pad - k_in)))
        t_freq = timestep_embedding(t, FREQ)           # tiny per-call glue, plain JAX

        def weight_spec(w):
            nd = w.ndim
            # full-shape, grid-invariant block; single-buffered so resident constants are
            # not duplicated by the default 2-deep pipeline.
            return pl.BlockSpec(w.shape, lambda i, _nd=nd: (0,) * _nd,
                                pipeline_mode=pl.Buffered(1))

        in_specs = [
            pl.BlockSpec((tile_n, k_pad), lambda i: (i, 0)),
            pl.BlockSpec((tile_n, FREQ), lambda i: (i, 0)),
        ] + [weight_spec(w) for w in weights]
        out_specs = pl.BlockSpec((tile_n, cout_pad), lambda i: (i, 0))

        # streamed tiles (double-buffered) + ada scratch + headroom for live intermediates
        act_bytes = 4 * tile_n * (2 * (k_pad + FREQ + cout_pad) + ada_w + 8 * mc)
        vmem_limit = max(32 << 20,
                         min(int(1.4 * (weight_bytes + act_bytes)) + (8 << 20),
                             vmem_cap - (8 << 20)))

        out_padded = pl.pallas_call(
            kernel,
            out_shape=jax.ShapeDtypeStruct((n, cout_pad), out_dtype),
            grid=grid,
            in_specs=in_specs,
            out_specs=out_specs,
            scratch_shapes=[pltpu.VMEM((tile_n, ada_w), jnp.float32)],
            compiler_params=pltpu.CompilerParams(
                dimension_semantics=("parallel",),
                vmem_limit_bytes=vmem_limit),
        )(xc, t_freq, *weights)
        # NOTE: consumers that tolerate the 128-padded slab can take out_padded directly
        # and skip this extra slice pass over the output.
        return out_padded[:, :cout]

    return forward


# ---------------- deterministic parameter init (synthetic) ----------------
# NOTE: the PyTorch module zero-inits the adaLN modulations and the final linear, which
# would make the output identically zero; here we use small deterministic random values
# so the kernel compute path is actually exercised/verified.
def init_params(key, cin, mc, cout, cz, num_blocks):
    keys = iter(jax.random.split(key, 16))

    def xavier(k, fan_in, fan_out, shape=None):
        shape = shape if shape is not None else (fan_in, fan_out)
        lim = math.sqrt(6.0 / (fan_in + fan_out))
        return jax.random.uniform(k, shape, jnp.float32, -lim, lim)

    p = {}
    p["ip_w"] = xavier(next(keys), cin, mc)
    p["ip_b"] = jnp.zeros((1, mc), jnp.float32)
    p["te_w1"] = 0.02 * jax.random.normal(next(keys), (FREQ, mc), jnp.float32)
    p["te_b1"] = jnp.zeros((1, mc), jnp.float32)
    p["te_w2"] = 0.02 * jax.random.normal(next(keys), (mc, mc), jnp.float32)
    p["te_b2"] = jnp.zeros((1, mc), jnp.float32)
    p["ce_w"] = xavier(next(keys), cz, mc)
    p["ce_b"] = jnp.zeros((1, mc), jnp.float32)
    p["r_ln_w"] = jnp.ones((num_blocks, 1, mc), jnp.float32)
    p["r_ln_b"] = jnp.zeros((num_blocks, 1, mc), jnp.float32)
    p["r_mw1"] = xavier(next(keys), mc, mc, (num_blocks, mc, mc))
    p["r_mb1"] = jnp.zeros((num_blocks, 1, mc), jnp.float32)
    p["r_mw2"] = xavier(next(keys), mc, mc, (num_blocks, mc, mc))
    p["r_mb2"] = jnp.zeros((num_blocks, 1, mc), jnp.float32)
    p["r_aw"] = 0.02 * jax.random.normal(next(keys), (num_blocks, mc, 3 * mc), jnp.float32)
    p["r_ab"] = 0.02 * jax.random.normal(next(keys), (num_blocks, 1, 3 * mc), jnp.float32)
    p["f_aw"] = 0.02 * jax.random.normal(next(keys), (mc, 2 * mc), jnp.float32)
    p["f_ab"] = 0.02 * jax.random.normal(next(keys), (1, 2 * mc), jnp.float32)
    p["f_lw"] = 0.02 * jax.random.normal(next(keys), (mc, cout), jnp.float32)
    p["f_lb"] = jnp.zeros((1, cout), jnp.float32)
    return p


# ---------------- pure-JAX f32 reference for correctness check ----------------
def reference_forward(x, t, c, p):
    def lin(h, w, b):
        return h @ w + b

    def silu(v):
        return v * jax.nn.sigmoid(v)

    def layer_norm(v, w=None, b=None, eps=1e-6):
        mu = v.mean(-1, keepdims=True)
        var = ((v - mu) ** 2).mean(-1, keepdims=True)
        h = (v - mu) / jnp.sqrt(var + eps)
        if w is not None:
            h = h * w + b
        return h

    tf = timestep_embedding(t, FREQ)
    xh = lin(x, p["ip_w"], p["ip_b"])
    te = lin(silu(lin(tf, p["te_w1"], p["te_b1"])), p["te_w2"], p["te_b2"])
    y = te + lin(c, p["ce_w"], p["ce_b"])
    sy = silu(y)
    for i in range(p["r_mw1"].shape[0]):
        ada = lin(sy, p["r_aw"][i], p["r_ab"][i])
        shift, scale, gate = jnp.split(ada, 3, axis=-1)
        h = layer_norm(xh, p["r_ln_w"][i], p["r_ln_b"][i]) * (1.0 + scale) + shift
        h = lin(silu(lin(h, p["r_mw1"][i], p["r_mb1"][i])), p["r_mw2"][i], p["r_mb2"][i])
        xh = xh + gate * h
    ada = lin(sy, p["f_aw"], p["f_ab"])
    shift, scale = jnp.split(ada, 2, axis=-1)
    h = layer_norm(xh) * (1.0 + scale) + shift
    return lin(h, p["f_lw"], p["f_lb"])


if __name__ == "__main__":
    N, CIN, MC, COUT, CZ, R = 256, 16, 128, 16, 32, 2

    key = jax.random.PRNGKey(0)
    kx, kt, kc, kp = jax.random.split(key, 4)
    x = jax.random.normal(kx, (N, CIN), jnp.float32)
    t = jax.random.uniform(kt, (N,), jnp.float32, 0.0, 1000.0)
    c = jax.random.normal(kc, (N, CZ), jnp.float32)
    params = init_params(kp, CIN, MC, COUT, CZ, R)

    # weights are packed / fused / padded / cast exactly once here (hoisted out of the call path)
    forward = jax.jit(make_forward(params))

    out = jax.block_until_ready(forward(x, t, c))
    ref = reference_forward(x, t, c, params)
    assert out.shape == (N, COUT)
    err = float(jnp.max(jnp.abs(out - ref)))
    # bf16 matmul operands / bf16 SiLU (f32 accumulation) vs f32 reference -> relaxed tolerance
    assert jnp.allclose(out, ref, atol=5e-2, rtol=5e-2), f"max abs err {err}"

    # ragged batch: exercises the partial last grid tile
    N2 = 52
    out2 = jax.block_until_ready(forward(x[:N2], t[:N2], c[:N2]))
    ref2 = reference_forward(x[:N2], t[:N2], c[:N2], params)
    err2 = float(jnp.max(jnp.abs(out2 - ref2)))
    assert out2.shape == (N2, COUT)
    assert jnp.allclose(out2, ref2, atol=5e-2, rtol=5e-2), f"ragged max abs err {err2}"

    print("KERNEL_OK")
</pallas_src>

<mosaic_0001>
module attributes {stable_mosaic.version = 11 : i64} {
  func.func @kernel(%arg0: i32, %arg1: memref<128x128xf32, #tpu.memory_space<vmem>>, %arg2: memref<128x256xf32, #tpu.memory_space<vmem>>, %arg3: memref<128x256xbf16, #tpu.memory_space<vmem>>, %arg4: memref<1x256xf32, #tpu.memory_space<vmem>>, %arg5: memref<256x128xbf16, #tpu.memory_space<vmem>>, %arg6: memref<1x128xf32, #tpu.memory_space<vmem>>, %arg7: memref<128x128xbf16, #tpu.memory_space<vmem>>, %arg8: memref<1x128xf32, #tpu.memory_space<vmem>>, %arg9: memref<128x1024xbf16, #tpu.memory_space<vmem>>, %arg10: memref<1x1024xf32, #tpu.memory_space<vmem>>, %arg11: memref<2x1x128xf32, #tpu.memory_space<vmem>>, %arg12: memref<2x1x128xf32, #tpu.memory_space<vmem>>, %arg13: memref<2x128x128xbf16, #tpu.memory_space<vmem>>, %arg14: memref<2x1x128xf32, #tpu.memory_space<vmem>>, %arg15: memref<2x128x128xbf16, #tpu.memory_space<vmem>>, %arg16: memref<2x1x128xf32, #tpu.memory_space<vmem>>, %arg17: memref<128x128xbf16, #tpu.memory_space<vmem>>, %arg18: memref<1x128xf32, #tpu.memory_space<vmem>>, %arg19: memref<128x128xf32, #tpu.memory_space<vmem>>, %arg20: memref<128x1024xf32, #tpu.memory_space<vmem>>) attributes {dimension_semantics = [#tpu.dimension_semantics<parallel>], iteration_bounds = array<i64: 2>, scalar_prefetch = 0 : i64, scratch_operands = 1 : i64, tpu.core_type = #tpu.core_type<tc>, window_params = [{transform_indices = @transform_0, window_bounds = array<i64: 128, 128>}, {transform_indices = @transform_1, window_bounds = array<i64: 128, 256>}, {pipeline_mode = #tpu.pipeline_mode<synchronous>, transform_indices = @transform_2, window_bounds = array<i64: 128, 256>}, {pipeline_mode = #tpu.pipeline_mode<synchronous>, transform_indices = @transform_3, window_bounds = array<i64: 1, 256>}, {pipeline_mode = #tpu.pipeline_mode<synchronous>, transform_indices = @transform_4, window_bounds = array<i64: 256, 128>}, {pipeline_mode = #tpu.pipeline_mode<synchronous>, transform_indices = @transform_5, window_bounds = array<i64: 1, 128>}, {pipeline_mode = #tpu.pipeline_mode<synchronous>, transform_indices = @transform_6, window_bounds = array<i64: 128, 128>}, {pipeline_mode = #tpu.pipeline_mode<synchronous>, transform_indices = @transform_7, window_bounds = array<i64: 1, 128>}, {pipeline_mode = #tpu.pipeline_mode<synchronous>, transform_indices = @transform_8, window_bounds = array<i64: 128, 1024>}, {pipeline_mode = #tpu.pipeline_mode<synchronous>, transform_indices = @transform_9, window_bounds = array<i64: 1, 1024>}, {pipeline_mode = #tpu.pipeline_mode<synchronous>, transform_indices = @transform_10, window_bounds = array<i64: 2, 1, 128>}, {pipeline_mode = #tpu.pipeline_mode<synchronous>, transform_indices = @transform_11, window_bounds = array<i64: 2, 1, 128>}, {pipeline_mode = #tpu.pipeline_mode<synchronous>, transform_indices = @transform_12, window_bounds = array<i64: 2, 128, 128>}, {pipeline_mode = #tpu.pipeline_mode<synchronous>, transform_indices = @transform_13, window_bounds = array<i64: 2, 1, 128>}, {pipeline_mode = #tpu.pipeline_mode<synchronous>, transform_indices = @transform_14, window_bounds = array<i64: 2, 128, 128>}, {pipeline_mode = #tpu.pipeline_mode<synchronous>, transform_indices = @transform_15, window_bounds = array<i64: 2, 1, 128>}, {pipeline_mode = #tpu.pipeline_mode<synchronous>, transform_indices = @transform_16, window_bounds = array<i64: 128, 128>}, {pipeline_mode = #tpu.pipeline_mode<synchronous>, transform_indices = @transform_17, window_bounds = array<i64: 1, 128>}, {transform_indices = @transform_18, window_bounds = array<i64: 128, 128>}]} {
    %c0 = arith.constant 0 : index
    %c0_0 = arith.constant 0 : index
    %0 = vector.load %arg1[%c0, %c0_0] : memref<128x128xf32, #tpu.memory_space<vmem>>, vector<128x128xf32>
    %c0_1 = arith.constant 0 : index
    %c0_2 = arith.constant 0 : index
    %1 = vector.load %arg3[%c0_1, %c0_2] : memref<128x256xbf16, #tpu.memory_space<vmem>>, vector<128x256xbf16>
    %2 = arith.truncf %0 : vector<128x128xf32> to vector<128x128xbf16>
    %cst = arith.constant dense<0.000000e+00> : vector<128x256xf32>
    %3 = tpu.matmul %2, %1, %cst {dimension_numbers = #tpu.dot_dimension_numbers<[1], [0], [0], [1], [0, 0, 1, 1], [], []>} : vector<128x128xbf16>, vector<128x256xbf16>, vector<128x256xf32> -> vector<128x256xf32>
    %c0_3 = arith.constant 0 : index
    %c0_4 = arith.constant 0 : index
    %4 = vector.load %arg4[%c0_3, %c0_4] : memref<1x256xf32, #tpu.memory_space<vmem>>, vector<1x256xf32>
    %5 = vector.broadcast %4 : vector<1x256xf32> to vector<128x256xf32>
    %6 = arith.addf %3, %5 : vector<128x256xf32>
    %7 = vector.extract_strided_slice %6 {offsets = [0, 0], sizes = [128, 128], strides = [1, 1]} : vector<128x256xf32> to vector<128x128xf32>
    %8 = vector.extract_strided_slice %6 {offsets = [0, 128], sizes = [128, 128], strides = [1, 1]} : vector<128x256xf32> to vector<128x128xf32>
    %c0_5 = arith.constant 0 : index
    %c0_6 = arith.constant 0 : index
    %9 = vector.load %arg2[%c0_5, %c0_6] : memref<128x256xf32, #tpu.memory_space<vmem>>, vector<128x256xf32>
    %c0_7 = arith.constant 0 : index
    %c0_8 = arith.constant 0 : index
    %10 = vector.load %arg5[%c0_7, %c0_8] : memref<256x128xbf16, #tpu.memory_space<vmem>>, vector<256x128xbf16>
    %11 = arith.truncf %9 : vector<128x256xf32> to vector<128x256xbf16>
    %cst_9 = arith.constant dense<0.000000e+00> : vector<128x128xf32>
    %12 = tpu.matmul %11, %10, %cst_9 {dimension_numbers = #tpu.dot_dimension_numbers<[1], [0], [0], [1], [0, 0, 1, 1], [], []>} : vector<128x256xbf16>, vector<256x128xbf16>, vector<128x128xf32> -> vector<128x128xf32>
    %c0_10 = arith.constant 0 : index
    %c0_11 = arith.constant 0 : index
    %13 = vector.load %arg6[%c0_10, %c0_11] : memref<1x128xf32, #tpu.memory_space<vmem>>, vector<1x128xf32>
    %14 = vector.broadcast %13 : vector<1x128xf32> to vector<128x128xf32>
    %15 = arith.addf %12, %14 : vector<128x128xf32>
    %16 = arith.truncf %15 : vector<128x128xf32> to vector<128x128xbf16>
    %17 = arith.negf %16 : vector<128x128xbf16>
    %18 = math.exp %17 : vector<128x128xbf16>
    %cst_12 = arith.constant 1.000000e+00 : bf16
    %19 = vector.broadcast %cst_12 : bf16 to vector<128x128xbf16>
    %20 = arith.addf %19, %18 : vector<128x128xbf16>
    %21 = arith.divf %19, %20 : vector<128x128xbf16>
    %22 = arith.mulf %16, %21 : vector<128x128xbf16>
    %c0_13 = arith.constant 0 : index
    %c0_14 = arith.constant 0 : index
    %23 = vector.load %arg7[%c0_13, %c0_14] : memref<128x128xbf16, #tpu.memory_space<vmem>>, vector<128x128xbf16>
    %cst_15 = arith.constant dense<0.000000e+00> : vector<128x128xf32>
    %24 = tpu.matmul %22, %23, %cst_15 {dimension_numbers = #tpu.dot_dimension_numbers<[1], [0], [0], [1], [0, 0, 1, 1], [], []>} : vector<128x128xbf16>, vector<128x128xbf16>, vector<128x128xf32> -> vector<128x128xf32>
    %c0_16 = arith.constant 0 : index
    %c0_17 = arith.constant 0 : index
    %25 = vector.load %arg8[%c0_16, %c0_17] : memref<1x128xf32, #tpu.memory_space<vmem>>, vector<1x128xf32>
    %26 = vector.broadcast %25 : vector<1x128xf32> to vector<128x128xf32>
    %27 = arith.addf %24, %26 : vector<128x128xf32>
    %28 = arith.addf %27, %8 : vector<128x128xf32>
    %29 = arith.truncf %28 : vector<128x128xf32> to vector<128x128xbf16>
    %30 = arith.negf %29 : vector<128x128xbf16>
    %31 = math.exp %30 : vector<128x128xbf16>
    %cst_18 = arith.constant 1.000000e+00 : bf16
    %32 = vector.broadcast %cst_18 : bf16 to vector<128x128xbf16>
    %33 = arith.addf %32, %31 : vector<128x128xbf16>
    %34 = arith.divf %32, %33 : vector<128x128xbf16>
    %35 = arith.mulf %29, %34 : vector<128x128xbf16>
    %c0_19 = arith.constant 0 : index
    %c0_20 = arith.constant 0 : index
    %36 = vector.load %arg9[%c0_19, %c0_20] : memref<128x1024xbf16, #tpu.memory_space<vmem>>, vector<128x1024xbf16>
    %cst_21 = arith.constant dense<0.000000e+00> : vector<128x1024xf32>
    %37 = tpu.matmul %35, %36, %cst_21 {dimension_numbers = #tpu.dot_dimension_numbers<[1], [0], [0], [1], [0, 0, 1, 1], [], []>} : vector<128x128xbf16>, vector<128x1024xbf16>, vector<128x1024xf32> -> vector<128x1024xf32>
    %c0_22 = arith.constant 0 : index
    %c0_23 = arith.constant 0 : index
    %38 = vector.load %arg10[%c0_22, %c0_23] : memref<1x1024xf32, #tpu.memory_space<vmem>>, vector<1x1024xf32>
    %39 = vector.broadcast %38 : vector<1x1024xf32> to vector<128x1024xf32>
    %40 = arith.addf %37, %39 : vector<128x1024xf32>
    %c0_24 = arith.constant 0 : index
    %c0_25 = arith.constant 0 : index
    %41 = vector.load %arg20[%c0_24, %c0_25] : memref<128x1024xf32, #tpu.memory_space<vmem>>, vector<128x1024xf32>
    tpu.vector_store %arg20[%c0_24, %c0_25], %40 {strides = array<i32>} : memref<128x1024xf32, #tpu.memory_space<vmem>>, vector<128x1024xf32>,
    %c0_26 = arith.constant 0 : index
    %c0_27 = arith.constant 0 : index
    %42 = vector.load %arg20[%c0_26, %c0_27] : memref<128x1024xf32, #tpu.memory_space<vmem>>, vector<128x128xf32>
    %c0_28 = arith.constant 0 : index
    %c128 = arith.constant 128 : index
    %43 = vector.load %arg20[%c0_28, %c128] : memref<128x1024xf32, #tpu.memory_space<vmem>>, vector<128x128xf32>
    %c0_29 = arith.constant 0 : index
    %c256 = arith.constant 256 : index
    %44 = vector.load %arg20[%c0_29, %c256] : memref<128x1024xf32, #tpu.memory_space<vmem>>, vector<128x128xf32>
    %c0_30 = arith.constant 0 : index
    %c0_31 = arith.constant 0 : index
    %c0_32 = arith.constant 0 : index
    %45 = vector.load %arg11[%c0_30, %c0_31, %c0_32] : memref<2x1x128xf32, #tpu.memory_space<vmem>>, vector<1x1x128xf32>
    %46 = vector.shape_cast %45 : vector<1x1x128xf32> to vector<1x128xf32>
    %c0_33 = arith.constant 0 : index
    %c0_34 = arith.constant 0 : index
    %c0_35 = arith.constant 0 : index
    %47 = vector.load %arg12[%c0_33, %c0_34, %c0_35] : memref<2x1x128xf32, #tpu.memory_space<vmem>>, vector<1x1x128xf32>
    %48 = vector.shape_cast %47 : vector<1x1x128xf32> to vector<1x128xf32>
    %cst_36 = arith.constant dense<0.000000e+00> : vector<128xf32>
    %49 = vector.multi_reduction <add>, %7, %cst_36 [1] : vector<128x128xf32> to vector<128xf32>
    %50 = vector.shape_cast %49 : vector<128xf32> to vector<128x1xf32>
    %cst_37 = arith.constant 1.280000e+02 : f32
    %51 = vector.broadcast %cst_37 : f32 to vector<128x1xf32>
    %52 = arith.divf %50, %51 : vector<128x1xf32>
    %53 = vector.broadcast %52 : vector<128x1xf32> to vector<128x128xf32>
    %54 = arith.subf %7, %53 : vector<128x128xf32>
    %55 = arith.mulf %54, %54 : vector<128x128xf32>
    %cst_38 = arith.constant dense<0.000000e+00> : vector<128xf32>
    %56 = vector.multi_reduction <add>, %55, %cst_38 [1] : vector<128x128xf32> to vector<128xf32>
    %57 = vector.shape_cast %56 : vector<128xf32> to vector<128x1xf32>
    %cst_39 = arith.constant 1.280000e+02 : f32
    %58 = vector.broadcast %cst_39 : f32 to vector<128x1xf32>
    %59 = arith.divf %57, %58 : vector<128x1xf32>
    %cst_40 = arith.constant 9.99999997E-7 : f32
    %60 = vector.broadcast %cst_40 : f32 to vector<128x1xf32>
    %61 = arith.addf %59, %60 : vector<128x1xf32>
    %62 = math.rsqrt %61 : vector<128x1xf32>
    %63 = vector.broadcast %62 : vector<128x1xf32> to vector<128x128xf32>
    %64 = arith.mulf %54, %63 : vector<128x128xf32>
    %65 = vector.broadcast %46 : vector<1x128xf32> to vector<128x128xf32>
    %66 = arith.mulf %64, %65 : vector<128x128xf32>
    %67 = vector.broadcast %48 : vector<1x128xf32> to vector<128x128xf32>
    %68 = arith.addf %66, %67 : vector<128x128xf32>
    %cst_41 = arith.constant 1.000000e+00 : f32
    %69 = vector.broadcast %cst_41 : f32 to vector<128x128xf32>
    %70 = arith.addf %69, %43 : vector<128x128xf32>
    %71 = arith.mulf %68, %70 : vector<128x128xf32>
    %72 = arith.addf %71, %42 : vector<128x128xf32>
    %c0_42 = arith.constant 0 : index
    %c0_43 = arith.constant 0 : index
    %c0_44 = arith.constant 0 : index
    %73 = vector.load %arg13[%c0_42, %c0_43, %c0_44] : memref<2x128x128xbf16, #tpu.memory_space<vmem>>, vector<1x128x128xbf16>
    %74 = vector.shape_cast %73 : vector<1x128x128xbf16> to vector<128x128xbf16>
    %75 = arith.truncf %72 : vector<128x128xf32> to vector<128x128xbf16>
    %cst_45 = arith.constant dense<0.000000e+00> : vector<128x128xf32>
    %76 = tpu.matmul %75, %74, %cst_45 {dimension_numbers = #tpu.dot_dimension_numbers<[1], [0], [0], [1], [0, 0, 1, 1], [], []>} : vector<128x128xbf16>, vector<128x128xbf16>, vector<128x128xf32> -> vector<128x128xf32>
    %c0_46 = arith.constant 0 : index
    %c0_47 = arith.constant 0 : index
    %c0_48 = arith.constant 0 : index
    %77 = vector.load %arg14[%c0_46, %c0_47, %c0_48] : memref<2x1x128xf32, #tpu.memory_space<vmem>>, vector<1x1x128xf32>
    %78 = vector.shape_cast %77 : vector<1x1x128xf32> to vector<1x128xf32>
    %79 = vector.broadcast %78 : vector<1x128xf32> to vector<128x128xf32>
    %80 = arith.addf %76, %79 : vector<128x128xf32>
    %81 = arith.truncf %80 : vector<128x128xf32> to vector<128x128xbf16>
    %82 = arith.negf %81 : vector<128x128xbf16>
    %83 = math.exp %82 : vector<128x128xbf16>
    %cst_49 = arith.constant 1.000000e+00 : bf16
    %84 = vector.broadcast %cst_49 : bf16 to vector<128x128xbf16>
    %85 = arith.addf %84, %83 : vector<128x128xbf16>
    %86 = arith.divf %84, %85 : vector<128x128xbf16>
    %87 = arith.mulf %81, %86 : vector<128x128xbf16>
    %c0_50 = arith.constant 0 : index
    %c0_51 = arith.constant 0 : index
    %c0_52 = arith.constant 0 : index
    %88 = vector.load %arg15[%c0_50, %c0_51, %c0_52] : memref<2x128x128xbf16, #tpu.memory_space<vmem>>, vector<1x128x128xbf16>
    %89 = vector.shape_cast %88 : vector<1x128x128xbf16> to vector<128x128xbf16>
    %cst_53 = arith.constant dense<0.000000e+00> : vector<128x128xf32>
    %90 = tpu.matmul %87, %89, %cst_53 {dimension_numbers = #tpu.dot_dimension_numbers<[1], [0], [0], [1], [0, 0, 1, 1], [], []>} : vector<128x128xbf16>, vector<128x128xbf16>, vector<128x128xf32> -> vector<128x128xf32>
    %c0_54 = arith.constant 0 : index
    %c0_55 = arith.constant 0 : index
    %c0_56 = arith.constant 0 : index
    %91 = vector.load %arg16[%c0_54, %c0_55, %c0_56] : memref<2x1x128xf32, #tpu.memory_space<vmem>>, vector<1x1x128xf32>
    %92 = vector.shape_cast %91 : vector<1x1x128xf32> to vector<1x128xf32>
    %93 = vector.broadcast %92 : vector<1x128xf32> to vector<128x128xf32>
    %94 = arith.addf %90, %93 : vector<128x128xf32>
    %95 = arith.mulf %44, %94 : vector<128x128xf32>
    %96 = arith.addf %7, %95 : vector<128x128xf32>
    %c0_57 = arith.constant 0 : index
    %c384 = arith.constant 384 : index
    %97 = vector.load %arg20[%c0_57, %c384] : memref<128x1024xf32, #tpu.memory_space<vmem>>, vector<128x128xf32>
    %c0_58 = arith.constant 0 : index
    %c512 = arith.constant 512 : index
    %98 = vector.load %arg20[%c0_58, %c512] : memref<128x1024xf32, #tpu.memory_space<vmem>>, vector<128x128xf32>
    %c0_59 = arith.constant 0 : index
    %c640 = arith.constant 640 : index
    %99 = vector.load %arg20[%c0_59, %c640] : memref<128x1024xf32, #tpu.memory_space<vmem>>, vector<128x128xf32>
    %c1 = arith.constant 1 : index
    %c0_60 = arith.constant 0 : index
    %c0_61 = arith.constant 0 : index
    %100 = vector.load %arg11[%c1, %c0_60, %c0_61] : memref<2x1x128xf32, #tpu.memory_space<vmem>>, vector<1x1x128xf32>
    %101 = vector.shape_cast %100 : vector<1x1x128xf32> to vector<1x128xf32>
    %c1_62 = arith.constant 1 : index
    %c0_63 = arith.constant 0 : index
    %c0_64 = arith.constant 0 : index
    %102 = vector.load %arg12[%c1_62, %c0_63, %c0_64] : memref<2x1x128xf32, #tpu.memory_space<vmem>>, vector<1x1x128xf32>
    %103 = vector.shape_cast %102 : vector<1x1x128xf32> to vector<1x128xf32>
    %cst_65 = arith.constant dense<0.000000e+00> : vector<128xf32>
    %104 = vector.multi_reduction <add>, %96, %cst_65 [1] : vector<128x128xf32> to vector<128xf32>
    %105 = vector.shape_cast %104 : vector<128xf32> to vector<128x1xf32>
    %cst_66 = arith.constant 1.280000e+02 : f32
    %106 = vector.broadcast %cst_66 : f32 to vector<128x1xf32>
    %107 = arith.divf %105, %106 : vector<128x1xf32>
    %108 = vector.broadcast %107 : vector<128x1xf32> to vector<128x128xf32>
    %109 = arith.subf %96, %108 : vector<128x128xf32>
    %110 = arith.mulf %109, %109 : vector<128x128xf32>
    %cst_67 = arith.constant dense<0.000000e+00> : vector<128xf32>
    %111 = vector.multi_reduction <add>, %110, %cst_67 [1] : vector<128x128xf32> to vector<128xf32>
    %112 = vector.shape_cast %111 : vector<128xf32> to vector<128x1xf32>
    %cst_68 = arith.constant 1.280000e+02 : f32
    %113 = vector.broadcast %cst_68 : f32 to vector<128x1xf32>
    %114 = arith.divf %112, %113 : vector<128x1xf32>
    %cst_69 = arith.constant 9.99999997E-7 : f32
    %115 = vector.broadcast %cst_69 : f32 to vector<128x1xf32>
    %116 = arith.addf %114, %115 : vector<128x1xf32>
    %117 = math.rsqrt %116 : vector<128x1xf32>
    %118 = vector.broadcast %117 : vector<128x1xf32> to vector<128x128xf32>
    %119 = arith.mulf %109, %118 : vector<128x128xf32>
    %120 = vector.broadcast %101 : vector<1x128xf32> to vector<128x128xf32>
    %121 = arith.mulf %119, %120 : vector<128x128xf32>
    %122 = vector.broadcast %103 : vector<1x128xf32> to vector<128x128xf32>
    %123 = arith.addf %121, %122 : vector<128x128xf32>
    %cst_70 = arith.constant 1.000000e+00 : f32
    %124 = vector.broadcast %cst_70 : f32 to vector<128x128xf32>
    %125 = arith.addf %124, %98 : vector<128x128xf32>
    %126 = arith.mulf %123, %125 : vector<128x128xf32>
    %127 = arith.addf %126, %97 : vector<128x128xf32>
    %c1_71 = arith.constant 1 : index
    %c0_72 = arith.constant 0 : index
    %c0_73 = arith.constant 0 : index
    %128 = vector.load %arg13[%c1_71, %c0_72, %c0_73] : memref<2x128x128xbf16, #tpu.memory_space<vmem>>, vector<1x128x128xbf16>
    %129 = vector.shape_cast %128 : vector<1x128x128xbf16> to vector<128x128xbf16>
    %130 = arith.truncf %127 : vector<128x128xf32> to vector<128x128xbf16>
    %cst_74 = arith.constant dense<0.000000e+00> : vector<128x128xf32>
    %131 = tpu.matmul %130, %129, %cst_74 {dimension_numbers = #tpu.dot_dimension_numbers<[1], [0], [0], [1], [0, 0, 1, 1], [], []>} : vector<128x128xbf16>, vector<128x128xbf16>, vector<128x128xf32> -> vector<128x128xf32>
    %c1_75 = arith.constant 1 : index
    %c0_76 = arith.constant 0 : index
    %c0_77 = arith.constant 0 : index
    %132 = vector.load %arg14[%c1_75, %c0_76, %c0_77] : memref<2x1x128xf32, #tpu.memory_space<vmem>>, vector<1x1x128xf32>
    %133 = vector.shape_cast %132 : vector<1x1x128xf32> to vector<1x128xf32>
    %134 = vector.broadcast %133 : vector<1x128xf32> to vector<128x128xf32>
    %135 = arith.addf %131, %134 : vector<128x128xf32>
    %136 = arith.truncf %135 : vector<128x128xf32> to vector<128x128xbf16>
    %137 = arith.negf %136 : vector<128x128xbf16>
    %138 = math.exp %137 : vector<128x128xbf16>
    %cst_78 = arith.constant 1.000000e+00 : bf16
    %139 = vector.broadcast %cst_78 : bf16 to vector<128x128xbf16>
    %140 = arith.addf %139, %138 : vector<128x128xbf16>
    %141 = arith.divf %139, %140 : vector<128x128xbf16>
    %142 = arith.mulf %136, %141 : vector<128x128xbf16>
    %c1_79 = arith.constant 1 : index
    %c0_80 = arith.constant 0 : index
    %c0_81 = arith.constant 0 : index
    %143 = vector.load %arg15[%c1_79, %c0_80, %c0_81] : memref<2x128x128xbf16, #tpu.memory_space<vmem>>, vector<1x128x128xbf16>
    %144 = vector.shape_cast %143 : vector<1x128x128xbf16> to vector<128x128xbf16>
    %cst_82 = arith.constant dense<0.000000e+00> : vector<128x128xf32>
    %145 = tpu.matmul %142, %144, %cst_82 {dimension_numbers = #tpu.dot_dimension_numbers<[1], [0], [0], [1], [0, 0, 1, 1], [], []>} : vector<128x128xbf16>, vector<128x128xbf16>, vector<128x128xf32> -> vector<128x128xf32>
    %c1_83 = arith.constant 1 : index
    %c0_84 = arith.constant 0 : index
    %c0_85 = arith.constant 0 : index
    %146 = vector.load %arg16[%c1_83, %c0_84, %c0_85] : memref<2x1x128xf32, #tpu.memory_space<vmem>>, vector<1x1x128xf32>
    %147 = vector.shape_cast %146 : vector<1x1x128xf32> to vector<1x128xf32>
    %148 = vector.broadcast %147 : vector<1x128xf32> to vector<128x128xf32>
    %149 = arith.addf %145, %148 : vector<128x128xf32>
    %150 = arith.mulf %99, %149 : vector<128x128xf32>
    %151 = arith.addf %96, %150 : vector<128x128xf32>
    %c0_86 = arith.constant 0 : index
    %c768 = arith.constant 768 : index
    %152 = vector.load %arg20[%c0_86, %c768] : memref<128x1024xf32, #tpu.memory_space<vmem>>, vector<128x128xf32>
    %c0_87 = arith.constant 0 : index
    %c896 = arith.constant 896 : index
    %153 = vector.load %arg20[%c0_87, %c896] : memref<128x1024xf32, #tpu.memory_space<vmem>>, vector<128x128xf32>
    %cst_88 = arith.constant dense<0.000000e+00> : vector<128xf32>
    %154 = vector.multi_reduction <add>, %151, %cst_88 [1] : vector<128x128xf32> to vector<128xf32>
    %155 = vector.shape_cast %154 : vector<128xf32> to vector<128x1xf32>
    %cst_89 = arith.constant 1.280000e+02 : f32
    %156 = vector.broadcast %cst_89 : f32 to vector<128x1xf32>
    %157 = arith.divf %155, %156 : vector<128x1xf32>
    %158 = vector.broadcast %157 : vector<128x1xf32> to vector<128x128xf32>
    %159 = arith.subf %151, %158 : vector<128x128xf32>
    %160 = arith.mulf %159, %159 : vector<128x128xf32>
    %cst_90 = arith.constant dense<0.000000e+00> : vector<128xf32>
    %161 = vector.multi_reduction <add>, %160, %cst_90 [1] : vector<128x128xf32> to vector<128xf32>
    %162 = vector.shape_cast %161 : vector<128xf32> to vector<128x1xf32>
    %cst_91 = arith.constant 1.280000e+02 : f32
    %163 = vector.broadcast %cst_91 : f32 to vector<128x1xf32>
    %164 = arith.divf %162, %163 : vector<128x1xf32>
    %cst_92 = arith.constant 9.99999997E-7 : f32
    %165 = vector.broadcast %cst_92 : f32 to vector<128x1xf32>
    %166 = arith.addf %164, %165 : vector<128x1xf32>
    %167 = math.rsqrt %166 : vector<128x1xf32>
    %168 = vector.broadcast %167 : vector<128x1xf32> to vector<128x128xf32>
    %169 = arith.mulf %159, %168 : vector<128x128xf32>
    %cst_93 = arith.constant 1.000000e+00 : f32
    %170 = vector.broadcast %cst_93 : f32 to vector<128x128xf32>
    %171 = arith.addf %170, %153 : vector<128x128xf32>
    %172 = arith.mulf %169, %171 : vector<128x128xf32>
    %173 = arith.addf %172, %152 : vector<128x128xf32>
    %c0_94 = arith.constant 0 : index
    %c0_95 = arith.constant 0 : index
    %174 = vector.load %arg17[%c0_94, %c0_95] : memref<128x128xbf16, #tpu.memory_space<vmem>>, vector<128x128xbf16>
    %175 = arith.truncf %173 : vector<128x128xf32> to vector<128x128xbf16>
    %cst_96 = arith.constant dense<0.000000e+00> : vector<128x128xf32>
    %176 = tpu.matmul %175, %174, %cst_96 {dimension_numbers = #tpu.dot_dimension_numbers<[1], [0], [0], [1], [0, 0, 1, 1], [], []>} : vector<128x128xbf16>, vector<128x128xbf16>, vector<128x128xf32> -> vector<128x128xf32>
    %c0_97 = arith.constant 0 : index
    %c0_98 = arith.constant 0 : index
    %177 = vector.load %arg18[%c0_97, %c0_98] : memref<1x128xf32, #tpu.memory_space<vmem>>, vector<1x128xf32>
    %178 = vector.broadcast %177 : vector<1x128xf32> to vector<128x128xf32>
    %179 = arith.addf %176, %178 : vector<128x128xf32>
    %c0_99 = arith.constant 0 : index
    %c0_100 = arith.constant 0 : index
    %180 = vector.load %arg19[%c0_99, %c0_100] : memref<128x128xf32, #tpu.memory_space<vmem>>, vector<128x128xf32>
    tpu.vector_store %arg19[%c0_99, %c0_100], %179 {strides = array<i32>} : memref<128x128xf32, #tpu.memory_space<vmem>>, vector<128x128xf32>,
    return
  }
  func.func @transform_0(%arg0: i32) -> (i32, i32) {
    %c0_i32 = arith.constant 0 : i32
    %c0_i32_0 = arith.constant 0 : i32
    return %arg0, %c0_i32 : i32, i32
  }
  func.func @transform_1(%arg0: i32) -> (i32, i32) {
    %c0_i32 = arith.constant 0 : i32
    %c0_i32_0 = arith.constant 0 : i32
    return %arg0, %c0_i32 : i32, i32
  }
  func.func @transform_2(%arg0: i32) -> (i32, i32) {
    %c0_i32 = arith.constant 0 : i32
    %c0_i32_0 = arith.constant 0 : i32
    %c0_i32_1 = arith.constant 0 : i32
    return %c0_i32, %c0_i32_0 : i32, i32
  }
  func.func @transform_3(%arg0: i32) -> (i32, i32) {
    %c0_i32 = arith.constant 0 : i32
    %c0_i32_0 = arith.constant 0 : i32
    %c0_i32_1 = arith.constant 0 : i32
    return %c0_i32, %c0_i32_0 : i32, i32
  }
  func.func @transform_4(%arg0: i32) -> (i32, i32) {
    %c0_i32 = arith.constant 0 : i32
    %c0_i32_0 = arith.constant 0 : i32
    %c0_i32_1 = arith.constant 0 : i32
    return %c0_i32, %c0_i32_0 : i32, i32
  }
  func.func @transform_5(%arg0: i32) -> (i32, i32) {
    %c0_i32 = arith.constant 0 : i32
    %c0_i32_0 = arith.constant 0 : i32
    %c0_i32_1 = arith.constant 0 : i32
    return %c0_i32, %c0_i32_0 : i32, i32
  }
  func.func @transform_6(%arg0: i32) -> (i32, i32) {
    %c0_i32 = arith.constant 0 : i32
    %c0_i32_0 = arith.constant 0 : i32
    %c0_i32_1 = arith.constant 0 : i32
    return %c0_i32, %c0_i32_0 : i32, i32
  }
  func.func @transform_7(%arg0: i32) -> (i32, i32) {
    %c0_i32 = arith.constant 0 : i32
    %c0_i32_0 = arith.constant 0 : i32
    %c0_i32_1 = arith.constant 0 : i32
    return %c0_i32, %c0_i32_0 : i32, i32
  }
  func.func @transform_8(%arg0: i32) -> (i32, i32) {
    %c0_i32 = arith.constant 0 : i32
    %c0_i32_0 = arith.constant 0 : i32
    %c0_i32_1 = arith.constant 0 : i32
    return %c0_i32, %c0_i32_0 : i32, i32
  }
  func.func @transform_9(%arg0: i32) -> (i32, i32) {
    %c0_i32 = arith.constant 0 : i32
    %c0_i32_0 = arith.constant 0 : i32
    %c0_i32_1 = arith.constant 0 : i32
    return %c0_i32, %c0_i32_0 : i32, i32
  }
  func.func @transform_10(%arg0: i32) -> (i32, i32, i32) {
    %c0_i32 = arith.constant 0 : i32
    %c0_i32_0 = arith.constant 0 : i32
    %c0_i32_1 = arith.constant 0 : i32
    %c0_i32_2 = arith.constant 0 : i32
    return %c0_i32, %c0_i32_0, %c0_i32_1 : i32, i32, i32
  }
  func.func @transform_11(%arg0: i32) -> (i32, i32, i32) {
    %c0_i32 = arith.constant 0 : i32
    %c0_i32_0 = arith.constant 0 : i32
    %c0_i32_1 = arith.constant 0 : i32
    %c0_i32_2 = arith.constant 0 : i32
    return %c0_i32, %c0_i32_0, %c0_i32_1 : i32, i32, i32
  }
  func.func @transform_12(%arg0: i32) -> (i32, i32, i32) {
    %c0_i32 = arith.constant 0 : i32
    %c0_i32_0 = arith.constant 0 : i32
    %c0_i32_1 = arith.constant 0 : i32
    %c0_i32_2 = arith.constant 0 : i32
    return %c0_i32, %c0_i32_0, %c0_i32_1 : i32, i32, i32
  }
  func.func @transform_13(%arg0: i32) -> (i32, i32, i32) {
    %c0_i32 = arith.constant 0 : i32
    %c0_i32_0 = arith.constant 0 : i32
    %c0_i32_1 = arith.constant 0 : i32
    %c0_i32_2 = arith.constant 0 : i32
    return %c0_i32, %c0_i32_0, %c0_i32_1 : i32, i32, i32
  }
  func.func @transform_14(%arg0: i32) -> (i32, i32, i32) {
    %c0_i32 = arith.constant 0 : i32
    %c0_i32_0 = arith.constant 0 : i32
    %c0_i32_1 = arith.constant 0 : i32
    %c0_i32_2 = arith.constant 0 : i32
    return %c0_i32, %c0_i32_0, %c0_i32_1 : i32, i32, i32
  }
  func.func @transform_15(%arg0: i32) -> (i32, i32, i32) {
    %c0_i32 = arith.constant 0 : i32
    %c0_i32_0 = arith.constant 0 : i32
    %c0_i32_1 = arith.constant 0 : i32
    %c0_i32_2 = arith.constant 0 : i32
    return %c0_i32, %c0_i32_0, %c0_i32_1 : i32, i32, i32
  }
  func.func @transform_16(%arg0: i32) -> (i32, i32) {
    %c0_i32 = arith.constant 0 : i32
    %c0_i32_0 = arith.constant 0 : i32
    %c0_i32_1 = arith.constant 0 : i32
    return %c0_i32, %c0_i32_0 : i32, i32
  }
  func.func @transform_17(%arg0: i32) -> (i32, i32) {
    %c0_i32 = arith.constant 0 : i32
    %c0_i32_0 = arith.constant 0 : i32
    %c0_i32_1 = arith.constant 0 : i32
    return %c0_i32, %c0_i32_0 : i32, i32
  }
  func.func @transform_18(%arg0: i32) -> (i32, i32) {
    %c0_i32 = arith.constant 0 : i32
    %c0_i32_0 = arith.constant 0 : i32
    return %arg0, %c0_i32 : i32, i32
  }
}

</mosaic_0001>

<bundles_post_ra>
// kernel: forward.1
= control target key start
LH: loop header
LB: loop body
LE: loop exit
PB: predicated region body
PF: predicated region fallthrough
CT: control target
= control target key end

     0   :  { %s5537_s27 = smov 0   ;;  %s7452_s0 = inlined_call_operand.vmem [shape: f32[256,128], index: 0, kind: input, shape index: {}]   ;;  %s7453_s1 = inlined_call_operand.vmem [shape: f32[256,256], index: 1, kind: input, shape index: {}]   ;;  %s7454_s2 = inlined_call_operand.vmem [shape: bf16[128,256], index: 2, kind: input, shape index: {}]   ;;  %s7455_s3 = inlined_call_operand.vmem [shape: f32[1,256], index: 3, kind: input, shape index: {}]   ;;  %s7456_s4 = inlined_call_operand.vmem [shape: bf16[256,128], index: 4, kind: input, shape index: {}]   ;;  %s7457_s5 = inlined_call_operand.vmem [shape: f32[1,128], index: 5, kind: input, shape index: {}, may-alias: {5,7,17}]   ;;  %s7458_s6 = inlined_call_operand.vmem [shape: bf16[128,128], index: 6, kind: input, shape index: {}]   ;;  %s7459_s7 = inlined_call_operand.vmem [shape: f32[1,128], index: 7, kind: input, shape index: {}, may-alias: {5,7,17}]   ;;  %s7460_s8 = inlined_call_operand.vmem [shape: bf16[128,1024], index: 8, kind: input, shape index: {}]   ;;  %s7461_s9 = inlined_call_operand.vmem [shape: f32[1,1024], index: 9, kind: input, shape index: {}]   ;;  %s7462_s10 = inlined_call_operand.vmem [shape: f32[2,1,128], index: 10, kind: input, shape index: {}]   ;;  %s7463_s11 = inlined_call_operand.vmem [shape: f32[2,1,128], index: 11, kind: input, shape index: {}, may-alias: {11,13,15}]   ;;  %s7464_s12 = inlined_call_operand.vmem [shape: bf16[2,128,128], index: 12, kind: input, shape index: {}]   ;;  %s7465_s13 = inlined_call_operand.vmem [shape: f32[2,1,128], index: 13, kind: input, shape index: {}, may-alias: {11,13,15}]   ;;  %s7466_s14 = inlined_call_operand.vmem [shape: bf16[2,128,128], index: 14, kind: input, shape index: {}]   ;;  %s7467_s15 = inlined_call_operand.vmem [shape: f32[2,1,128], index: 15, kind: input, shape index: {}, may-alias: {11,13,15}]   ;;  %s7468_s16 = inlined_call_operand.vmem [shape: bf16[128,128], index: 16, kind: input, shape index: {}]   ;;  %s7469_s17 = inlined_call_operand.vmem [shape: f32[1,128], index: 17, kind: input, shape index: {}, may-alias: {5,7,17}]   ;;  %s7470_s18 = inlined_call_operand.vmem [shape: f32[256,128], index: 18, kind: output, shape index: {}]  }
   0x1   :  { %7485 = sst [smem:[#allocation79_spill]] %s7452_s0 }
   0x2   :  { %7486 = sst [smem:[#allocation80_spill]] %s7453_s1 }
   0x3   :  { %7487 = sst [smem:[#allocation81_spill]] %s7454_s2 }
   0x4 LB: > { %s4520_s28 = sadd.s32 4294967295, %s5439_s27   ;;  %p4524_p0 = scmp.ge.s32.totalorder %s5439_s27, 1  ;;  %s5439_s27 = sphi %s5537_s27, %s28_s27  }
   0x5   : > { %p525_p1 = scmp.lt.s32.totalorder %s5439_s27, 3 }
   0x7   : > { %p526_p2 = pnand %p4524_p0, %p525_p1 }
   0x9   : > { %529 = sbr.rel (%p526_p2) target bundleno = 2647 (0xa57), region = 92 }
  0x10   : > { %s7488_s0 = sld [smem:[#allocation81_spill]]  ;;  %v5121_v1 = vld [vmem:[%s7456_s4 + $0x40] sm:$0xff]   ;;  %v7473_v2 = vmov 0   ;;  %v5126_v6 = vld [vmem:[%s7456_s4 + $0x48] sm:$0xff]   ;;  %v5131_v10 = vld [vmem:[%s7456_s4 + $0x50] sm:$0xff]   ;;  %s4525_s25 = sshll.u32 %s4520_s28, 4 }
  0x11   : > { %770 = vmatprep.mubr.bf16.mxu0 %v7473_v2  ;;  %4758 = vmatprep.subr.bf16.mxu1 %v5121_v1  ;;  %v5123_v4 = vld [vmem:[%s7456_s4] sm:$0xff]   ;;  %v5128_v8 = vld [vmem:[%s7456_s4 + $0x8] sm:$0xff]   ;;  %v5133_v12 = vld [vmem:[%s7456_s4 + $0x10] sm:$0xff]   ;;  %p586_p3 = scmp.lt.s32.totalorder %s4525_s25, 31  ;;  %s7489_s23 = sld [smem:[#allocation80_spill]] }
  0x12   : > { %4759 = vmatpush3.bf16.msra.mxu1 %v5123_v4  ;;  %v5136_v14 = vld [vmem:[%s7456_s4 + $0x58] sm:$0xff]   ;;  %v5141_v18 = vld [vmem:[%s7456_s4 + $0x60] sm:$0xff]   ;;  %v5146_v22 = vld [vmem:[%s7456_s4 + $0x68] sm:$0xff]   ;;  %s7490_s2 = sld [smem:[#allocation79_spill]] }
  0x13   : > { %4760 = vmatprep.subr.bf16.mxu1 %v5126_v6  ;;  %v5138_v16 = vld [vmem:[%s7456_s4 + $0x18] sm:$0xff]   ;;  %v5143_v20 = vld [vmem:[%s7456_s4 + $0x20] sm:$0xff]   ;;  %s7653_s25 = smov (!%p586_p3, %s4525_s25), 31  ;;  %v5148_v24 = vld [vmem:[%s7456_s4 + $0x28] sm:$0xff]  }
  0x14   : > { %s4757_s30 = sshll.u32 %s7653_s25, 4  ;;  %v5151_v26 = vld [vmem:[%s7456_s4 + $0x70] sm:$0xff]   ;;  %s4526_s22 = sshll.u32 %s7653_s25, 3  ;;  %v5156_v30 = vld [vmem:[%s7456_s4 + $0x78] sm:$0xff]   ;;  %v5159_v58 = vld [vmem:[%s7458_s6] sm:$0xff]  }
  0x15   : > { %v5153_v28 = vld [vmem:[%s7456_s4 + $0x30] sm:$0xff]   ;;  %v5158_v37 = vld [vmem:[%s7456_s4 + $0x38] sm:$0xff]   ;;  %v5160_v61 = vld [vmem:[%s7458_s6 + $0x8] sm:$0xff]   ;;  %s7431_s26 = scalar_lea.vmem %s7470_s18, %s4526_s22 }
  0x16   : > { %v5119_v0 = vld [vmem:[%s7488_s0 + $0x4] ss:$8 sps:$4 sm:$0xff]   ;;  %v5122_v3 = vld [vmem:[%s7488_s0] ss:$8 sps:$4 sm:$0xff]   ;;  %v5124_v5 = vld [vmem:[%s7488_s0 + $0x14] ss:$8 sps:$4 sm:$0xff]   ;;  %4761 = vmatpush3.bf16.msra.mxu1 %v5128_v8 }
  0x17   : > { %738 = vmatprep.subr.bf16.mxu0 %v5119_v0  ;;  %v5127_v7 = vld [vmem:[%s7488_s0 + $0x10] ss:$8 sps:$4 sm:$0xff]   ;;  %v5129_v9 = vld [vmem:[%s7488_s0 + $0x24] ss:$8 sps:$4 sm:$0xff]   ;;  %v5132_v11 = vld [vmem:[%s7488_s0 + $0x20] ss:$8 sps:$4 sm:$0xff]   ;;  %4762 = vmatprep.subr.bf16.mxu1 %v5131_v10  ;;  %s5631_s24 = scalar_lea.vmem %s7489_s23, %s4757_s30 }
  0x18   : > { %739 = vmatpush1.bf16.msra.mxu0 %v5122_v3  ;;  %v5134_v13 = vld [vmem:[%s7488_s0 + $0x34] ss:$8 sps:$4 sm:$0xff]   ;;  %v5137_v15 = vld [vmem:[%s7488_s0 + $0x30] ss:$8 sps:$4 sm:$0xff]   ;;  %v5139_v17 = vld [vmem:[%s7488_s0 + $0x44] ss:$8 sps:$4 sm:$0xff]   ;;  %s5647_s23 = scalar_lea.vmem %s7490_s2, %s4526_s22 }
  0x19   : > { %740 = vmatprep.subr.bf16.mxu0 %v5124_v5  ;;  %v5142_v19 = vld [vmem:[%s7488_s0 + $0x40] ss:$8 sps:$4 sm:$0xff]   ;;  %v5144_v21 = vld [vmem:[%s7488_s0 + $0x54] ss:$8 sps:$4 sm:$0xff]   ;;  %v5147_v23 = vld [vmem:[%s7488_s0 + $0x50] ss:$8 sps:$4 sm:$0xff]  }
  0x1a   : > { %4763 = vmatpush3.bf16.msra.mxu1 %v5133_v12  ;;  %v5149_v25 = vld [vmem:[%s7488_s0 + $0x64] ss:$8 sps:$4 sm:$0xff]   ;;  %v5152_v27 = vld [vmem:[%s7488_s0 + $0x60] ss:$8 sps:$4 sm:$0xff]   ;;  %v5154_v29 = vld [vmem:[%s7488_s0 + $0x74] ss:$8 sps:$4 sm:$0xff]  }
  0x1b   : > { %4764 = vmatprep.subr.bf16.mxu1 %v5136_v14  ;;  %v852_v31 = vld [vmem:[%s5631_s24 + $0x8] sm:$0xff]  ;;  %v854_v32 = vld [vmem:[%s5631_s24 + $0x18] sm:$0xff]  ;;  %v606_v35 = vld [vmem:[%s5647_s23] sm:$0xff] }
  0x1c   : > { %741 = vmatpush1.bf16.msra.mxu0 %v5127_v7  ;;  %v5157_v33 = vld [vmem:[%s7488_s0 + $0x70] ss:$8 sps:$4 sm:$0xff]   ;;  %v916_v34 = vpack.c.bf16 %v854_v32, %v852_v31  ;;  %v607_v36 = vld [vmem:[%s5647_s23 + $0x8] sm:$0xff]  ;;  %v851_v38 = vld [vmem:[%s5631_s24] sm:$0xff] }
  0x1d   : > { %742 = vmatprep.subr.bf16.mxu0 %v5129_v9  ;;  %v853_v39 = vld [vmem:[%s5631_s24 + $0x10] sm:$0xff]  ;;  %v856_v40 = vld [vmem:[%s5631_s24 + $0x28] sm:$0xff]  ;;  %v858_v41 = vld [vmem:[%s5631_s24 + $0x38] sm:$0xff]  ;;  %v638_v42 = vpack.c.bf16 %v607_v36, %v606_v35 }
  0x1e   : > { %4765 = vmatpush3.bf16.msra.mxu1 %v5138_v16  ;;  %1066 = vmatprep.mubr.bf16.mxu1 %v916_v34  ;;  %v915_v43 = vpack.c.bf16 %v853_v39, %v851_v38  ;;  %v918_v44 = vpack.c.bf16 %v858_v41, %v856_v40  ;;  %v608_v45 = vld [vmem:[%s5647_s23 + $0x10] sm:$0xff]  ;;  %v609_v46 = vld [vmem:[%s5647_s23 + $0x18] sm:$0xff]  ;;  %v855_v47 = vld [vmem:[%s5631_s24 + $0x20] sm:$0xff] }
  0x1f   : > { %4766 = vmatprep.subr.bf16.mxu1 %v5141_v18  ;;  %v857_v48 = vld [vmem:[%s5631_s24 + $0x30] sm:$0xff]  ;;  %v860_v49 = vld [vmem:[%s5631_s24 + $0x48] sm:$0xff]  ;;  %v862_v50 = vld [vmem:[%s5631_s24 + $0x58] sm:$0xff]  ;;  %v639_v51 = vpack.c.bf16 %v609_v46, %v608_v45 }
  0x20   : > { %743 = vmatpush1.bf16.msra.mxu0 %v5132_v11  ;;  %v917_v52 = vpack.c.bf16 %v857_v48, %v855_v47  ;;  %v920_v53 = vpack.c.bf16 %v862_v50, %v860_v49  ;;  %v610_v54 = vld [vmem:[%s5647_s23 + $0x20] sm:$0xff]  ;;  %v611_v55 = vld [vmem:[%s5647_s23 + $0x28] sm:$0xff]  ;;  %v861_v57 = vld [vmem:[%s5631_s24 + $0x50] sm:$0xff]  ;;  %v648_v50 = vlaneseq }
  0x21   : > { %744 = vmatprep.subr.bf16.mxu0 %v5134_v13  ;;  %v859_v56 = vld [vmem:[%s5631_s24 + $0x40] sm:$0xff]  ;;  %v864_v59 = vld [vmem:[%s5631_s24 + $0x68] sm:$0xff]  ;;  %v866_v60 = vld [vmem:[%s5631_s24 + $0x78] sm:$0xff]  ;;  %v640_v62 = vpack.c.bf16 %v611_v55, %v610_v54 }
  0x22   : > { %4767 = vmatpush3.bf16.msra.mxu1 %v5143_v20  ;;  %v919_v63 = vpack.c.bf16 %v861_v57, %v859_v56  ;;  %v922_v0 = vpack.c.bf16 %v866_v60, %v864_v59  ;;  %v612_v1 = vld [vmem:[%s5647_s23 + $0x30] sm:$0xff]  ;;  %v613_v3 = vld [vmem:[%s5647_s23 + $0x38] sm:$0xff]  ;;  %v863_v4 = vld [vmem:[%s5631_s24 + $0x60] sm:$0xff] }
  0x23   : > { %4768 = vmatprep.subr.bf16.mxu1 %v5146_v22  ;;  %v865_v5 = vld [vmem:[%s5631_s24 + $0x70] sm:$0xff]  ;;  %v868_v6 = vld [vmem:[%s5631_s24 + $0x88] sm:$0xff]  ;;  %v870_v7 = vld [vmem:[%s5631_s24 + $0x98] sm:$0xff]  ;;  %v641_v8 = vpack.c.bf16 %v613_v3, %v612_v1 }
  0x24   : > { %745 = vmatpush1.bf16.msra.mxu0 %v5137_v15  ;;  %v921_v9 = vpack.c.bf16 %v865_v5, %v863_v4  ;;  %v924_v10 = vpack.c.bf16 %v870_v7, %v868_v6  ;;  %v614_v11 = vld [vmem:[%s5647_s23 + $0x40] sm:$0xff]  ;;  %v615_v12 = vld [vmem:[%s5647_s23 + $0x48] sm:$0xff]  ;;  %v869_v14 = vld [vmem:[%s5631_s24 + $0x90] sm:$0xff] }
  0x25   : > { %746 = vmatprep.subr.bf16.mxu0 %v5139_v17  ;;  %v867_v13 = vld [vmem:[%s5631_s24 + $0x80] sm:$0xff]  ;;  %v872_v15 = vld [vmem:[%s5631_s24 + $0xa8] sm:$0xff]  ;;  %v874_v16 = vld [vmem:[%s5631_s24 + $0xb8] sm:$0xff]  ;;  %v642_v17 = vpack.c.bf16 %v615_v12, %v614_v11 }
  0x26   : > { %4769 = vmatpush3.bf16.msra.mxu1 %v5148_v24  ;;  %v923_v18 = vpack.c.bf16 %v869_v14, %v867_v13  ;;  %v616_v20 = vld [vmem:[%s5647_s23 + $0x50] sm:$0xff]  ;;  %v871_v22 = vld [vmem:[%s5631_s24 + $0xa0] sm:$0xff]  ;;  %v876_v24 = vld [vmem:[%s5631_s24 + $0xc8] sm:$0xff] }
  0x27   : > { %4770 = vmatprep.subr.bf16.mxu1 %v5151_v26  ;;  %v875_v31 = vld [vmem:[%s5631_s24 + $0xc0] sm:$0xff]  ;;  %v877_v32 = vld [vmem:[%s5631_s24 + $0xd0] sm:$0xff]  ;;  %v882_v34 = vld [vmem:[%s5631_s24 + $0xf8] sm:$0xff] }
  0x28   : > { %747 = vmatpush1.bf16.msra.mxu0 %v5142_v19  ;;  %v926_v19 = vpack.c.bf16 %v874_v16, %v872_v15  ;;  %v927_v36 = vpack.c.bf16 %v877_v32, %v875_v31  ;;  %v620_v38 = vld [vmem:[%s5647_s23 + $0x70] sm:$0xff]  ;;  %v621_v39 = vld [vmem:[%s5647_s23 + $0x78] sm:$0xff]  ;;  %v879_v40 = vld [vmem:[%s5631_s24 + $0xe0] sm:$0xff] }
  0x29   : > { %748 = vmatprep.subr.bf16.mxu0 %v5144_v21  ;;  %v617_v21 = vld [vmem:[%s5647_s23 + $0x58] sm:$0xff]  ;;  %v881_v41 = vld [vmem:[%s5631_s24 + $0xf0] sm:$0xff]  ;;  %v5163_v46 = vld [vmem:[%s7458_s6 + $0x20] sm:$0xff]  }
  0x2a   : > { %4771 = vmatpush3.bf16.msra.mxu1 %v5153_v28  ;;  %v643_v26 = vpack.c.bf16 %v617_v21, %v616_v20  ;;  %v5162_v45 = vld [vmem:[%s7458_s6 + $0x18] sm:$0xff]   ;;  %v5164_v47 = vld [vmem:[%s7458_s6 + $0x28] sm:$0xff]   ;;  %v5165_v48 = vld [vmem:[%s7458_s6 + $0x30] sm:$0xff]  }
  0x2b   : > { %4772 = vmatprep.subr.bf16.mxu1 %v5156_v30  ;;  %v619_v30 = vld [vmem:[%s5647_s23 + $0x68] sm:$0xff]  ;;  %v5166_v49 = vld [vmem:[%s7458_s6 + $0x38] sm:$0xff]   ;;  %v5765_v1 = vld [vmem:[%s7457_s5] ss:$0 sm:$0xff] }
  0x2c   : > { %749 = vmatpush1.bf16.msra.mxu0 %v5147_v23  ;;  %v873_v23 = vld [vmem:[%s5631_s24 + $0xb0] sm:$0xff] }
  0x2d   : > { %750 = vmatprep.subr.bf16.mxu0 %v5149_v25  ;;  %v878_v25 = vld [vmem:[%s5631_s24 + $0xd8] sm:$0xff] }
  0x2e   : > { %4773 = vmatpush3.bf16.msra.mxu1 %v5158_v37  ;;  %v928_v28 = vpack.c.bf16 %v878_v25, %v876_v24 }
  0x30   : > { %751 = vmatpush1.bf16.msra.mxu0 %v5152_v27  ;;  %v925_v27 = vpack.c.bf16 %v873_v23, %v871_v22 }
  0x31   : > { %752 = vmatprep.subr.bf16.mxu0 %v5154_v29  ;;  %1067 = vmatmul.mubr.bf16.vlgmr.msra.gmra.mrb[0].mxu1 %v915_v43  ;;  %v618_v29 = vld [vmem:[%s5647_s23 + $0x60] sm:$0xff]  ;;  %v929_v43 = vpack.c.bf16 %v881_v41, %v879_v40 }
  0x32   : > { %1074 = vmatprep.mubr.bf16.mxu1 %v918_v44  ;;  %v644_v35 = vpack.c.bf16 %v619_v30, %v618_v29  ;;  %v5161_v44 = vld [vmem:[%s7458_s6 + $0x10] sm:$0xff]  }
  0x34   : > { %753 = vmatpush1.bf16.msra.mxu0 %v5157_v33  ;;  %v880_v33 = vld [vmem:[%s5631_s24 + $0xe8] sm:$0xff] }
  0x35   : > { %4918 = vmatprep.subr.bf16.mxu0 %v5159_v58  ;;  %v930_v37 = vpack.c.bf16 %v882_v34, %v880_v33 }
  0x37   : > { %771 = vmatmul.mubr.bf16.vlgmr.msra.gmra.mrb[0].mxu0 %v638_v42  ;;  %v645_v42 = vpack.c.bf16 %v621_v39, %v620_v38 }
  0x38   : > { %780 = vmatprep.mubr.bf16.mxu0 %v7473_v2  ;;  %4919 = vmatpush3.bf16.msra.mxu0 %v5159_v58 }
  0x39   : > { %1075 = vmatmul.mubr.bf16.gmra.mrb[4].mxu1 %v917_v52  ;;  %4920 = vmatprep.subr.bf16.mxu0 %v5160_v61 }
  0x3a   : > { %1082 = vmatprep.mubr.bf16.mxu1 %v920_v53  ;;  %v5744_v53 = vld [vmem:[%s7455_s3] sm:$0x3] }
  0x3c   : > { %4921 = vmatpush3.bf16.msra.mxu0 %v5160_v61 }
  0x3d   : > { %4922 = vmatprep.subr.bf16.mxu0 %v5161_v44 }
  0x3f   : > { %781 = vmatmul.mubr.bf16.gmra.mrb[4].mxu0 %v639_v51  ;;  %v5738_v51 = vshrl.u32 %v648_v50, 7 }
  0x40   : > { %790 = vmatprep.mubr.bf16.mxu0 %v7473_v2  ;;  %4923 = vmatpush3.bf16.msra.mxu0 %v5161_v44 }
  0x41   : > { %1083 = vmatmul.mubr.bf16.gmra.mrb[8].mxu1 %v919_v63  ;;  %4924 = vmatprep.subr.bf16.mxu0 %v5162_v45  ;;  %v7472_v52 = vsub.s32 0, %v5738_v51 }
  0x42   : > { %1090 = vmatprep.mubr.bf16.mxu1 %v922_v0 }
  0x43   : > { %v5749_v54 = vrot.slane %v5744_v53, %v7472_v52 }
  0x44   : > { %4925 = vmatpush3.bf16.msra.mxu0 %v5162_v45 }
  0x45   : > { %4926 = vmatprep.subr.bf16.mxu0 %v5163_v46 }
  0x47   : > { %791 = vmatmul.mubr.bf16.gmra.mrb[8].mxu0 %v640_v62 }
  0x48   : > { %800 = vmatprep.mubr.bf16.mxu0 %v7473_v2  ;;  %4927 = vmatpush3.bf16.msra.mxu0 %v5163_v46 }
  0x49   : > { %1091 = vmatmul.mubr.bf16.gmra.mrb[12].mxu1 %v921_v9  ;;  %4928 = vmatprep.subr.bf16.mxu0 %v5164_v47 }
  0x4a   : > { %1098 = vmatprep.mubr.bf16.mxu1 %v924_v10 }
  0x4c   : > { %4929 = vmatpush3.bf16.msra.mxu0 %v5164_v47 }
  0x4d   : > { %4930 = vmatprep.subr.bf16.mxu0 %v5165_v48 }
  0x4f   : > { %801 = vmatmul.mubr.bf16.gmra.mrb[12].mxu0 %v641_v8 }
  0x50   : > { %810 = vmatprep.mubr.bf16.mxu0 %v7473_v2  ;;  %4931 = vmatpush3.bf16.msra.mxu0 %v5165_v48 }
  0x51   : > { %1099 = vmatmul.mubr.bf16.gmra.mrb[16].mxu1 %v923_v18  ;;  %4932 = vmatprep.subr.bf16.mxu0 %v5166_v49 }
  0x52   : > { %1106 = vmatprep.mubr.bf16.mxu1 %v926_v19 }
  0x54   : > { %4933 = vmatpush3.bf16.msra.mxu0 %v5166_v49 }
  0x57   : > { %811 = vmatmul.mubr.bf16.gmra.mrb[16].mxu0 %v642_v17 }
  0x58   : > { %820 = vmatprep.mubr.bf16.mxu0 %v7473_v2 }
  0x59   : > { %1107 = vmatmul.mubr.bf16.gmra.mrb[20].mxu1 %v925_v27 }
  0x5a   : > { %1114 = vmatprep.mubr.bf16.mxu1 %v928_v28 }
  0x5f   : > { %821 = vmatmul.mubr.bf16.gmra.mrb[20].mxu0 %v643_v26 }
  0x60   : > { %830 = vmatprep.mubr.bf16.mxu0 %v7473_v2 }
  0x61   : > { %1115 = vmatmul.mubr.bf16.gmra.mrb[24].mxu1 %v927_v36 }
  0x62   : > { %1122 = vmatprep.mubr.bf16.mxu1 %v930_v37 }
  0x67   : > { %831 = vmatmul.mubr.bf16.gmra.mrb[24].mxu0 %v644_v35 }
  0x68   : > { %840 = vmatprep.mubr.bf16.mxu0 %v7473_v2 }
  0x69   : > { %1123 = vmatmul.mubr.bf16.gmra.mrb[28].mxu1 %v929_v43 }
  0x6a   : > { %1917 = vmatprep.mubr.bf16.mxu1 %v7473_v2 }
  0x6f   : > { %841 = vmatmul.mubr.bf16.gmra.mrb[28].mxu0 %v645_v42 }
 0x104   : > { %v4774_v57 = vpop.f32.mrb[0].mxu1 }
 0x105   : > { %v4775_v59 = vpop.f32.mrb[1].mxu1 }
 0x106   : > { %v4776_v61 = vadd.f32 %v4775_v59, %v4774_v57  ;;  %v4777_v62 = vpop.f32.mrb[2].mxu1 }
 0x107   : > { %v4778_v3 = vpop.f32.mrb[3].mxu1 }
 0x108   : > { %v4779_v4 = vadd.f32 %v4778_v3, %v4777_v62  ;;  %v1069_v5 = vadd.f32 %v4776_v61, %v5765_v1 }
 0x10a   : > { %v772_v55 = vpop.f32.mrb[0].mxu0  ;;  %v1072_v6 = vadd.f32 %v4779_v4, %v5765_v1 }
 0x10b   : > { %v5752_v56 = vadd.f32 %v772_v55, %v5749_v54  ;;  %v5754_v58 = vpop.f32.mrb[1].mxu0 }
 0x10c   : > { %v776_v60 = vpop.f32.mrb[2].mxu0  ;;  %v5770_v8 = vpack.c.bf16 %v1072_v6, %v1069_v5  ;;  %v4780_v10 = vpop.f32.mrb[4].mxu1 }
 0x10d   : > { %2515 = vadd.xlane.f32.xlu0 %v5752_v56  ;;  %v5758_v63 = vadd.f32 %v776_v60, %v5749_v54  ;;  %v5760_v0 = vpop.f32.mrb[3].mxu0  ;;  %v4781_v12 = vpop.f32.mrb[5].mxu1 }
 0x10e   : > { %v4565_v14 = vmul.bf16 3216621497, %v5770_v8  ;;  %v4782_v15 = vadd.f32 %v4781_v12, %v4780_v10  ;;  %v4783_v16 = vpop.f32.mrb[6].mxu1 }
 0x10f   : > { %v4784_v19 = vpop.f32.mrb[7].mxu1 }
 0x110   : > { %5207 = vpow.bf16 %v4565_v14  ;;  %v4785_v20 = vadd.f32 %v4784_v19, %v4783_v16  ;;  %v1077_v21 = vadd.f32 %v4782_v15, %v5765_v1 }
 0x111   : > { %2517 = vadd.xlane.f32.xlu0 %v5758_v63 }
 0x112   : > { %v782_v7 = vpop.f32.mrb[4].mxu0  ;;  %v1080_v22 = vadd.f32 %v4785_v20, %v5765_v1 }
 0x113   : > { %v5773_v9 = vadd.f32 %v782_v7, %v5749_v54  ;;  %v5775_v11 = vpop.f32.mrb[5].mxu0 }
 0x114   : > { %v786_v13 = vpop.f32.mrb[6].mxu0  ;;  %v5787_v24 = vpack.c.bf16 %v1080_v22, %v1077_v21  ;;  %v4786_v26 = vpop.f32.mrb[8].mxu1 }
 0x115   : > { %2519 = vadd.xlane.f32.xlu1 %v5773_v9  ;;  %v5780_v17 = vadd.f32 %v786_v13, %v5749_v54  ;;  %v5782_v18 = vpop.f32.mrb[7].mxu0  ;;  %v4787_v28 = vpop.f32.mrb[9].mxu1 }
 0x116   : > { %v4566_v30 = vmul.bf16 3216621497, %v5787_v24  ;;  %v4788_v31 = vadd.f32 %v4787_v28, %v4786_v26  ;;  %v4789_v33 = vpop.f32.mrb[10].mxu1 }
 0x117   : > { %v4790_v35 = vpop.f32.mrb[11].mxu1 }
 0x118   : > { %5209 = vpow.bf16 %v4566_v30  ;;  %v4791_v36 = vadd.f32 %v4790_v35, %v4789_v33  ;;  %v1085_v37 = vadd.f32 %v4788_v31, %v5765_v1 }
 0x119   : > { %2521 = vadd.xlane.f32.xlu1 %v5780_v17 }
 0x11a   : > { %v792_v23 = vpop.f32.mrb[8].mxu0  ;;  %v1088_v38 = vadd.f32 %v4791_v36, %v5765_v1 }
 0x11b   : > { %v5790_v25 = vadd.f32 %v792_v23, %v5749_v54  ;;  %v5792_v27 = vpop.f32.mrb[9].mxu0  ;;  %v5208_v39 = vpop.eup %5207 }
 0x11c   : > { %v796_v29 = vpop.f32.mrb[10].mxu0  ;;  %v5804_v41 = vpack.c.bf16 %v1088_v38, %v1085_v37  ;;  %v4792_v43 = vpop.f32.mrb[12].mxu1  ;;  %v1171_v45 = vadd.bf16 1065369472, %v5208_v39 }
 0x11d   : > { %v5796_v32 = vadd.f32 %v796_v29, %v5749_v54  ;;  %2523 = vadd.xlane.f32.xlu0 %v5790_v25  ;;  %v5799_v34 = vpop.f32.mrb[11].mxu0  ;;  %v4793_v46 = vpop.f32.mrb[13].mxu1 }
 0x11e   : > { %v4567_v48 = vmul.bf16 3216621497, %v5804_v41  ;;  %v4794_v49 = vadd.f32 %v4793_v46, %v4792_v43  ;;  %v4795_v55 = vpop.f32.mrb[14].mxu1  ;;  %5211 = vrcp.bf16 %v1171_v45 }
 0x11f   : > { %2525 = vadd.xlane.f32.xlu1 %v5796_v32  ;;  %v4796_v59 = vpop.f32.mrb[15].mxu1 }
 0x120   : > { %5213 = vpow.bf16 %v4567_v48  ;;  %v4797_v60 = vadd.f32 %v4796_v59, %v4795_v55  ;;  %v1093_v61 = vadd.f32 %v4794_v49, %v5765_v1 }
 0x122   : > { %v802_v40 = vpop.f32.mrb[12].mxu0  ;;  %v1096_v62 = vadd.f32 %v4797_v60, %v5765_v1 }
 0x123   : > { %v5807_v42 = vadd.f32 %v802_v40, %v5749_v54  ;;  %v5809_v44 = vpop.f32.mrb[13].mxu0  ;;  %v5210_v3 = vpop.eup %5209 }
 0x124   : > { %v806_v47 = vpop.f32.mrb[14].mxu0  ;;  %v1172_v5 = vadd.bf16 1065369472, %v5210_v3  ;;  %v5821_v6 = vpack.c.bf16 %v1096_v62, %v1093_v61  ;;  %v4798_v10 = vpop.f32.mrb[16].mxu1 }
 0x125   : > { %v5813_v50 = vadd.f32 %v806_v47, %v5749_v54  ;;  %2527 = vadd.xlane.f32.xlu0 %v5807_v42  ;;  %v5816_v57 = vpop.f32.mrb[15].mxu0  ;;  %v4799_v13 = vpop.f32.mrb[17].mxu1 }
 0x126   : > { %5215 = vrcp.bf16 %v1172_v5  ;;  %v4568_v15 = vmul.bf16 3216621497, %v5821_v6  ;;  %v4800_v16 = vadd.f32 %v4799_v13, %v4798_v10  ;;  %v4801_v20 = vpop.f32.mrb[18].mxu1 }
 0x127   : > { %2529 = vadd.xlane.f32.xlu1 %v5813_v50  ;;  %v4802_v22 = vpop.f32.mrb[19].mxu1 }
 0x128   : > { %5217 = vpow.bf16 %v4568_v15  ;;  %v4803_v23 = vadd.f32 %v4802_v22, %v4801_v20  ;;  %v1101_v28 = vadd.f32 %v4800_v16, %v5765_v1 }
 0x129   : > { %v5212_v26 = vpop.eup %5211 }
 0x12a   : > { %v812_v4 = vpop.f32.mrb[16].mxu0  ;;  %v1104_v29 = vadd.f32 %v4803_v23, %v5765_v1  ;;  %v1180_v30 = vmul.bf16 1065369472, %v5212_v26 }
 0x12b   : > { %v5824_v7 = vadd.f32 %v812_v4, %v5749_v54  ;;  %v5826_v12 = vpop.f32.mrb[17].mxu0  ;;  %v5214_v31 = vpop.eup %5213 }
 0x12c   : > { %v816_v14 = vpop.f32.mrb[18].mxu0  ;;  %v5838_v35 = vpack.c.bf16 %v1104_v29, %v1101_v28  ;;  %v4804_v37 = vpop.f32.mrb[20].mxu1  ;;  %v1195_v39 = vmul.bf16 %v1180_v30, %v5770_v8  ;;  %v1173_v40 = vadd.bf16 1065369472, %v5214_v31 }
 0x12d   : > { %v5830_v19 = vadd.f32 %v816_v14, %v5749_v54  ;;  %2531 = vadd.xlane.f32.xlu0 %v5824_v7  ;;  %v5833_v21 = vpop.f32.mrb[19].mxu0  ;;  %v4805_v43 = vpop.f32.mrb[21].mxu1 }
 0x12e   : > { %v4569_v46 = vmul.bf16 3216621497, %v5838_v35  ;;  %v4806_v47 = vadd.f32 %v4805_v43, %v4804_v37  ;;  %v4807_v49 = vpop.f32.mrb[22].mxu1  ;;  %4934 = vmatprep.mubr.bf16.mxu0 %v1195_v39  ;;  %5219 = vrcp.bf16 %v1173_v40 }
 0x12f   : > { %7491 = vst [vmem:[#allocation3_spill] sm:$0xff] %v5830_v19  ;;  %2533 = vadd.xlane.f32.xlu1 %v5830_v19  ;;  %v4808_v59 = vpop.f32.mrb[23].mxu1 }
 0x130   : > { %5221 = vpow.bf16 %v4569_v46  ;;  %v4809_v60 = vadd.f32 %v4808_v59, %v4807_v49  ;;  %v1109_v62 = vadd.f32 %v4806_v47, %v5765_v1 }
 0x131   : > { %v5216_v8 = vpop.eup %5215 }
 0x132   : > { %v822_v33 = vpop.f32.mrb[20].mxu0  ;;  %v1182_v61 = vmul.bf16 1065369472, %v5216_v8  ;;  %v1112_v3 = vadd.f32 %v4809_v60, %v5765_v1 }
 0x133   : > { %v5841_v36 = vadd.f32 %v822_v33, %v5749_v54  ;;  %v5843_v38 = vpop.f32.mrb[21].mxu0  ;;  %v5218_v4 = vpop.eup %5217 }
 0x134   : > { %v826_v45 = vpop.f32.mrb[22].mxu0  ;;  %v1196_v10 = vmul.bf16 %v1182_v61, %v5787_v24  ;;  %v5857_v13 = vpack.c.bf16 %v1112_v3, %v1109_v62  ;;  %v4810_v15 = vpop.f32.mrb[24].mxu1  ;;  %v1174_v20 = vadd.bf16 1065369472, %v5218_v4 }
 0x135   : > { %7492 = vst [vmem:[#allocation4_spill] sm:$0xff] %v5841_v36  ;;  %v5848_v48 = vadd.f32 %v826_v45, %v5749_v54  ;;  %2535 = vadd.xlane.f32.xlu0 %v5841_v36  ;;  %v5851_v55 = vpop.f32.mrb[23].mxu0  ;;  %v4811_v22 = vpop.f32.mrb[25].mxu1 }
 0x136   : > { %v4570_v26 = vmul.bf16 3216621497, %v5857_v13  ;;  %v4812_v28 = vadd.f32 %v4811_v22, %v4810_v15  ;;  %v4813_v30 = vpop.f32.mrb[26].mxu1  ;;  %4935 = vmatmul.mubr.bf16.vlgmr.msra.gmra.mrb[32].mxu0 %v1196_v10  ;;  %5223 = vrcp.bf16 %v1174_v20 }
 0x137   : > { %7493 = vst [vmem:[#allocation5_spill] sm:$0xff] %v5848_v48  ;;  %2537 = vadd.xlane.f32.xlu1 %v5848_v48  ;;  %v4814_v31 = vpop.f32.mrb[27].mxu1 }
 0x138   : > { %5225 = vpow.bf16 %v4570_v26  ;;  %v4815_v33 = vadd.f32 %v4814_v31, %v4813_v30  ;;  %v1117_v39 = vadd.f32 %v4812_v28, %v5765_v1 }
 0x139   : > { %v5220_v37 = vpop.eup %5219 }
 0x13a   : > { %v832_v5 = vpop.f32.mrb[24].mxu0  ;;  %v1120_v40 = vadd.f32 %v4815_v33, %v5765_v1  ;;  %v1184_v43 = vmul.bf16 1065369472, %v5220_v37 }
 0x13b   : > { %v5860_v14 = vadd.f32 %v832_v5, %v5749_v54  ;;  %v5862_v16 = vpop.f32.mrb[25].mxu0  ;;  %v5222_v45 = vpop.eup %5221 }
 0x13c   : > { %v836_v23 = vpop.f32.mrb[26].mxu0  ;;  %v1137_v47 = vpack.c.bf16 %v1120_v40, %v1117_v39  ;;  %v4816_v59 = vpop.f32.mrb[28].mxu1  ;;  %v1197_v8 = vmul.bf16 %v1184_v43, %v5804_v41  ;;  %v1175_v61 = vadd.bf16 1065369472, %v5222_v45 }
 0x13d   : > { %7494 = vst [vmem:[#allocation6_spill] sm:$0xff] %v5860_v14  ;;  %v5866_v29 = vadd.f32 %v836_v23, %v5749_v54  ;;  %2539 = vadd.xlane.f32.xlu0 %v5860_v14  ;;  %v5869_v24 = vpop.f32.mrb[27].mxu0  ;;  %v4817_v62 = vpop.f32.mrb[29].mxu1 }
 0x13e   : > { %v4571_v4 = vmul.bf16 3216621497, %v1137_v47  ;;  %v4818_v5 = vadd.f32 %v4817_v62, %v4816_v59  ;;  %v4819_v15 = vpop.f32.mrb[30].mxu1  ;;  %4938 = vmatprep.mubr.bf16.mxu0 %v1197_v8  ;;  %5227 = vrcp.bf16 %v1175_v61 }
 0x13f   : > { %7495 = vst [vmem:[#allocation7_spill] sm:$0xff] %v5866_v29  ;;  %2541 = vadd.xlane.f32.xlu1 %v5866_v29  ;;  %v4820_v20 = vpop.f32.mrb[31].mxu1 }
 0x140   : > { %5229 = vpow.bf16 %v4571_v4  ;;  %v4821_v22 = vadd.f32 %v4820_v20, %v4819_v15  ;;  %v1125_v41 = vadd.f32 %v4818_v5, %v5765_v1 }
 0x141   : > { %v5224_v23 = vpop.eup %5223 }
 0x142   : > { %v842_v46 = vpop.f32.mrb[28].mxu0  ;;  %v1128_v26 = vadd.f32 %v4821_v22, %v5765_v1  ;;  %v1186_v28 = vmul.bf16 1065369472, %v5224_v23  ;;  %v1475_v22 = vld [vmem:[%s7460_s8 + $0x80] sm:$0xff] }
 0x143   : > { %v5875_v49 = vadd.f32 %v842_v46, %v5749_v54  ;;  %v5877_v60 = vpop.f32.mrb[29].mxu0  ;;  %v5226_v30 = vpop.eup %5225  ;;  %v1479_v23 = vld [vmem:[%s7460_s8 + $0xa0] sm:$0xff] }
 0x144   : > { %v846_v3 = vpop.f32.mrb[30].mxu0  ;;  %v1138_v31 = vpack.c.bf16 %v1128_v26, %v1125_v41  ;;  %v1176_v33 = vadd.bf16 1065369472, %v5226_v30 }
 0x145   : > { %7496 = vst [vmem:[#allocation8_spill] sm:$0xff] %v5875_v49  ;;  %v5881_v10 = vadd.f32 %v846_v3, %v5749_v54  ;;  %2543 = vadd.xlane.f32.xlu0 %v5875_v49  ;;  %v1198_v54 = vmul.bf16 %v1186_v28, %v5821_v6  ;;  %v1459_v6 = vld [vmem:[%s7460_s8] sm:$0xff]  ;;  %v5899_v4 = vpop.f32.mrb[31].mxu0  ;;  %v4607_v28 = vcombine.high %v1475_v22, %v1479_v23 }
 0x146   : > { %v4572_v37 = vmul.bf16 3216621497, %v1138_v31  ;;  %5231 = vrcp.bf16 %v1176_v33  ;;  %v1463_v3 = vld [vmem:[%s7460_s8 + $0x20] sm:$0xff]  ;;  %v4606_v33 = vcombine.low %v1475_v22, %v1479_v23  ;;  %v1476_v23 = vld [vmem:[%s7460_s8 + $0x88] sm:$0xff] }
 0x147   : > { %7497 = vst [vmem:[#allocation9_spill] sm:$0xff] %v5881_v10  ;;  %2545 = vadd.xlane.f32.xlu1 %v5881_v10  ;;  %4939 = vmatmul.mubr.bf16.gmra.mrb[36].mxu0 %v1198_v54  ;;  %v4590_v5 = vcombine.low %v1459_v6, %v1463_v3  ;;  %v4591_v15 = vcombine.high %v1459_v6, %v1463_v3  ;;  %v1468_v6 = vld [vmem:[%s7460_s8 + $0x48] sm:$0xff] }
 0x148   : > { %5233 = vpow.bf16 %v4572_v37  ;;  %v1472_v3 = vld [vmem:[%s7460_s8 + $0x68] sm:$0xff] }
 0x149   : > { %v5228_v39 = vpop.eup %5227  ;;  %1885 = vmatprep.subr.bf16.mxu1 %v4591_v15  ;;  %v4600_v15 = vcombine.low %v1468_v6, %v1472_v3 }
 0x14a   : > { %v1188_v40 = vmul.bf16 1065369472, %v5228_v39  ;;  %1886 = vmatpush1.bf16.msra.mxu1 %v4590_v5 }
 0x14b   : > { %v5230_v43 = vpop.eup %5229 }
 0x14c   : > { %v1199_v45 = vmul.bf16 %v1188_v40, %v5838_v35  ;;  %v1177_v46 = vadd.bf16 1065369472, %v5230_v43  ;;  %v1467_v35 = vld [vmem:[%s7460_s8 + $0x40] sm:$0xff] }
 0x14d   : > { %v1483_v43 = vld [vmem:[%s7460_s8 + $0xc0] sm:$0xff] }
 0x14e   : > { %4942 = vmatprep.mubr.bf16.mxu0 %v1199_v45  ;;  %5235 = vrcp.bf16 %v1177_v46  ;;  %v1487_v45 = vld [vmem:[%s7460_s8 + $0xe0] sm:$0xff] }
 0x14f   : > { %v4615_v46 = vcombine.high %v1483_v43, %v1487_v45 }
 0x151   : > { %v5232_v59 = vpop.eup %5231 }
 0x152   : > { %v1190_v1 = vmul.bf16 1065369472, %v5232_v59  ;;  %v1460_v59 = vld [vmem:[%s7460_s8 + $0x8] sm:$0xff] }
 0x153   : > { %v5234_v8 = vpop.eup %5233 }
 0x154   : > { %v1200_v61 = vmul.bf16 %v1190_v1, %v5857_v13  ;;  %v1178_v62 = vadd.bf16 1065369472, %v5234_v8  ;;  %v1471_v13 = vld [vmem:[%s7460_s8 + $0x60] sm:$0xff] }
 0x155   : > { %v4599_v20 = vcombine.high %v1467_v35, %v1471_v13  ;;  %v4598_v41 = vcombine.low %v1467_v35, %v1471_v13  ;;  %v4601_v35 = vcombine.high %v1468_v6, %v1472_v3  ;;  %v1496_v6 = vld [vmem:[%s7460_s8 + $0x128] sm:$0xff] }
 0x156   : > { %4943 = vmatmul.mubr.bf16.gmra.mrb[40].mxu0 %v1200_v61  ;;  %5237 = vrcp.bf16 %v1178_v62 }
 0x157   : > { %1887 = vmatprep.subr.bf16.mxu1 %v4599_v20 }
 0x158   : > { %1888 = vmatpush1.bf16.msra.mxu1 %v4598_v41  ;;  %v1480_v41 = vld [vmem:[%s7460_s8 + $0xa8] sm:$0xff] }
 0x159   : > { %v5236_v26 = vpop.eup %5235  ;;  %1889 = vmatprep.subr.bf16.mxu1 %v4607_v28 }
 0x15a   : > { %v1192_v30 = vmul.bf16 1065369472, %v5236_v26  ;;  %v4609_v26 = vcombine.high %v1476_v23, %v1480_v41 }
 0x15c   : > { %v1201_v54 = vmul.bf16 %v1192_v30, %v1137_v47  ;;  %1890 = vmatpush1.bf16.msra.mxu1 %v4606_v33  ;;  %v4614_v47 = vcombine.low %v1483_v43, %v1487_v45  ;;  %v4608_v30 = vcombine.low %v1476_v23, %v1480_v41  ;;  %v1499_v41 = vld [vmem:[%s7460_s8 + $0x140] sm:$0xff] }
 0x15d   : > { %1891 = vmatprep.subr.bf16.mxu1 %v4615_v46 }
 0x15e   : > { %4946 = vmatprep.mubr.bf16.mxu0 %v1201_v54 }
 0x160   : > { %1892 = vmatpush1.bf16.msra.mxu1 %v4614_v47 }
 0x161   : > { %v5238_v37 = vpop.eup %5237 }
 0x162   : > { %v1194_v39 = vmul.bf16 1065369472, %v5238_v37 }
 0x164   : > { %v1202_v40 = vmul.bf16 %v1194_v39, %v1138_v31  ;;  %v1464_v31 = vld [vmem:[%s7460_s8 + $0x28] sm:$0xff] }
 0x165   : > { %v4593_v1 = vcombine.high %v1460_v59, %v1464_v31  ;;  %v4592_v8 = vcombine.low %v1460_v59, %v1464_v31  ;;  %v1484_v39 = vld [vmem:[%s7460_s8 + $0xc8] sm:$0xff] }
 0x166   : > { %4947 = vmatmul.mubr.bf16.gmra.mrb[44].mxu0 %v1202_v40  ;;  %v1488_v40 = vld [vmem:[%s7460_s8 + $0xe8] sm:$0xff] }
 0x167   : > { %2030 = vmatprep.mubr.bf16.mxu0 %v7473_v2  ;;  %1998 = vmatprep.subr.bf16.mxu0 %v4593_v1  ;;  %v4617_v43 = vcombine.high %v1484_v39, %v1488_v40  ;;  %v4616_v47 = vcombine.low %v1484_v39, %v1488_v40  ;;  %v1491_v1 = vld [vmem:[%s7460_s8 + $0x100] sm:$0xff] }
 0x168   : > { %1999 = vmatpush1.bf16.msra.mxu0 %v4592_v8  ;;  %v1495_v8 = vld [vmem:[%s7460_s8 + $0x120] sm:$0xff] }
 0x169   : > { %2000 = vmatprep.subr.bf16.mxu0 %v4601_v35  ;;  %v4622_v35 = vcombine.low %v1491_v1, %v1495_v8 }
 0x16c   : > { %2001 = vmatpush1.bf16.msra.mxu0 %v4600_v15 }
 0x16d   : > { %2002 = vmatprep.subr.bf16.mxu0 %v4609_v26  ;;  %v1503_v26 = vld [vmem:[%s7460_s8 + $0x160] sm:$0xff] }
 0x170   : > { %2003 = vmatpush1.bf16.msra.mxu0 %v4608_v30  ;;  %v1500_v30 = vld [vmem:[%s7460_s8 + $0x148] sm:$0xff] }
 0x171   : > { %2004 = vmatprep.subr.bf16.mxu0 %v4617_v43  ;;  %v4630_v43 = vcombine.low %v1499_v41, %v1503_v26 }
 0x174   : > { %2005 = vmatpush1.bf16.msra.mxu0 %v4616_v47 }
 0x19a   : > { %v2516_v61 = vpop.xlane.xlu0 %2515 }
 0x19b   : > { %v2548_v62 = vmul.f32 0.0078125, %v2516_v61  ;;  %v1492_v61 = vld [vmem:[%s7460_s8 + $0x108] sm:$0xff] }
 0x19c   : > { %v4624_v15 = vcombine.low %v1492_v61, %v1496_v6 }
 0x19d   : > { %v5930_v5 = vsub.f32 %v5752_v56, %v2548_v62  ;;  %v4623_v62 = vcombine.high %v1491_v1, %v1495_v8  ;;  %v1507_v1 = vld [vmem:[%s7460_s8 + $0x180] sm:$0xff] }
 0x19e   : > { %v2518_v13 = vpop.xlane.xlu0 %2517  ;;  %v1511_v8 = vld [vmem:[%s7460_s8 + $0x1a0] sm:$0xff] }
 0x19f   : > { %v2549_v20 = vmul.f32 0.0078125, %v2518_v13  ;;  %v2580_v22 = vmul.f32 %v5930_v5, %v5930_v5  ;;  %v4625_v13 = vcombine.high %v1492_v61, %v1496_v6  ;;  %1893 = vmatprep.subr.bf16.mxu1 %v4623_v62  ;;  %v1508_v61 = vld [vmem:[%s7460_s8 + $0x188] sm:$0xff]  ;;  %v4639_v62 = vcombine.high %v1507_v1, %v1511_v8 }
 0x1a0   : > { %1894 = vmatpush1.bf16.msra.mxu1 %v4622_v35  ;;  %v1512_v6 = vld [vmem:[%s7460_s8 + $0x1a8] sm:$0xff] }
 0x1a1   : > { %v5941_v28 = vsub.f32 %v5758_v63, %v2549_v20  ;;  %2596 = vadd.xlane.f32.xlu0 %v2580_v22  ;;  %2006 = vmatprep.subr.bf16.mxu0 %v4625_v13  ;;  %v4640_v13 = vcombine.low %v1508_v61, %v1512_v6 }
 0x1a2   : > { %v2520_v54 = vpop.xlane.xlu1 %2519  ;;  %2007 = vmatpush1.bf16.msra.mxu0 %v4624_v15  ;;  %v4638_v15 = vcombine.low %v1507_v1, %v1511_v8 }
 0x1a3   : > { %v2550_v33 = vmul.f32 0.0078125, %v2520_v54  ;;  %v2581_v37 = vmul.f32 %v5941_v28, %v5941_v28 }
 0x1a5   : > { %v5952_v45 = vsub.f32 %v5773_v9, %v2550_v33  ;;  %2598 = vadd.xlane.f32.xlu1 %v2581_v37  ;;  %v4631_v33 = vcombine.high %v1499_v41, %v1503_v26  ;;  %v1504_v37 = vld [vmem:[%s7460_s8 + $0x168] sm:$0xff]  ;;  %v1515_v41 = vld [vmem:[%s7460_s8 + $0x1c0] sm:$0xff] }
 0x1a6   : > { %v2522_v46 = vpop.xlane.xlu1 %2521  ;;  %v4632_v47 = vcombine.low %v1500_v30, %v1504_v37  ;;  %v1519_v26 = vld [vmem:[%s7460_s8 + $0x1e0] sm:$0xff] }
 0x1a7   : > { %v2551_v59 = vmul.f32 0.0078125, %v2522_v46  ;;  %v2582_v31 = vmul.f32 %v5952_v45, %v5952_v45  ;;  %1895 = vmatprep.subr.bf16.mxu1 %v4631_v33  ;;  %v4633_v46 = vcombine.high %v1500_v30, %v1504_v37  ;;  %v1516_v30 = vld [vmem:[%s7460_s8 + $0x1c8] sm:$0xff]  ;;  %v4647_v33 = vcombine.high %v1515_v41, %v1519_v26 }
 0x1a8   : > { %1896 = vmatpush1.bf16.msra.mxu1 %v4630_v43  ;;  %v1520_v37 = vld [vmem:[%s7460_s8 + $0x1e8] sm:$0xff] }
 0x1a9   : > { %v5969_v3 = vsub.f32 %v5780_v17, %v2551_v59  ;;  %2600 = vadd.xlane.f32.xlu0 %v2582_v31  ;;  %2008 = vmatprep.subr.bf16.mxu0 %v4633_v46  ;;  %v4648_v46 = vcombine.low %v1516_v30, %v1520_v37 }
 0x1aa   : > { %v2524_v20 = vpop.xlane.xlu0 %2523  ;;  %2009 = vmatpush1.bf16.msra.mxu0 %v4632_v47  ;;  %1897 = vmatprep.subr.bf16.mxu1 %v4639_v62  ;;  %v4646_v47 = vcombine.low %v1515_v41, %v1519_v26 }
 0x1ab   : > { %v2552_v22 = vmul.f32 0.0078125, %v2524_v20  ;;  %v2583_v23 = vmul.f32 %v5969_v3, %v5969_v3 }
 0x1ac   : > { %v2526_v54 = vpop.xlane.xlu1 %2525  ;;  %1898 = vmatpush1.bf16.msra.mxu1 %v4638_v15 }
 0x1ad   : > { %v5986_v39 = vsub.f32 %v5790_v25, %v2552_v22  ;;  %v2553_v40 = vmul.f32 0.0078125, %v2526_v54  ;;  %2602 = vadd.xlane.f32.xlu1 %v2583_v23  ;;  %v4641_v22 = vcombine.high %v1508_v61, %v1512_v6  ;;  %1899 = vmatprep.subr.bf16.mxu1 %v4647_v33 }
 0x1af   : > { %v5989_v59 = vsub.f32 %v5796_v32, %v2553_v40  ;;  %v2584_v31 = vmul.f32 %v5986_v39, %v5986_v39  ;;  %2010 = vmatprep.subr.bf16.mxu0 %v4641_v22 }
 0x1b0   : > { %2011 = vmatpush1.bf16.msra.mxu0 %v4640_v13  ;;  %1900 = vmatpush1.bf16.msra.mxu1 %v4646_v47 }
 0x1b1   : > { %2604 = vadd.xlane.f32.xlu0 %v2584_v31  ;;  %v2585_v35 = vmul.f32 %v5989_v59, %v5989_v59  ;;  %v4649_v31 = vcombine.high %v1516_v30, %v1520_v37 }
 0x1b2   : > { %v2528_v20 = vpop.xlane.xlu0 %2527 }
 0x1b3   : > { %v2554_v23 = vmul.f32 0.0078125, %v2528_v20  ;;  %2606 = vadd.xlane.f32.xlu1 %v2585_v35  ;;  %2012 = vmatprep.subr.bf16.mxu0 %v4649_v31 }
 0x1b4   : > { %v2530_v54 = vpop.xlane.xlu1 %2529  ;;  %2013 = vmatpush1.bf16.msra.mxu0 %v4648_v46 }
 0x1b5   : > { %v6020_v40 = vsub.f32 %v5807_v42, %v2554_v23  ;;  %v2555_v43 = vmul.f32 0.0078125, %v2530_v54 }
 0x1b7   : > { %v6023_v1 = vsub.f32 %v5813_v50, %v2555_v43  ;;  %v2586_v8 = vmul.f32 %v6020_v40, %v6020_v40 }
 0x1b9   : > { %2608 = vadd.xlane.f32.xlu0 %v2586_v8  ;;  %v2587_v61 = vmul.f32 %v6023_v1, %v6023_v1 }
 0x1ba   : > { %v2532_v62 = vpop.xlane.xlu0 %2531 }
 0x1bb   : > { %v2556_v6 = vmul.f32 0.0078125, %v2532_v62  ;;  %2610 = vadd.xlane.f32.xlu1 %v2587_v61 }
 0x1bc   : > { %v2534_v35 = vpop.xlane.xlu1 %2533 }
 0x1bd   : > { %v6030_v15 = vsub.f32 %v5824_v7, %v2556_v6  ;;  %v2557_v13 = vmul.f32 0.0078125, %v2534_v35 }
 0x1bf   : > { %v6033_v20 = vsub.f32 %v5830_v19, %v2557_v13  ;;  %v2588_v22 = vmul.f32 %v6030_v15, %v6030_v15 }
 0x1c1   : > { %2612 = vadd.xlane.f32.xlu0 %v2588_v22  ;;  %v2589_v23 = vmul.f32 %v6033_v20, %v6033_v20 }
 0x1c2   : > { %v2536_v41 = vpop.xlane.xlu0 %2535 }
 0x1c3   : > { %v2558_v26 = vmul.f32 0.0078125, %v2536_v41  ;;  %2614 = vadd.xlane.f32.xlu1 %v2589_v23 }
 0x1c4   : > { %v2538_v30 = vpop.xlane.xlu1 %2537 }
 0x1c5   : > { %v6040_v54 = vsub.f32 %v5841_v36, %v2558_v26  ;;  %v2559_v33 = vmul.f32 0.0078125, %v2538_v30 }
 0x1c7   : > { %v6043_v37 = vsub.f32 %v5848_v48, %v2559_v33  ;;  %v2590_v43 = vmul.f32 %v6040_v54, %v6040_v54 }
 0x1c9   : > { %2616 = vadd.xlane.f32.xlu0 %v2590_v43  ;;  %v2591_v47 = vmul.f32 %v6043_v37, %v6043_v37 }
 0x1ca   : > { %v2540_v46 = vpop.xlane.xlu0 %2539 }
 0x1cb   : > { %v2560_v31 = vmul.f32 0.0078125, %v2540_v46  ;;  %2618 = vadd.xlane.f32.xlu1 %v2591_v47  ;;  %v6070_v47 = vld [vmem:[%s7460_s8 + $0x10] sm:$0xff] }
 0x1cc   : > { %v2542_v8 = vpop.xlane.xlu1 %2541  ;;  %v6075_v46 = vld [vmem:[%s7460_s8 + $0x30] sm:$0xff] }
 0x1cd   : > { %v6050_v61 = vsub.f32 %v5860_v14, %v2560_v31  ;;  %v2561_v62 = vmul.f32 0.0078125, %v2542_v8  ;;  %v6080_v31 = vld [vmem:[%s7460_s8 + $0x18] sm:$0xff] }
 0x1cf   : > { %v6053_v6 = vsub.f32 %v5866_v29, %v2561_v62  ;;  %v2592_v35 = vmul.f32 %v6050_v61, %v6050_v61  ;;  %v4595_v62 = vcombine.high %v6070_v47, %v6075_v46 }
 0x1d1   : > { %2620 = vadd.xlane.f32.xlu0 %v2592_v35  ;;  %v2593_v13 = vmul.f32 %v6053_v6, %v6053_v6  ;;  %v6089_v35 = vld [vmem:[%s7460_s8 + $0x38] sm:$0xff]  ;;  %2111 = vmatprep.subr.bf16.mxu1 %v4595_v62 }
 0x1d2   : > { %v2544_v22 = vpop.xlane.xlu0 %2543 }
 0x1d3   : > { %v2562_v23 = vmul.f32 0.0078125, %v2544_v22  ;;  %2622 = vadd.xlane.f32.xlu1 %v2593_v13 }
 0x1d4   : > { %v2546_v41 = vpop.xlane.xlu1 %2545 }
 0x1d5   : > { %v6060_v26 = vsub.f32 %v5875_v49, %v2562_v23  ;;  %v2563_v30 = vmul.f32 0.0078125, %v2546_v41  ;;  %v4597_v23 = vcombine.high %v6080_v31, %v6089_v35  ;;  %v7475_v41 = vsub.s32 1, %v5738_v51 }
 0x1d7   : > { %v6063_v33 = vsub.f32 %v5881_v10, %v2563_v30  ;;  %v2594_v43 = vmul.f32 %v6060_v26, %v6060_v26  ;;  %2224 = vmatprep.subr.bf16.mxu0 %v4597_v23  ;;  %v6101_v30 = vrot.slane %v5744_v53, %v7475_v41 }
 0x1d9   : > { %2624 = vadd.xlane.f32.xlu0 %v2594_v43  ;;  %v2595_v8 = vmul.f32 %v6063_v33, %v6063_v33  ;;  %v6106_v43 = vld [vmem:[%s7459_s7] ss:$0 sm:$0xff]  ;;  %v785_v22 = vadd.f32 %v5775_v11, %v6101_v30  ;;  %v775_v23 = vadd.f32 %v5754_v58, %v6101_v30  ;;  %v789_v53 = vadd.f32 %v5782_v18, %v6101_v30 }
 0x1da   : > { %v779_v29 = vadd.f32 %v5760_v0, %v6101_v30 }
 0x1db   : > { %2626 = vadd.xlane.f32.xlu1 %v2595_v8 }
 0x209   : > { %v4936_v52 = vpop.f32.mrb[32].mxu0 }
 0x20a   : > { %v1317_v8 = vadd.f32 %v4936_v52, %v6106_v43  ;;  %v1308_v62 = vpop.f32.mrb[33].mxu0 }
 0x20b   : > { %v1309_v13 = vadd.f32 %v6106_v43, %v1308_v62  ;;  %v4937_v2 = vpop.f32.mrb[34].mxu0 }
 0x20c   : > { %v1373_v41 = vadd.f32 %v1317_v8, %v785_v22  ;;  %v1320_v10 = vadd.f32 %v4937_v2, %v6106_v43  ;;  %v1311_v49 = vpop.f32.mrb[35].mxu0  ;;  %v805_v2 = vadd.f32 %v5809_v44, %v6101_v30 }
 0x20d   : > { %v1371_v11 = vadd.f32 %v1309_v13, %v775_v23  ;;  %v1312_v52 = vadd.f32 %v6106_v43, %v1311_v49  ;;  %v795_v49 = vadd.f32 %v5792_v27, %v6101_v30 }
 0x20e   : > { %v1374_v14 = vadd.f32 %v1320_v10, %v789_v53 }
 0x20f   : > { %v1372_v48 = vadd.f32 %v1312_v52, %v779_v29 }
 0x210   : > { %v6120_v36 = vpack.c.bf16 %v1374_v14, %v1373_v41  ;;  %v799_v41 = vadd.f32 %v5799_v34, %v6101_v30 }
 0x211   : > { %v1387_v58 = vpack.c.bf16 %v1372_v48, %v1371_v11  ;;  %v809_v48 = vadd.f32 %v5816_v57, %v6101_v30 }
 0x212   : > { %v4583_v62 = vmul.bf16 3216621497, %v6120_v36 }
 0x213   : > { %v4582_v19 = vmul.bf16 3216621497, %v1387_v58 }
 0x214   : > { %5239 = vpow.bf16 %v4583_v62 }
 0x215   : > { %5241 = vpow.bf16 %v4582_v19 }
 0x21a   : > { %v4940_v18 = vpop.f32.mrb[36].mxu0 }
 0x21b   : > { %v1333_v22 = vadd.f32 %v4940_v18, %v6106_v43  ;;  %v1324_v0 = vpop.f32.mrb[37].mxu0 }
 0x21c   : > { %v1325_v29 = vadd.f32 %v6106_v43, %v1324_v0  ;;  %v4941_v14 = vpop.f32.mrb[38].mxu0  ;;  %v825_v0 = vadd.f32 %v5843_v38, %v6101_v30 }
 0x21d   : > { %v1377_v10 = vadd.f32 %v1333_v22, %v805_v2  ;;  %v1336_v13 = vadd.f32 %v4941_v14, %v6106_v43  ;;  %v1327_v19 = vpop.f32.mrb[39].mxu0  ;;  %v815_v14 = vadd.f32 %v5826_v12, %v6101_v30  ;;  %v1469_v12 = vld [vmem:[%s7460_s8 + $0x50] sm:$0xff] }
 0x21e   : > { %v1375_v44 = vadd.f32 %v1325_v29, %v795_v49  ;;  %v1328_v8 = vadd.f32 %v6106_v43, %v1327_v19 }
 0x21f   : > { %v1378_v23 = vadd.f32 %v1336_v13, %v809_v48  ;;  %v5240_v53 = vpop.eup %5239  ;;  %v829_v13 = vadd.f32 %v5851_v55, %v6101_v30  ;;  %v1473_v55 = vld [vmem:[%s7460_s8 + $0x70] sm:$0xff] }
 0x220   : > { %v1376_v11 = vadd.f32 %v1328_v8, %v799_v41  ;;  %v5242_v27 = vpop.eup %5241  ;;  %v1428_v2 = vadd.bf16 1065369472, %v5240_v53  ;;  %v819_v8 = vadd.f32 %v5833_v21, %v6101_v30  ;;  %v1470_v21 = vld [vmem:[%s7460_s8 + $0x58] sm:$0xff] }
 0x221   : > { %v6135_v52 = vpack.c.bf16 %v1378_v23, %v1377_v10  ;;  %v1427_v62 = vadd.bf16 1065369472, %v5242_v27 }
 0x222   : > { %v6137_v18 = vpack.c.bf16 %v1376_v11, %v1375_v44 }
 0x223   : > { %v4585_v57 = vmul.bf16 3216621497, %v6135_v52  ;;  %5243 = vrcp.bf16 %v1427_v62 }
 0x224   : > { %v4584_v22 = vmul.bf16 3216621497, %v6137_v18 }
 0x225   : > { %5245 = vpow.bf16 %v4585_v57 }
 0x226   : > { %5247 = vpow.bf16 %v4584_v22 }
 0x227   : > { %5249 = vrcp.bf16 %v1428_v2  ;;  %v1474_v2 = vld [vmem:[%s7460_s8 + $0x78] sm:$0xff] }
 0x229   : > { %v4944_v34 = vpop.f32.mrb[40].mxu0 }
 0x22a   : > { %v1349_v49 = vadd.f32 %v4944_v34, %v6106_v43  ;;  %v1340_v29 = vpop.f32.mrb[41].mxu0 }
 0x22b   : > { %v1341_v48 = vadd.f32 %v6106_v43, %v1340_v29  ;;  %v4945_v10 = vpop.f32.mrb[42].mxu0 }
 0x22c   : > { %v1381_v19 = vadd.f32 %v1349_v49, %v825_v0  ;;  %v1352_v41 = vadd.f32 %v4945_v10, %v6106_v43  ;;  %v1343_v44 = vpop.f32.mrb[43].mxu0  ;;  %v4603_v10 = vcombine.high %v1469_v12, %v1473_v55 }
 0x22d   : > { %v1379_v38 = vadd.f32 %v1341_v48, %v815_v14  ;;  %v1344_v23 = vadd.f32 %v6106_v43, %v1343_v44  ;;  %v1481_v44 = vld [vmem:[%s7460_s8 + $0xb0] sm:$0xff] }
 0x22e   : > { %v5244_v53 = vpop.eup %5243  ;;  %v1382_v11 = vadd.f32 %v1352_v41, %v829_v13  ;;  %v4605_v13 = vcombine.high %v1470_v21, %v1474_v2  ;;  %v1477_v41 = vld [vmem:[%s7460_s8 + $0x90] sm:$0xff] }
 0x22f   : > { %v1436_v62 = vmul.bf16 1065369472, %v5244_v53  ;;  %v1380_v57 = vadd.f32 %v1344_v23, %v819_v8  ;;  %v1478_v8 = vld [vmem:[%s7460_s8 + $0x98] sm:$0xff]  ;;  %v7498_v23 = vmov 0  }
 0x230   : > { %v5246_v27 = vpop.eup %5245  ;;  %v6165_v34 = vpack.c.bf16 %v1382_v11, %v1381_v19  ;;  %v7499_v11 = vcombine.low %v6070_v47, %v6075_v46  ;;  %v1489_v47 = vld [vmem:[%s7460_s8 + $0xf0] sm:$0xff]  ;;  %v1486_v46 = vld [vmem:[%s7460_s8 + $0xd8] sm:$0xff] }
 0x231   : > { %v5248_v22 = vpop.eup %5247  ;;  %v6167_v0 = vmul.bf16 %v1436_v62, %v1387_v58  ;;  %v6169_v29 = vpack.c.bf16 %v1380_v57, %v1379_v38  ;;  %v1430_v19 = vadd.bf16 1065369472, %v5246_v27  ;;  %v1482_v38 = vld [vmem:[%s7460_s8 + $0xb8] sm:$0xff]  ;;  %v7500_v27 = vcombine.low %v6080_v31, %v6089_v35 }
 0x232   : > { %v1429_v49 = vadd.bf16 1065369472, %v5248_v22  ;;  %v5250_v14 = vpop.eup %5249  ;;  %v4587_v48 = vmul.bf16 3216621497, %v6165_v34  ;;  %v4602_v62 = vcombine.low %v1469_v12, %v1473_v55  ;;  %v4604_v57 = vcombine.low %v1470_v21, %v1474_v2  ;;  %v1490_v31 = vld [vmem:[%s7460_s8 + $0xf8] sm:$0xff] }
 0x233   : > { %v4586_v58 = vmul.bf16 3216621497, %v6169_v29  ;;  %1918 = vmatmul.mubr.bf16.vlgmr.msra.gmra.mrb[32].mxu1 %v6167_v0  ;;  %2031 = vmatmul.mubr.bf16.vlgmr.msra.gmra.mrb[48].mxu0 %v6167_v0  ;;  %v1438_v53 = vmul.bf16 1065369472, %v5250_v14  ;;  %v4611_v22 = vcombine.high %v1477_v41, %v1481_v44  ;;  %v835_v35 = vadd.f32 %v5862_v16, %v6101_v30  ;;  %v6218_v16 = vld [vmem:[%s7460_s8 + $0x110] sm:$0xff] }
 0x234   : > { %5251 = vrcp.bf16 %v1429_v49  ;;  %1927 = vmatprep.mubr.bf16.mxu1 %v7498_v23  ;;  %2040 = vmatprep.mubr.bf16.mxu0 %v7498_v23  ;;  %v4613_v49 = vcombine.high %v1478_v8, %v1482_v38  ;;  %v845_v12 = vadd.f32 %v5877_v60, %v6101_v30  ;;  %v4610_v2 = vcombine.low %v1477_v41, %v1481_v44 }
 0x235   : > { %5253 = vpow.bf16 %v4587_v48  ;;  %2112 = vmatpush1.bf16.msra.mxu1 %v7499_v11  ;;  %2225 = vmatpush1.bf16.msra.mxu0 %v7500_v27  ;;  %v1485_v48 = vld [vmem:[%s7460_s8 + $0xd0] sm:$0xff]  ;;  %v6212_v55 = vmul.bf16 %v1438_v53, %v6120_v36  ;;  %v4612_v14 = vcombine.low %v1478_v8, %v1482_v38  ;;  %v839_v36 = vadd.f32 %v5869_v24, %v6101_v30  ;;  %v1494_v38 = vld [vmem:[%s7460_s8 + $0x118] sm:$0xff] }
 0x236   : > { %5255 = vpow.bf16 %v4586_v58  ;;  %2113 = vmatprep.subr.bf16.mxu1 %v4603_v10  ;;  %2226 = vmatprep.subr.bf16.mxu0 %v4605_v13  ;;  %v4621_v58 = vcombine.high %v1486_v46, %v1490_v31  ;;  %v849_v60 = vadd.f32 %v5899_v4, %v6101_v30  ;;  %v1497_v8 = vld [vmem:[%s7460_s8 + $0x130] sm:$0xff]  ;;  %v1498_v24 = vld [vmem:[%s7460_s8 + $0x138] sm:$0xff]  ;;  %v4618_v11 = vcombine.low %v1485_v48, %v1489_v47 }
 0x237   : > { %5257 = vrcp.bf16 %v1430_v19  ;;  %v4619_v19 = vcombine.high %v1485_v48, %v1489_v47  ;;  %v1502_v47 = vld [vmem:[%s7460_s8 + $0x158] sm:$0xff] }
 0x239   : > { %v4948_v21 = vpop.f32.mrb[44].mxu0  ;;  %2114 = vmatpush1.bf16.msra.mxu1 %v4602_v62  ;;  %2227 = vmatpush1.bf16.msra.mxu0 %v4604_v57  ;;  %v4620_v57 = vcombine.low %v1486_v46, %v1490_v31  ;;  %v1506_v46 = vld [vmem:[%s7460_s8 + $0x178] sm:$0xff] }
 0x23a   : > { %v1365_v10 = vadd.f32 %v4948_v21, %v6106_v43  ;;  %v1356_v13 = vpop.f32.mrb[45].mxu0  ;;  %2115 = vmatprep.subr.bf16.mxu1 %v4611_v22  ;;  %2228 = vmatprep.subr.bf16.mxu0 %v4613_v49  ;;  %v4629_v21 = vcombine.high %v1494_v38, %v1498_v24 }
 0x23b   : > { %v1357_v41 = vadd.f32 %v6106_v43, %v1356_v13  ;;  %v4949_v44 = vpop.f32.mrb[46].mxu0  ;;  %1928 = vmatmul.mubr.bf16.gmra.mrb[36].mxu1 %v6212_v55  ;;  %2041 = vmatmul.mubr.bf16.gmra.mrb[52].mxu0 %v6212_v55 }
 0x23c   : > { %v1385_v4 = vadd.f32 %v1365_v10, %v845_v12  ;;  %v1368_v30 = vadd.f32 %v4949_v44, %v6106_v43  ;;  %v1359_v53 = vpop.f32.mrb[47].mxu0  ;;  %1937 = vmatprep.mubr.bf16.mxu1 %v7498_v23  ;;  %2050 = vmatprep.mubr.bf16.mxu0 %v7498_v23  ;;  %v4627_v12 = vcombine.high %v6218_v16, %v1497_v8  ;;  %v1501_v10 = vld [vmem:[%s7460_s8 + $0x150] sm:$0xff] }
 0x23d   : > { %v1383_v27 = vadd.f32 %v1357_v41, %v835_v35  ;;  %v1360_v62 = vadd.f32 %v6106_v43, %v1359_v53  ;;  %2116 = vmatpush1.bf16.msra.mxu1 %v4610_v2  ;;  %2229 = vmatpush1.bf16.msra.mxu0 %v4612_v14  ;;  %v1505_v43 = vld [vmem:[%s7460_s8 + $0x170] sm:$0xff]  ;;  %v4626_v2 = vcombine.low %v6218_v16, %v1497_v8 }
 0x23e   : > { %v1386_v49 = vadd.f32 %v1368_v30, %v849_v60  ;;  %2117 = vmatprep.subr.bf16.mxu1 %v4619_v19  ;;  %2230 = vmatprep.subr.bf16.mxu0 %v4621_v58  ;;  %v4635_v30 = vcombine.high %v1501_v10, %v1505_v43  ;;  %v4637_v53 = vcombine.high %v1502_v47, %v1506_v46  ;;  %v1509_v16 = vld [vmem:[%s7460_s8 + $0x190] sm:$0xff] }
 0x23f   : > { %v5252_v22 = vpop.eup %5251  ;;  %v1384_v48 = vadd.f32 %v1360_v62, %v839_v36  ;;  %v4628_v36 = vcombine.low %v1494_v38, %v1498_v24  ;;  %v1510_v38 = vld [vmem:[%s7460_s8 + $0x198] sm:$0xff]  ;;  %v4636_v62 = vcombine.low %v1502_v47, %v1506_v46 }
 0x240   : > { %v5254_v13 = vpop.eup %5253  ;;  %v1440_v44 = vmul.bf16 1065369472, %v5252_v22  ;;  %v6253_v35 = vpack.c.bf16 %v1386_v49, %v1385_v4  ;;  %v1514_v24 = vld [vmem:[%s7460_s8 + $0x1b8] sm:$0xff]  ;;  %v1517_v49 = vld [vmem:[%s7460_s8 + $0x1d0] sm:$0xff] }
 0x241   : > { %v5256_v31 = vpop.eup %5255  ;;  %v6259_v58 = vpack.c.bf16 %v1384_v48, %v1383_v27  ;;  %2118 = vmatpush1.bf16.msra.mxu1 %v4618_v11  ;;  %2231 = vmatpush1.bf16.msra.mxu0 %v4620_v57  ;;  %v1432_v8 = vadd.bf16 1065369472, %v5254_v13  ;;  %v4634_v27 = vcombine.low %v1501_v10, %v1505_v43  ;;  %v4645_v22 = vcombine.high %v1510_v38, %v1514_v24  ;;  %v1522_v10 = vld [vmem:[%s7460_s8 + $0x1f8] sm:$0xff] }
 0x242   : > { %v6257_v14 = vmul.bf16 %v1440_v44, %v6137_v18  ;;  %v1431_v19 = vadd.bf16 1065369472, %v5256_v31  ;;  %v5258_v60 = vpop.eup %5257  ;;  %v4589_v41 = vmul.bf16 3216621497, %v6253_v35  ;;  %2119 = vmatprep.subr.bf16.mxu1 %v4627_v12  ;;  %2232 = vmatprep.subr.bf16.mxu0 %v4629_v21  ;;  %v1513_v18 = vld [vmem:[%s7460_s8 + $0x1b0] sm:$0xff]  ;;  %v1518_v21 = vld [vmem:[%s7460_s8 + $0x1d8] sm:$0xff]  ;;  %v4644_v48 = vcombine.low %v1510_v38, %v1514_v24 }
 0x243   : > { %v4588_v4 = vmul.bf16 3216621497, %v6259_v58  ;;  %v1442_v11 = vmul.bf16 1065369472, %v5258_v60  ;;  %v4643_v57 = vcombine.high %v1509_v16, %v1513_v18  ;;  %v1521_v12 = vld [vmem:[%s7460_s8 + $0x1f0] sm:$0xff]  ;;  %v4642_v44 = vcombine.low %v1509_v16, %v1513_v18 }
 0x244   : > { %5259 = vrcp.bf16 %v1431_v19  ;;  %1938 = vmatmul.mubr.bf16.gmra.mrb[40].mxu1 %v6257_v14  ;;  %2051 = vmatmul.mubr.bf16.gmra.mrb[56].mxu0 %v6257_v14  ;;  %v4651_v43 = vcombine.high %v1517_v49, %v1521_v12  ;;  %v4653_v47 = vcombine.high %v1518_v21, %v1522_v10  ;;  %v4652_v46 = vcombine.low %v1518_v21, %v1522_v10 }
 0x245   : > { %5261 = vpow.bf16 %v4589_v41  ;;  %1947 = vmatprep.mubr.bf16.mxu1 %v7498_v23  ;;  %2060 = vmatprep.mubr.bf16.mxu0 %v7498_v23  ;;  %v6292_v13 = vmul.bf16 %v1442_v11, %v6135_v52  ;;  %v4650_v52 = vcombine.low %v1517_v49, %v1521_v12 }
 0x246   : > { %5263 = vpow.bf16 %v4588_v4  ;;  %2120 = vmatpush1.bf16.msra.mxu1 %v4626_v2  ;;  %2233 = vmatpush1.bf16.msra.mxu0 %v4628_v36  ;;  %v5167_v2 = vld [vmem:[%s7464_s12] sm:$0xff]  }
 0x247   : > { %2121 = vmatprep.subr.bf16.mxu1 %v4635_v30  ;;  %2234 = vmatprep.subr.bf16.mxu0 %v4637_v53  ;;  %5265 = vrcp.bf16 %v1432_v8 }
 0x24a   : > { %2122 = vmatpush1.bf16.msra.mxu1 %v4634_v27  ;;  %2235 = vmatpush1.bf16.msra.mxu0 %v4636_v62  ;;  %v5173_v27 = vld [vmem:[%s7464_s12 + $0x30] sm:$0xff]   ;;  %v5174_v62 = vld [vmem:[%s7464_s12 + $0x38] sm:$0xff]  }
 0x24b   : > { %2123 = vmatprep.subr.bf16.mxu1 %v4643_v57  ;;  %2236 = vmatprep.subr.bf16.mxu0 %v4645_v22  ;;  %v2597_v57 = vpop.xlane.xlu0 %2596  ;;  %v2599_v22 = vpop.xlane.xlu1 %2598 }
 0x24c   : > { %1948 = vmatmul.mubr.bf16.gmra.mrb[44].mxu1 %v6292_v13  ;;  %2061 = vmatmul.mubr.bf16.gmra.mrb[60].mxu0 %v6292_v13  ;;  %v2628_v49 = vmul.f32 0.0078125, %v2597_v57  ;;  %v2629_v12 = vmul.f32 0.0078125, %v2599_v22  ;;  %v7502_v22 = vsub.s32 0, %v5738_v51 }
 0x24d   : > { %1957 = vmatprep.mubr.bf16.mxu1 %v7498_v23  ;;  %2070 = vmatprep.mubr.bf16.mxu0 %v7498_v23 }
 0x24e   : > { %2124 = vmatpush1.bf16.msra.mxu1 %v4642_v44  ;;  %2237 = vmatpush1.bf16.msra.mxu0 %v4644_v48  ;;  %v2644_v21 = vadd.f32 1e-06, %v2628_v49 }
 0x24f   : > { %v5260_v31 = vpop.eup %5259  ;;  %2125 = vmatprep.subr.bf16.mxu1 %v4651_v43  ;;  %2238 = vmatprep.subr.bf16.mxu0 %v4653_v47  ;;  %v2601_v10 = vpop.xlane.xlu0 %2600 }
 0x250   : > { %v5262_v19 = vpop.eup %5261  ;;  %v1444_v36 = vmul.bf16 1065369472, %v5260_v31  ;;  %v2603_v44 = vpop.xlane.xlu1 %2602  ;;  %v2630_v48 = vmul.f32 0.0078125, %v2601_v10 }
 0x251   : > { %v5264_v60 = vpop.eup %5263  ;;  %v1434_v16 = vadd.bf16 1065369472, %v5262_v19  ;;  %v2631_v43 = vmul.f32 0.0078125, %v2603_v44 }
 0x252   : > { %v6302_v41 = vmul.bf16 %v1444_v36, %v6169_v29  ;;  %v1433_v30 = vadd.bf16 1065369472, %v5264_v60  ;;  %2126 = vmatpush1.bf16.msra.mxu1 %v4650_v52  ;;  %2239 = vmatpush1.bf16.msra.mxu0 %v4652_v46  ;;  %v5266_v53 = vpop.eup %5265  ;;  %v2646_v47 = vadd.f32 1e-06, %v2630_v48 }
 0x253   : > { %4950 = vmatprep.subr.bf16.mxu1 %v5167_v2  ;;  %v1446_v18 = vmul.bf16 1065369472, %v5266_v53  ;;  %v2605_v52 = vpop.xlane.xlu0 %2604  ;;  %v2647_v46 = vadd.f32 1e-06, %v2631_v43 }
 0x254   : > { %5267 = vrcp.bf16 %v1433_v30  ;;  %1958 = vmatmul.mubr.bf16.gmra.mrb[48].mxu1 %v6302_v41  ;;  %2071 = vmatmul.mubr.bf16.gmra.mrb[64].mxu0 %v6302_v41  ;;  %v2607_v31 = vpop.xlane.xlu1 %2606  ;;  %v6365_v30 = vld [vmem:[%s7461_s9] sm:$0xff] }
 0x255   : > { %1967 = vmatprep.mubr.bf16.mxu1 %v7498_v23  ;;  %2080 = vmatprep.mubr.bf16.mxu0 %v7498_v23  ;;  %5269 = vrcp.bf16 %v1434_v16  ;;  %v1456_v29 = vmul.bf16 %v1446_v18, %v6165_v34  ;;  %v6393_v49 = vrot.slane %v6365_v30, %v7502_v22 }
 0x256   : > { %5271 = vrsqrt.f32 %v2644_v21 }
 0x258   : > { %v2611_v16 = vpop.xlane.xlu1 %2610 }
 0x25c   : > { %1968 = vmatmul.mubr.bf16.gmra.mrb[52].mxu1 %v1456_v29  ;;  %2081 = vmatmul.mubr.bf16.gmra.mrb[68].mxu0 %v1456_v29 }
 0x25d   : > { %1977 = vmatprep.mubr.bf16.mxu1 %v7498_v23  ;;  %2090 = vmatprep.mubr.bf16.mxu0 %v7498_v23 }
 0x25f   : > { %v5268_v8 = vpop.eup %5267 }
 0x260   : > { %v1448_v4 = vmul.bf16 1065369472, %v5268_v8  ;;  %v5270_v24 = vpop.eup %5269  ;;  %v6371_v8 = vld [vmem:[%s7462_s10] ss:$0 sm:$0xff] }
 0x261   : > { %v1450_v11 = vmul.bf16 1065369472, %v5270_v24  ;;  %v5272_v19 = vpop.eup %5271 }
 0x262   : > { %v1457_v38 = vmul.bf16 %v1448_v4, %v6259_v58  ;;  %v5168_v58 = vld [vmem:[%s7464_s12 + $0x8] sm:$0xff]   ;;  %v2676_v18 = vmul.f32 %v5272_v19, %v5930_v5 }
 0x263   : > { %v1458_v34 = vmul.bf16 %v1450_v11, %v6253_v35  ;;  %v5169_v35 = vld [vmem:[%s7464_s12 + $0x10] sm:$0xff]   ;;  %v2635_v11 = vmul.f32 0.0078125, %v2611_v16 }
 0x264   : > { %1978 = vmatmul.mubr.bf16.gmra.mrb[56].mxu1 %v1457_v38  ;;  %2091 = vmatmul.mubr.bf16.gmra.mrb[72].mxu0 %v1457_v38 }
 0x265   : > { %1987 = vmatprep.mubr.bf16.mxu1 %v7498_v23  ;;  %2100 = vmatprep.mubr.bf16.mxu0 %v7498_v23 }
 0x26c   : > { %1988 = vmatmul.mubr.bf16.gmra.mrb[60].mxu1 %v1458_v34  ;;  %2101 = vmatmul.mubr.bf16.gmra.mrb[76].mxu0 %v1458_v34 }
 0x26d   : > { %2143 = vmatprep.mubr.bf16.mxu1 %v7498_v23  ;;  %2256 = vmatprep.mubr.bf16.mxu0 %v7498_v23 }
 0x274   : > { %2144 = vmatmul.mubr.bf16.vlgmr.msra.gmra.mrb[64].mxu1 %v6167_v0  ;;  %2257 = vmatmul.mubr.bf16.vlgmr.msra.gmra.mrb[80].mxu0 %v6167_v0  ;;  %v5170_v0 = vld [vmem:[%s7464_s12 + $0x18] sm:$0xff]  }
 0x275   : > { %2153 = vmatprep.mubr.bf16.mxu1 %v7498_v23  ;;  %2266 = vmatprep.mubr.bf16.mxu0 %v7498_v23 }
 0x276   : > { %4951 = vmatpush3.bf16.msra.mxu1 %v5167_v2  ;;  %v2633_v2 = vmul.f32 0.0078125, %v2607_v31  ;;  %v2615_v31 = vpop.xlane.xlu1 %2614 }
 0x277   : > { %4952 = vmatprep.subr.bf16.mxu1 %v5168_v58 }
 0x278   : > { %v2649_v53 = vadd.f32 1e-06, %v2633_v2 }
 0x27a   : > { %4953 = vmatpush3.bf16.msra.mxu1 %v5168_v58 }
 0x27b   : > { %4954 = vmatprep.subr.bf16.mxu1 %v5169_v35 }
 0x27c   : > { %2154 = vmatmul.mubr.bf16.gmra.mrb[68].mxu1 %v6212_v55  ;;  %2267 = vmatmul.mubr.bf16.gmra.mrb[84].mxu0 %v6212_v55  ;;  %v5171_v55 = vld [vmem:[%s7464_s12 + $0x20] sm:$0xff]  }
 0x27d   : > { %2163 = vmatprep.mubr.bf16.mxu1 %v7498_v23  ;;  %2276 = vmatprep.mubr.bf16.mxu0 %v7498_v23 }
 0x27e   : > { %4955 = vmatpush3.bf16.msra.mxu1 %v5169_v35 }
 0x27f   : > { %4956 = vmatprep.subr.bf16.mxu1 %v5170_v0 }
 0x282   : > { %4957 = vmatpush3.bf16.msra.mxu1 %v5170_v0  ;;  %v2698_v0 = vmul.f32 %v6371_v8, %v2676_v18  ;;  %v2637_v18 = vmul.f32 0.0078125, %v2615_v31 }
 0x283   : > { %4958 = vmatprep.subr.bf16.mxu1 %v5171_v55 }
 0x284   : > { %2164 = vmatmul.mubr.bf16.gmra.mrb[72].mxu1 %v6257_v14  ;;  %2277 = vmatmul.mubr.bf16.gmra.mrb[88].mxu0 %v6257_v14  ;;  %v5172_v14 = vld [vmem:[%s7464_s12 + $0x28] sm:$0xff]  }
 0x285   : > { %2173 = vmatprep.mubr.bf16.mxu1 %v7498_v23  ;;  %2286 = vmatprep.mubr.bf16.mxu0 %v7498_v23 }
 0x286   : > { %4959 = vmatpush3.bf16.msra.mxu1 %v5171_v55 }
 0x287   : > { %4960 = vmatprep.subr.bf16.mxu1 %v5172_v14 }
 0x28a   : > { %4961 = vmatpush3.bf16.msra.mxu1 %v5172_v14 }
 0x28b   : > { %4962 = vmatprep.subr.bf16.mxu1 %v5173_v27 }
 0x28c   : > { %2174 = vmatmul.mubr.bf16.gmra.mrb[76].mxu1 %v6292_v13  ;;  %2287 = vmatmul.mubr.bf16.gmra.mrb[92].mxu0 %v6292_v13  ;;  %v2645_v13 = vadd.f32 1e-06, %v2629_v12 }
 0x28d   : > { %2183 = vmatprep.mubr.bf16.mxu1 %v7498_v23  ;;  %2296 = vmatprep.mubr.bf16.mxu0 %v7498_v23 }
 0x28e   : > { %4963 = vmatpush3.bf16.msra.mxu1 %v5173_v27  ;;  %5273 = vrsqrt.f32 %v2645_v13  ;;  %v2651_v13 = vadd.f32 1e-06, %v2635_v11 }
 0x28f   : > { %4964 = vmatprep.subr.bf16.mxu1 %v5174_v62  ;;  %5275 = vrsqrt.f32 %v2646_v47 }
 0x290   : > { %5277 = vrsqrt.f32 %v2647_v46 }
 0x292   : > { %4965 = vmatpush3.bf16.msra.mxu1 %v5174_v62 }
 0x294   : > { %2184 = vmatmul.mubr.bf16.gmra.mrb[80].mxu1 %v6302_v41  ;;  %2297 = vmatmul.mubr.bf16.gmra.mrb[96].mxu0 %v6302_v41  ;;  %v2609_v41 = vpop.xlane.xlu0 %2608 }
 0x295   : > { %2193 = vmatprep.mubr.bf16.mxu1 %v7498_v23  ;;  %2306 = vmatprep.mubr.bf16.mxu0 %v7498_v23 }
 0x298   : > { %v5274_v36 = vpop.eup %5273 }
 0x299   : > { %v2677_v4 = vmul.f32 %v5274_v36, %v5941_v28  ;;  %v5276_v58 = vpop.eup %5275  ;;  %v6385_v28 = vld [vmem:[%s7463_s11] ss:$0 sm:$0xff] }
 0x29a   : > { %v5278_v57 = vpop.eup %5277  ;;  %v2678_v43 = vmul.f32 %v5276_v58, %v5952_v45  ;;  %v2720_v47 = vadd.f32 %v6385_v28, %v2698_v0 }
 0x29b   : > { %v2699_v62 = vmul.f32 %v6371_v8, %v2677_v4  ;;  %v2679_v2 = vmul.f32 %v5278_v57, %v5969_v3 }
 0x29c   : > { %2194 = vmatmul.mubr.bf16.gmra.mrb[84].mxu1 %v1456_v29  ;;  %2307 = vmatmul.mubr.bf16.gmra.mrb[100].mxu0 %v1456_v29  ;;  %v2634_v29 = vmul.f32 0.0078125, %v2609_v41  ;;  %v2700_v45 = vmul.f32 %v6371_v8, %v2678_v43  ;;  %v2653_v43 = vadd.f32 1e-06, %v2637_v18 }
 0x29d   : > { %2203 = vmatprep.mubr.bf16.mxu1 %v7498_v23  ;;  %2316 = vmatprep.mubr.bf16.mxu0 %v7498_v23 }
 0x29e   : > { %v2650_v55 = vadd.f32 1e-06, %v2634_v29 }
 0x2a4   : > { %2204 = vmatmul.mubr.bf16.gmra.mrb[88].mxu1 %v1457_v38  ;;  %2317 = vmatmul.mubr.bf16.gmra.mrb[104].mxu0 %v1457_v38  ;;  %v7501_v38 = vsub.s32 1, %v5738_v51 }
 0x2a5   : > { %2213 = vmatprep.mubr.bf16.mxu1 %v7498_v23  ;;  %2326 = vmatprep.mubr.bf16.mxu0 %v7498_v23  ;;  %v2632_v23 = vmul.f32 0.0078125, %v2605_v52 }
 0x2a6   : > { %v6377_v24 = vrot.slane %v6365_v30, %v7501_v38 }
 0x2a7   : > { %v2648_v60 = vadd.f32 1e-06, %v2632_v23  ;;  %v2721_v23 = vadd.f32 %v6385_v28, %v2699_v62 }
 0x2a9   : > { %5279 = vrsqrt.f32 %v2648_v60 }
 0x2aa   : > { %5281 = vrsqrt.f32 %v2649_v53 }
 0x2ab   : > { %5283 = vrsqrt.f32 %v2650_v55 }
 0x2ac   : > { %2214 = vmatmul.mubr.bf16.gmra.mrb[92].mxu1 %v1458_v34  ;;  %2327 = vmatmul.mubr.bf16.gmra.mrb[108].mxu0 %v1458_v34  ;;  %v2613_v34 = vpop.xlane.xlu0 %2612  ;;  %5285 = vrsqrt.f32 %v2651_v13 }
 0x2ad   : > { %v2636_v19 = vmul.f32 0.0078125, %v2613_v34  ;;  %v2701_v34 = vmul.f32 %v6371_v8, %v2679_v2  ;;  %v2619_v2 = vpop.xlane.xlu1 %2618 }
 0x2af   : > { %v2652_v55 = vadd.f32 1e-06, %v2636_v19  ;;  %v2723_v31 = vadd.f32 %v6385_v28, %v2701_v34  ;;  %v2639_v34 = vmul.f32 0.0078125, %v2619_v2 }
 0x2b0   : > { %v2617_v53 = vpop.xlane.xlu0 %2616 }
 0x2b1   : > { %5287 = vrsqrt.f32 %v2652_v55  ;;  %v2655_v2 = vadd.f32 1e-06, %v2639_v34 }
 0x2b2   : > { %5289 = vrsqrt.f32 %v2653_v43 }
 0x2b3   : > { %v5280_v16 = vpop.eup %5279 }
 0x306   : > { %v1919_v35 = vpop.f32.mrb[32].mxu1  ;;  %v6379_v5 = vpop.f32.mrb[48].mxu0 }
 0x307   : > { %v1921_v14 = vpop.f32.mrb[33].mxu1  ;;  %v6387_v27 = vpop.f32.mrb[49].mxu0  ;;  %v1920_v36 = vadd.f32 %v1919_v35, %v6393_v49 }
 0x308   : > { %v1922_v12 = vadd.f32 %v1921_v14, %v6377_v24  ;;  %v1923_v21 = vpop.f32.mrb[34].mxu1  ;;  %v6396_v10 = vpop.f32.mrb[50].mxu0 }
 0x309   : > { %v1925_v44 = vpop.f32.mrb[35].mxu1  ;;  %v6398_v48 = vpop.f32.mrb[51].mxu0  ;;  %v1924_v4 = vadd.f32 %v1923_v21, %v6393_v49 }
 0x30a   : > { %v2736_v52 = vadd.f32 1.0, %v1922_v12  ;;  %v1926_v46 = vadd.f32 %v1925_v44, %v6377_v24  ;;  %v5282_v35 = vpop.eup %5281  ;;  %v2722_v12 = vadd.f32 %v6385_v28, %v2700_v45  ;;  %v2680_v44 = vmul.f32 %v5280_v16, %v5986_v39 }
 0x30b   : > { %v2638_v45 = vmul.f32 0.0078125, %v2617_v53 }
 0x30c   : > { %v2752_v60 = vmul.f32 %v2736_v52, %v2720_v47  ;;  %v2737_v41 = vadd.f32 1.0, %v1926_v46  ;;  %v2702_v39 = vmul.f32 %v6371_v8, %v2680_v44 }
 0x30e   : > { %v2768_v29 = vadd.f32 %v2752_v60, %v1920_v36  ;;  %v2753_v38 = vmul.f32 %v2737_v41, %v2721_v23  ;;  %v1929_v11 = vpop.f32.mrb[36].mxu1  ;;  %v6408_v58 = vpop.f32.mrb[52].mxu0  ;;  %v2681_v23 = vmul.f32 %v5282_v35, %v5989_v59 }
 0x30f   : > { %v1931_v0 = vpop.f32.mrb[37].mxu1  ;;  %v6410_v3 = vpop.f32.mrb[53].mxu0  ;;  %v1930_v19 = vadd.f32 %v1929_v11, %v6393_v49 }
 0x310   : > { %v2769_v14 = vadd.f32 %v2753_v38, %v1924_v4  ;;  %v1932_v62 = vadd.f32 %v1931_v0, %v6377_v24  ;;  %v1933_v57 = vpop.f32.mrb[38].mxu1  ;;  %v6414_v22 = vpop.f32.mrb[54].mxu0  ;;  %v2703_v55 = vmul.f32 %v6371_v8, %v2681_v23 }
 0x311   : > { %v1935_v21 = vpop.f32.mrb[39].mxu1  ;;  %v6417_v13 = vpop.f32.mrb[55].mxu0  ;;  %v1934_v18 = vadd.f32 %v1933_v57, %v6393_v49 }
 0x312   : > { %v2738_v47 = vadd.f32 1.0, %v1932_v62  ;;  %v1936_v52 = vadd.f32 %v1935_v21, %v6377_v24  ;;  %v2800_v46 = vpack.c.bf16 %v2769_v14, %v2768_v29  ;;  %v5284_v41 = vpop.eup %5283  ;;  %v2621_v4 = vpop.xlane.xlu0 %2620  ;;  %v2654_v21 = vadd.f32 1e-06, %v2638_v45 }
 0x313   : > { %v5286_v59 = vpop.eup %5285  ;;  %v2682_v43 = vmul.f32 %v5284_v41, %v6020_v40  ;;  %v2623_v23 = vpop.xlane.xlu1 %2622 }
 0x314   : > { %v2754_v36 = vmul.f32 %v2738_v47, %v2722_v12  ;;  %v2739_v60 = vadd.f32 1.0, %v1936_v52  ;;  %4966 = vmatprep.mubr.bf16.mxu1 %v2800_v46  ;;  %v2724_v52 = vadd.f32 %v6385_v28, %v2702_v39  ;;  %5291 = vrsqrt.f32 %v2654_v21  ;;  %v5288_v41 = vpop.eup %5287 }
 0x315   : > { %v2704_v40 = vmul.f32 %v6371_v8, %v2682_v43  ;;  %v2641_v39 = vmul.f32 0.0078125, %v2623_v23  ;;  %5293 = vrsqrt.f32 %v2655_v2 }
 0x316   : > { %v2770_v16 = vadd.f32 %v2754_v36, %v1930_v19  ;;  %v2755_v29 = vmul.f32 %v2739_v60, %v2723_v31  ;;  %v2725_v19 = vadd.f32 %v6385_v28, %v2703_v55  ;;  %v2683_v36 = vmul.f32 %v5286_v59, %v6023_v1  ;;  %v5290_v59 = vpop.eup %5289  ;;  %v2625_v23 = vpop.xlane.xlu0 %2624 }
 0x317   : > { %v1939_v38 = vpop.f32.mrb[40].mxu1  ;;  %v6426_v0 = vpop.f32.mrb[56].mxu0  ;;  %v2640_v60 = vmul.f32 0.0078125, %v2621_v4  ;;  %v2657_v2 = vadd.f32 1e-06, %v2641_v39 }
 0x318   : > { %v1941_v35 = vpop.f32.mrb[41].mxu1  ;;  %v6428_v11 = vpop.f32.mrb[57].mxu0  ;;  %v2771_v14 = vadd.f32 %v2755_v29, %v1934_v18  ;;  %v1940_v45 = vadd.f32 %v1939_v38, %v6393_v49  ;;  %v2705_v38 = vmul.f32 %v6371_v8, %v2683_v36 }
 0x319   : > { %v1942_v53 = vadd.f32 %v1941_v35, %v6377_v24  ;;  %v1943_v62 = vpop.f32.mrb[42].mxu1  ;;  %v6432_v12 = vpop.f32.mrb[58].mxu0  ;;  %v2656_v55 = vadd.f32 1e-06, %v2640_v60 }
 0x31a   : > { %v1945_v44 = vpop.f32.mrb[43].mxu1  ;;  %v6434_v57 = vpop.f32.mrb[59].mxu0  ;;  %v2801_v47 = vpack.c.bf16 %v2771_v14, %v2770_v16  ;;  %v1944_v35 = vadd.f32 %v1943_v62, %v6393_v49  ;;  %v2726_v62 = vadd.f32 %v6385_v28, %v2704_v40  ;;  %v2727_v60 = vadd.f32 %v6385_v28, %v2705_v38 }
 0x31b   : > { %7503 = vst [vmem:[#allocation10_spill] sm:$0xff] %v6434_v57  ;;  %v2740_v46 = vadd.f32 1.0, %v1942_v53  ;;  %v1946_v31 = vadd.f32 %v1945_v44, %v6377_v24  ;;  %5295 = vrsqrt.f32 %v2656_v55 }
 0x31c   : > { %4967 = vmatmul.mubr.bf16.vlgmr.msra.gmra.mrb[96].mxu1 %v2801_v47  ;;  %5297 = vrsqrt.f32 %v2657_v2 }
 0x31d   : > { %v2756_v18 = vmul.f32 %v2740_v46, %v2724_v52  ;;  %v2741_v29 = vadd.f32 1.0, %v1946_v31  ;;  %v2684_v31 = vmul.f32 %v5288_v41, %v6030_v15 }
 0x31e   : > { %v5292_v38 = vpop.eup %5291 }
 0x31f   : > { %v2772_v16 = vadd.f32 %v2756_v18, %v1940_v45  ;;  %v2757_v34 = vmul.f32 %v2741_v29, %v2725_v19  ;;  %v1949_v14 = vpop.f32.mrb[44].mxu1  ;;  %v6444_v53 = vpop.f32.mrb[60].mxu0  ;;  %v2685_v18 = vmul.f32 %v5290_v59, %v6033_v20  ;;  %v2706_v15 = vmul.f32 %v6371_v8, %v2684_v31 }
 0x320   : > { %v1951_v1 = vpop.f32.mrb[45].mxu1  ;;  %v6446_v4 = vpop.f32.mrb[61].mxu0 }
 0x321   : > { %7504 = vst [vmem:[#allocation11_spill] sm:$0xff] %v6446_v4  ;;  %v2773_v21 = vadd.f32 %v2757_v34, %v1944_v35  ;;  %v1952_v44 = vadd.f32 %v1951_v1, %v6377_v24  ;;  %v1953_v43 = vpop.f32.mrb[46].mxu1  ;;  %v6450_v47 = vpop.f32.mrb[62].mxu0  ;;  %v1950_v35 = vadd.f32 %v1949_v14, %v6393_v49  ;;  %v2642_v1 = vmul.f32 0.0078125, %v2625_v23 }
 0x322   : > { %v1955_v52 = vpop.f32.mrb[47].mxu1  ;;  %v6453_v46 = vpop.f32.mrb[63].mxu0  ;;  %v1954_v39 = vadd.f32 %v1953_v43, %v6393_v49  ;;  %v2707_v14 = vmul.f32 %v6371_v8, %v2685_v18  ;;  %v2728_v43 = vadd.f32 %v6385_v28, %v2706_v15 }
 0x323   : > { %7505 = vst [vmem:[#allocation12_spill] sm:$0xff] %v6453_v46  ;;  %v2742_v19 = vadd.f32 1.0, %v1952_v44  ;;  %v1956_v36 = vadd.f32 %v1955_v52, %v6377_v24  ;;  %v2802_v45 = vpack.c.bf16 %v2773_v21, %v2772_v16  ;;  %v2627_v29 = vpop.xlane.xlu1 %2626  ;;  %v5294_v2 = vpop.eup %5293 }
 0x324   : > { %v2643_v20 = vmul.f32 0.0078125, %v2627_v29 }
 0x325   : > { %v2758_v40 = vmul.f32 %v2742_v19, %v2726_v62  ;;  %v2743_v34 = vadd.f32 1.0, %v1956_v36  ;;  %4970 = vmatprep.mubr.bf16.mxu1 %v2802_v45  ;;  %v2658_v19 = vadd.f32 1e-06, %v2642_v1  ;;  %v2687_v1 = vmul.f32 %v5294_v2, %v6043_v37  ;;  %v5296_v15 = vpop.eup %5295 }
 0x326   : > { %v2659_v18 = vadd.f32 1e-06, %v2643_v20 }
 0x327   : > { %v2774_v41 = vadd.f32 %v2758_v40, %v1950_v35  ;;  %v2759_v44 = vmul.f32 %v2743_v34, %v2727_v60  ;;  %v1959_v16 = vpop.f32.mrb[48].mxu1  ;;  %v6462_v21 = vpop.f32.mrb[64].mxu0  ;;  %v2686_v40 = vmul.f32 %v5292_v38, %v6040_v54  ;;  %v2729_v34 = vadd.f32 %v6385_v28, %v2707_v14 }
 0x328   : > { %v1961_v59 = vpop.f32.mrb[49].mxu1  ;;  %v6464_v55 = vpop.f32.mrb[65].mxu0  ;;  %5299 = vrsqrt.f32 %v2658_v19  ;;  %v2709_v19 = vmul.f32 %v6371_v8, %v2687_v1 }
 0x329   : > { %7506 = vst [vmem:[#allocation13_spill] sm:$0xff] %v6464_v55  ;;  %v2775_v62 = vadd.f32 %v2759_v44, %v1954_v39  ;;  %v1962_v52 = vadd.f32 %v1961_v59, %v6377_v24  ;;  %v1963_v23 = vpop.f32.mrb[50].mxu1  ;;  %v6468_v31 = vpop.f32.mrb[66].mxu0  ;;  %v1960_v39 = vadd.f32 %v1959_v16, %v6393_v49  ;;  %v2708_v54 = vmul.f32 %v6371_v8, %v2686_v40 }
 0x32a   : > { %v1965_v36 = vpop.f32.mrb[51].mxu1  ;;  %v6471_v45 = vpop.f32.mrb[67].mxu0  ;;  %5301 = vrsqrt.f32 %v2659_v18 }
 0x32b   : > { %7507 = vst [vmem:[#allocation14_spill] sm:$0xff] %v6471_v45  ;;  %v2744_v60 = vadd.f32 1.0, %v1962_v52  ;;  %v1966_v29 = vadd.f32 %v1965_v36, %v6377_v24  ;;  %v2803_v35 = vpack.c.bf16 %v2775_v62, %v2774_v41  ;;  %v1964_v52 = vadd.f32 %v1963_v23, %v6393_v49  ;;  %v5298_v16 = vpop.eup %5297 }
 0x32d   : > { %v2760_v44 = vmul.f32 %v2744_v60, %v2728_v43  ;;  %v2745_v59 = vadd.f32 1.0, %v1966_v29  ;;  %4971 = vmatmul.mubr.bf16.gmra.mrb[100].mxu1 %v2803_v35  ;;  %v2688_v60 = vmul.f32 %v5296_v15, %v6050_v61  ;;  %v2730_v29 = vadd.f32 %v6385_v28, %v2708_v54 }
 0x32f   : > { %v2776_v55 = vadd.f32 %v2760_v44, %v1960_v39  ;;  %v2761_v45 = vmul.f32 %v2745_v59, %v2729_v34  ;;  %v1969_v36 = vpop.f32.mrb[52].mxu1  ;;  %v6479_v41 = vpop.f32.mrb[68].mxu0  ;;  %v2731_v44 = vadd.f32 %v6385_v28, %v2709_v19  ;;  %v2710_v1 = vmul.f32 %v6371_v8, %v2688_v60 }
 0x330   : > { %v1971_v38 = vpop.f32.mrb[53].mxu1  ;;  %v6482_v20 = vpop.f32.mrb[69].mxu0  ;;  %v1970_v34 = vadd.f32 %v1969_v36, %v6393_v49 }
 0x331   : > { %7508 = vst [vmem:[#allocation15_spill] sm:$0xff] %v6482_v20  ;;  %v2777_v14 = vadd.f32 %v2761_v45, %v1964_v52  ;;  %v1972_v62 = vadd.f32 %v1971_v38, %v6377_v24  ;;  %v1973_v37 = vpop.f32.mrb[54].mxu1  ;;  %v6485_v2 = vpop.f32.mrb[70].mxu0  ;;  %v2689_v45 = vmul.f32 %v5298_v16, %v6053_v6 }
 0x332   : > { %v1975_v23 = vpop.f32.mrb[55].mxu1  ;;  %v6488_v43 = vpop.f32.mrb[71].mxu0  ;;  %v1974_v61 = vadd.f32 %v1973_v37, %v6393_v49 }
 0x333   : > { %7509 = vst [vmem:[#allocation16_spill] sm:$0xff] %v6488_v43  ;;  %v2746_v35 = vadd.f32 1.0, %v1972_v62  ;;  %v1976_v40 = vadd.f32 %v1975_v23, %v6377_v24  ;;  %v2804_v18 = vpack.c.bf16 %v2777_v14, %v2776_v55  ;;  %v5300_v62 = vpop.eup %5299  ;;  %v2711_v6 = vmul.f32 %v6371_v8, %v2689_v45 }
 0x334   : > { %v5302_v60 = vpop.eup %5301 }
 0x335   : > { %v2762_v39 = vmul.f32 %v2746_v35, %v2730_v29  ;;  %v2747_v59 = vadd.f32 1.0, %v1976_v40  ;;  %4974 = vmatprep.mubr.bf16.mxu1 %v2804_v18  ;;  %v2732_v29 = vadd.f32 %v6385_v28, %v2710_v1  ;;  %v2733_v45 = vadd.f32 %v6385_v28, %v2711_v6 }
 0x337   : > { %v2778_v52 = vadd.f32 %v2762_v39, %v1970_v34  ;;  %v2763_v15 = vmul.f32 %v2747_v59, %v2731_v44  ;;  %v1979_v54 = vpop.f32.mrb[56].mxu1  ;;  %v6498_v38 = vpop.f32.mrb[72].mxu0  ;;  %v2690_v39 = vmul.f32 %v5300_v62, %v6060_v26 }
 0x338   : > { %v1981_v55 = vpop.f32.mrb[57].mxu1  ;;  %v6500_v14 = vpop.f32.mrb[73].mxu0  ;;  %v1980_v44 = vadd.f32 %v1979_v54, %v6393_v49 }
 0x339   : > { %7510 = vst [vmem:[#allocation17_spill] sm:$0xff] %v6500_v14  ;;  %v2779_v36 = vadd.f32 %v2763_v15, %v1974_v61  ;;  %v1982_v16 = vadd.f32 %v1981_v55, %v6377_v24  ;;  %v1983_v19 = vpop.f32.mrb[58].mxu1  ;;  %v6504_v23 = vpop.f32.mrb[74].mxu0  ;;  %v2691_v15 = vmul.f32 %v5302_v60, %v6063_v33 }
 0x33a   : > { %v1985_v37 = vpop.f32.mrb[59].mxu1  ;;  %v6507_v35 = vpop.f32.mrb[75].mxu0  ;;  %v1984_v1 = vadd.f32 %v1983_v19, %v6393_v49 }
 0x33b   : > { %7511 = vst [vmem:[#allocation18_spill] sm:$0xff] %v6507_v35  ;;  %v2748_v40 = vadd.f32 1.0, %v1982_v16  ;;  %v1986_v18 = vadd.f32 %v1985_v37, %v6377_v24  ;;  %v2805_v34 = vpack.c.bf16 %v2779_v36, %v2778_v52  ;;  %v2712_v52 = vmul.f32 %v6371_v8, %v2690_v39 }
 0x33c   : > { %v2713_v33 = vmul.f32 %v6371_v8, %v2691_v15 }
 0x33d   : > { %v2764_v59 = vmul.f32 %v2748_v40, %v2732_v29  ;;  %v2749_v61 = vadd.f32 1.0, %v1986_v18  ;;  %4975 = vmatmul.mubr.bf16.gmra.mrb[104].mxu1 %v2805_v34  ;;  %v2734_v19 = vadd.f32 %v6385_v28, %v2712_v52 }
 0x33f   : > { %v2780_v55 = vadd.f32 %v2764_v59, %v1980_v44  ;;  %v2765_v14 = vmul.f32 %v2749_v61, %v2733_v45  ;;  %v1989_v35 = vpop.f32.mrb[60].mxu1  ;;  %v6515_v16 = vpop.f32.mrb[76].mxu0 }
 0x340   : > { %v1991_v36 = vpop.f32.mrb[61].mxu1  ;;  %v6518_v26 = vpop.f32.mrb[77].mxu0  ;;  %v1990_v39 = vadd.f32 %v1989_v35, %v6393_v49 }
 0x341   : > { %7512 = vst [vmem:[#allocation19_spill] sm:$0xff] %v6518_v26  ;;  %v2781_v62 = vadd.f32 %v2765_v14, %v1984_v1  ;;  %v1992_v54 = vadd.f32 %v1991_v36, %v6377_v24  ;;  %v1993_v6 = vpop.f32.mrb[62].mxu1  ;;  %v6521_v29 = vpop.f32.mrb[78].mxu0  ;;  %v2735_v14 = vadd.f32 %v6385_v28, %v2713_v33 }
 0x342   : > { %v1995_v60 = vpop.f32.mrb[63].mxu1  ;;  %v6524_v37 = vpop.f32.mrb[79].mxu0  ;;  %v1994_v61 = vadd.f32 %v1993_v6, %v6393_v49 }
 0x343   : > { %7513 = vst [vmem:[#allocation20_spill] sm:$0xff] %v6524_v37  ;;  %v2750_v40 = vadd.f32 1.0, %v1992_v54  ;;  %v1996_v18 = vadd.f32 %v1995_v60, %v6377_v24  ;;  %v2806_v34 = vpack.c.bf16 %v2781_v62, %v2780_v55 }
 0x345   : > { %v2766_v45 = vmul.f32 %v2750_v40, %v2734_v19  ;;  %v2751_v44 = vadd.f32 1.0, %v1996_v18  ;;  %4978 = vmatprep.mubr.bf16.mxu1 %v2806_v34 }
 0x347   : > { %v2782_v59 = vadd.f32 %v2766_v45, %v1990_v39  ;;  %v2767_v8 = vmul.f32 %v2751_v44, %v2735_v14  ;;  %v6531_v15 = vpop.f32.mrb[64].mxu1  ;;  %v6533_v1 = vpop.f32.mrb[80].mxu0 }
 0x348   : > { %7514 = vst [vmem:[#allocation21_spill] sm:$0xff] %v6533_v1  ;;  %v6535_v52 = vpop.f32.mrb[65].mxu1  ;;  %v6537_v36 = vpop.f32.mrb[81].mxu0 }
 0x349   : > { %7515 = vst [vmem:[#allocation22_spill] sm:$0xff] %v6535_v52  ;;  %7516 = vst [vmem:[#allocation23_spill] sm:$0xff] %v6537_v36  ;;  %v2783_v24 = vadd.f32 %v2767_v8, %v1994_v61  ;;  %v6539_v55 = vpop.f32.mrb[66].mxu1  ;;  %v6541_v35 = vpop.f32.mrb[82].mxu0 }
 0x34a   : > { %7517 = vst [vmem:[#allocation24_spill] sm:$0xff] %v6541_v35  ;;  %v6543_v28 = vpop.f32.mrb[67].mxu1  ;;  %v6545_v62 = vpop.f32.mrb[83].mxu0 }
 0x34b   : > { %7518 = vst [vmem:[#allocation25_spill] sm:$0xff] %v6543_v28  ;;  %7519 = vst [vmem:[#allocation26_spill] sm:$0xff] %v6545_v62  ;;  %v2807_v54 = vpack.c.bf16 %v2783_v24, %v2782_v59 }
 0x34d   : > { %4979 = vmatmul.mubr.bf16.gmra.mrb[108].mxu1 %v2807_v54 }
 0x34f   : > { %v6547_v49 = vpop.f32.mrb[68].mxu1  ;;  %v6549_v6 = vpop.f32.mrb[84].mxu0 }
 0x350   : > { %7520 = vst [vmem:[#allocation27_spill] sm:$0xff] %v6549_v6  ;;  %v6551_v33 = vpop.f32.mrb[69].mxu1  ;;  %v6553_v60 = vpop.f32.mrb[85].mxu0 }
 0x351   : > { %7521 = vst [vmem:[#allocation28_spill] sm:$0xff] %v6551_v33  ;;  %7522 = vst [vmem:[#allocation29_spill] sm:$0xff] %v6553_v60  ;;  %v6555_v19 = vpop.f32.mrb[70].mxu1  ;;  %v6557_v40 = vpop.f32.mrb[86].mxu0 }
 0x352   : > { %7523 = vst [vmem:[#allocation30_spill] sm:$0xff] %v6557_v40  ;;  %v6559_v18 = vpop.f32.mrb[71].mxu1  ;;  %v6561_v34 = vpop.f32.mrb[87].mxu0 }
 0x353   : > { %7524 = vst [vmem:[#allocation31_spill] sm:$0xff] %v6559_v18  ;;  %7525 = vst [vmem:[#allocation32_spill] sm:$0xff] %v6561_v34 }
 0x357   : > { %v6563_v39 = vpop.f32.mrb[72].mxu1  ;;  %v6565_v45 = vpop.f32.mrb[88].mxu0 }
 0x358   : > { %7526 = vst [vmem:[#allocation33_spill] sm:$0xff] %v6565_v45  ;;  %v6567_v14 = vpop.f32.mrb[73].mxu1  ;;  %v6569_v44 = vpop.f32.mrb[89].mxu0 }
 0x359   : > { %7527 = vst [vmem:[#allocation34_spill] sm:$0xff] %v6567_v14  ;;  %7528 = vst [vmem:[#allocation35_spill] sm:$0xff] %v6569_v44  ;;  %v6571_v59 = vpop.f32.mrb[74].mxu1  ;;  %v6573_v61 = vpop.f32.mrb[90].mxu0 }
 0x35a   : > { %7529 = vst [vmem:[#allocation36_spill] sm:$0xff] %v6573_v61  ;;  %v6575_v8 = vpop.f32.mrb[75].mxu1  ;;  %v6577_v24 = vpop.f32.mrb[91].mxu0 }
 0x35b   : > { %7530 = vst [vmem:[#allocation37_spill] sm:$0xff] %v6575_v8  ;;  %7531 = vst [vmem:[#allocation38_spill] sm:$0xff] %v6577_v24 }
 0x35f   : > { %v6579_v54 = vpop.f32.mrb[76].mxu1  ;;  %v6581_v40 = vpop.f32.mrb[92].mxu0 }
 0x360   : > { %7532 = vst [vmem:[#allocation39_spill] sm:$0xff] %v6579_v54  ;;  %7533 = vst [vmem:[#allocation40_spill] sm:$0xff] %v6581_v40  ;;  %v6583_v6 = vpop.f32.mrb[77].mxu1  ;;  %v6585_v35 = vpop.f32.mrb[93].mxu0 }
 0x361   : > { %7534 = vst [vmem:[#allocation41_spill] sm:$0xff] %v6583_v6  ;;  %7535 = vst [vmem:[#allocation42_spill] sm:$0xff] %v6585_v35  ;;  %v6587_v45 = vpop.f32.mrb[78].mxu1  ;;  %v6589_v34 = vpop.f32.mrb[94].mxu0 }
 0x362   : > { %7536 = vst [vmem:[#allocation43_spill] sm:$0xff] %v6587_v45  ;;  %7537 = vst [vmem:[#allocation44_spill] sm:$0xff] %v6589_v34  ;;  %v6591_v44 = vpop.f32.mrb[79].mxu1  ;;  %v6593_v1 = vpop.f32.mrb[95].mxu0 }
 0x363   : > { %7538 = vst [vmem:[#allocation45_spill] sm:$0xff] %v6591_v44  ;;  %7539 = vst [vmem:[#allocation46_spill] sm:$0xff] %v6593_v1 }
 0x367   : > { %v6595_v61 = vpop.f32.mrb[80].mxu1  ;;  %v6597_v60 = vpop.f32.mrb[96].mxu0 }
 0x368   : > { %7540 = vst [vmem:[#allocation47_spill] sm:$0xff] %v6595_v61  ;;  %7541 = vst [vmem:[#allocation48_spill] sm:$0xff] %v6597_v60  ;;  %v6599_v24 = vpop.f32.mrb[81].mxu1  ;;  %v6601_v62 = vpop.f32.mrb[97].mxu0 }
 0x369   : > { %7542 = vst [vmem:[#allocation49_spill] sm:$0xff] %v6599_v24  ;;  %7543 = vst [vmem:[#allocation50_spill] sm:$0xff] %v6601_v62  ;;  %v6603_v40 = vpop.f32.mrb[82].mxu1  ;;  %v6605_v36 = vpop.f32.mrb[98].mxu0 }
 0x36a   : > { %7544 = vst [vmem:[#allocation51_spill] sm:$0xff] %v6603_v40  ;;  %7545 = vst [vmem:[#allocation52_spill] sm:$0xff] %v6605_v36  ;;  %v6607_v35 = vpop.f32.mrb[83].mxu1  ;;  %v6609_v8 = vpop.f32.mrb[99].mxu0  ;;  %v5175_v36 = vld [vmem:[%s7466_s14] sm:$0xff]  }
 0x36b   : > { %7546 = vst [vmem:[#allocation53_spill] sm:$0xff] %v6607_v35  ;;  %7547 = vst [vmem:[#allocation54_spill] sm:$0xff] %v6609_v8  ;;  %4982 = vmatprep.subr.bf16.mxu0 %v5175_v36 }
 0x36c   : > { %4983 = vmatpush3.bf16.msra.mxu0 %v5175_v36  ;;  %v5176_v36 = vld [vmem:[%s7466_s14 + $0x8] sm:$0xff]  }
 0x36d   : > { %4984 = vmatprep.subr.bf16.mxu0 %v5176_v36 }
 0x36f   : > { %v6611_v34 = vpop.f32.mrb[84].mxu1  ;;  %v6613_v44 = vpop.f32.mrb[100].mxu0 }
 0x370   : > { %7548 = vst [vmem:[#allocation55_spill] sm:$0xff] %v6611_v34  ;;  %7549 = vst [vmem:[#allocation56_spill] sm:$0xff] %v6613_v44  ;;  %v6615_v1 = vpop.f32.mrb[85].mxu1  ;;  %v6617_v14 = vpop.f32.mrb[101].mxu0  ;;  %4985 = vmatpush3.bf16.msra.mxu0 %v5176_v36  ;;  %v5178_v36 = vld [vmem:[%s7466_s14 + $0x18] sm:$0xff]  }
 0x371   : > { %7550 = vst [vmem:[#allocation57_spill] sm:$0xff] %v6615_v1  ;;  %7551 = vst [vmem:[#allocation58_spill] sm:$0xff] %v6617_v14  ;;  %v6619_v60 = vpop.f32.mrb[86].mxu1  ;;  %v6621_v24 = vpop.f32.mrb[102].mxu0 }
 0x372   : > { %7552 = vst [vmem:[#allocation59_spill] sm:$0xff] %v6619_v60  ;;  %7553 = vst [vmem:[#allocation60_spill] sm:$0xff] %v6621_v24  ;;  %v6626_v62 = vpop.f32.mrb[87].mxu1  ;;  %v6628_v35 = vpop.f32.mrb[103].mxu0 }
 0x373   : > { %7554 = vst [vmem:[#allocation61_spill] sm:$0xff] %v6626_v62  ;;  %7555 = vst [vmem:[#allocation62_spill] sm:$0xff] %v6628_v35 }
 0x377   : > { %v6630_v8 = vpop.f32.mrb[88].mxu1  ;;  %v6632_v44 = vpop.f32.mrb[104].mxu0 }
 0x378   : > { %7556 = vst [vmem:[#allocation63_spill] sm:$0xff] %v6630_v8  ;;  %7557 = vst [vmem:[#allocation64_spill] sm:$0xff] %v6632_v44  ;;  %v6634_v1 = vpop.f32.mrb[89].mxu1  ;;  %v6636_v14 = vpop.f32.mrb[105].mxu0 }
 0x379   : > { %7558 = vst [vmem:[#allocation65_spill] sm:$0xff] %v6634_v1  ;;  %7559 = vst [vmem:[#allocation66_spill] sm:$0xff] %v6636_v14  ;;  %v6638_v6 = vpop.f32.mrb[90].mxu1  ;;  %v6640_v24 = vpop.f32.mrb[106].mxu0 }
 0x37a   : > { %7560 = vst [vmem:[#allocation67_spill] sm:$0xff] %v6638_v6  ;;  %7561 = vst [vmem:[#allocation68_spill] sm:$0xff] %v6640_v24  ;;  %v6642_v28 = vpop.f32.mrb[91].mxu1  ;;  %v6644_v18 = vpop.f32.mrb[107].mxu0  ;;  %v5177_v24 = vld [vmem:[%s7466_s14 + $0x10] sm:$0xff]  }
 0x37b   : > { %7562 = vst [vmem:[#allocation69_spill] sm:$0xff] %v6642_v28  ;;  %7563 = vst [vmem:[#allocation70_spill] sm:$0xff] %v6644_v18  ;;  %4986 = vmatprep.subr.bf16.mxu0 %v5177_v24 }
 0x37c   : > { %4987 = vmatpush3.bf16.msra.mxu0 %v5177_v24  ;;  %v5181_v24 = vld [vmem:[%s7466_s14 + $0x30] sm:$0xff]  }
 0x37d   : > { %4988 = vmatprep.subr.bf16.mxu0 %v5178_v36 }
 0x37f   : > { %v6649_v35 = vpop.f32.mrb[92].mxu1  ;;  %v6651_v44 = vpop.f32.mrb[108].mxu0 }
 0x380   : > { %7564 = vst [vmem:[#allocation71_spill] sm:$0xff] %v6649_v35  ;;  %7565 = vst [vmem:[#allocation72_spill] sm:$0xff] %v6651_v44  ;;  %v6653_v1 = vpop.f32.mrb[93].mxu1  ;;  %v6655_v14 = vpop.f32.mrb[109].mxu0  ;;  %4989 = vmatpush3.bf16.msra.mxu0 %v5178_v36  ;;  %v5179_v44 = vld [vmem:[%s7466_s14 + $0x20] sm:$0xff]   ;;  %v5182_v36 = vld [vmem:[%s7466_s14 + $0x38] sm:$0xff]  }
 0x381   : > { %7566 = vst [vmem:[#allocation73_spill] sm:$0xff] %v6653_v1  ;;  %7567 = vst [vmem:[#allocation74_spill] sm:$0xff] %v6655_v14  ;;  %v6660_v28 = vpop.f32.mrb[94].mxu1  ;;  %v6662_v18 = vpop.f32.mrb[110].mxu0  ;;  %4990 = vmatprep.subr.bf16.mxu0 %v5179_v44 }
 0x382   : > { %7568 = vst [vmem:[#allocation75_spill] sm:$0xff] %v6660_v28  ;;  %7569 = vst [vmem:[#allocation76_spill] sm:$0xff] %v6662_v18  ;;  %v6664_v62 = vpop.f32.mrb[95].mxu1  ;;  %v6666_v52 = vpop.f32.mrb[111].mxu0  ;;  %v5180_v18 = vld [vmem:[%s7466_s14 + $0x28] sm:$0xff]  }
 0x383   : > { %7570 = vst [vmem:[#allocation77_spill] sm:$0xff] %v6664_v62  ;;  %7571 = vst [vmem:[#allocation78_spill] sm:$0xff] %v6666_v52 }
 0x384   : > { %4991 = vmatpush3.bf16.msra.mxu0 %v5179_v44  ;;  %v6686_v44 = vld [vmem:[%s7465_s13] ss:$0 sm:$0xff] }
 0x385   : > { %4992 = vmatprep.subr.bf16.mxu0 %v5180_v18 }
 0x388   : > { %4993 = vmatpush3.bf16.msra.mxu0 %v5180_v18 }
 0x389   : > { %4994 = vmatprep.subr.bf16.mxu0 %v5181_v24 }
 0x38c   : > { %4995 = vmatpush3.bf16.msra.mxu0 %v5181_v24 }
 0x38d   : > { %4996 = vmatprep.subr.bf16.mxu0 %v5182_v36 }
 0x390   : > { %4997 = vmatpush3.bf16.msra.mxu0 %v5182_v36 }
 0x3ef   : > { %v4968_v52 = vpop.f32.mrb[96].mxu1 }
 0x3f0   : > { %v2897_v14 = vpop.f32.mrb[97].mxu1  ;;  %v2906_v62 = vadd.f32 %v4968_v52, %v6686_v44 }
 0x3f1   : > { %v4969_v18 = vpop.f32.mrb[98].mxu1  ;;  %v2898_v24 = vadd.f32 %v6686_v44, %v2897_v14 }
 0x3f2   : > { %v2909_v1 = vadd.f32 %v4969_v18, %v6686_v44  ;;  %v2900_v33 = vpop.f32.mrb[99].mxu1 }
 0x3f3   : > { %v2901_v37 = vadd.f32 %v6686_v44, %v2900_v33 }
 0x3f4   : > { %v2961_v26 = vpack.c.bf16 %v2909_v1, %v2906_v62 }
 0x3f5   : > { %v2960_v28 = vpack.c.bf16 %v2901_v37, %v2898_v24 }
 0x3f6   : > { %v4666_v36 = vmul.bf16 3216621497, %v2961_v26 }
 0x3f7   : > { %v4665_v35 = vmul.bf16 3216621497, %v2960_v28 }
 0x3f8   : > { %5303 = vpow.bf16 %v4666_v36 }
 0x3f9   : > { %5305 = vpow.bf16 %v4665_v35 }
 0x400   : > { %v4972_v6 = vpop.f32.mrb[100].mxu1 }
 0x401   : > { %v2913_v8 = vpop.f32.mrb[101].mxu1  ;;  %v2922_v20 = vadd.f32 %v4972_v6, %v6686_v44 }
 0x402   : > { %v4973_v43 = vpop.f32.mrb[102].mxu1  ;;  %v2914_v34 = vadd.f32 %v6686_v44, %v2913_v8 }
 0x403   : > { %v2925_v52 = vadd.f32 %v4973_v43, %v6686_v44  ;;  %v2916_v60 = vpop.f32.mrb[103].mxu1  ;;  %v5304_v18 = vpop.eup %5303 }
 0x404   : > { %v2917_v14 = vadd.f32 %v6686_v44, %v2916_v60  ;;  %v5306_v33 = vpop.eup %5305  ;;  %v3001_v1 = vadd.bf16 1065369472, %v5304_v18 }
 0x405   : > { %v2963_v37 = vpack.c.bf16 %v2925_v52, %v2922_v20  ;;  %v3000_v62 = vadd.bf16 1065369472, %v5306_v33 }
 0x406   : > { %v2962_v24 = vpack.c.bf16 %v2917_v14, %v2914_v34  ;;  %5307 = vrcp.bf16 %v3001_v1 }
 0x407   : > { %v4668_v35 = vmul.bf16 3216621497, %v2963_v37  ;;  %5309 = vrcp.bf16 %v3000_v62 }
 0x408   : > { %v4667_v36 = vmul.bf16 3216621497, %v2962_v24 }
 0x409   : > { %5311 = vpow.bf16 %v4668_v35 }
 0x40a   : > { %5313 = vpow.bf16 %v4667_v36 }
 0x410   : > { %v4976_v6 = vpop.f32.mrb[104].mxu1 }
 0x411   : > { %v2929_v40 = vpop.f32.mrb[105].mxu1  ;;  %v5308_v43 = vpop.eup %5307  ;;  %v2938_v8 = vadd.f32 %v4976_v6, %v6686_v44 }
 0x412   : > { %v4977_v61 = vpop.f32.mrb[106].mxu1  ;;  %v5310_v46 = vpop.eup %5309  ;;  %v3011_v4 = vmul.bf16 1065369472, %v5308_v43  ;;  %v2930_v34 = vadd.f32 %v6686_v44, %v2929_v40 }
 0x413   : > { %v2941_v60 = vadd.f32 %v4977_v61, %v6686_v44  ;;  %v2932_v18 = vpop.f32.mrb[107].mxu1  ;;  %v3009_v14 = vmul.bf16 1065369472, %v5310_v46 }
 0x414   : > { %v5312_v20 = vpop.eup %5311  ;;  %v2933_v52 = vadd.f32 %v6686_v44, %v2932_v18  ;;  %v3025_v54 = vmul.bf16 %v3011_v4, %v2961_v26 }
 0x415   : > { %v5314_v33 = vpop.eup %5313  ;;  %v3003_v1 = vadd.bf16 1065369472, %v5312_v20  ;;  %v2965_v62 = vpack.c.bf16 %v2941_v60, %v2938_v8  ;;  %v3024_v45 = vmul.bf16 %v3009_v14, %v2960_v28 }
 0x416   : > { %v3002_v35 = vadd.bf16 1065369472, %v5314_v33  ;;  %v2964_v36 = vpack.c.bf16 %v2933_v52, %v2930_v34 }
 0x417   : > { %5315 = vrcp.bf16 %v3003_v1  ;;  %v4670_v43 = vmul.bf16 3216621497, %v2965_v62  ;;  %4998 = vmatprep.mubr.bf16.mxu0 %v3024_v45 }
 0x418   : > { %5317 = vrcp.bf16 %v3002_v35  ;;  %v4669_v6 = vmul.bf16 3216621497, %v2964_v36  ;;  %4999 = vmatmul.mubr.bf16.vlgmr.msra.gmra.mrb[112].mxu0 %v3025_v54 }
 0x419   : > { %5319 = vpow.bf16 %v4670_v43 }
 0x41a   : > { %5321 = vpow.bf16 %v4669_v6 }
 0x420   : > { %v4980_v61 = vpop.f32.mrb[108].mxu1 }
 0x421   : > { %v2945_v40 = vpop.f32.mrb[109].mxu1  ;;  %v2954_v20 = vadd.f32 %v4980_v61, %v6686_v44 }
 0x422   : > { %v5316_v57 = vpop.eup %5315  ;;  %v4981_v18 = vpop.f32.mrb[110].mxu1  ;;  %v2946_v26 = vadd.f32 %v6686_v44, %v2945_v40 }
 0x423   : > { %v5318_v46 = vpop.eup %5317  ;;  %v2957_v8 = vadd.f32 %v4981_v18, %v6686_v44  ;;  %v2948_v60 = vpop.f32.mrb[111].mxu1  ;;  %v3015_v28 = vmul.bf16 1065369472, %v5316_v57 }
 0x424   : > { %v5320_v4 = vpop.eup %5319  ;;  %v2949_v34 = vadd.f32 %v6686_v44, %v2948_v60  ;;  %v3013_v45 = vmul.bf16 1065369472, %v5318_v46 }
 0x425   : > { %v5322_v52 = vpop.eup %5321  ;;  %v3005_v54 = vadd.bf16 1065369472, %v5320_v4  ;;  %v2967_v14 = vpack.c.bf16 %v2957_v8, %v2954_v20  ;;  %v3027_v6 = vmul.bf16 %v3015_v28, %v2963_v37 }
 0x426   : > { %v3004_v33 = vadd.bf16 1065369472, %v5322_v52  ;;  %v2966_v1 = vpack.c.bf16 %v2949_v34, %v2946_v26  ;;  %v3026_v35 = vmul.bf16 %v3013_v45, %v2962_v24 }
 0x427   : > { %5323 = vrcp.bf16 %v3005_v54  ;;  %v4672_v43 = vmul.bf16 3216621497, %v2967_v14  ;;  %v1535_v54 = vsub.s32 2, %v5738_v51 }
 0x428   : > { %5325 = vrcp.bf16 %v3004_v33  ;;  %v4671_v61 = vmul.bf16 3216621497, %v2966_v1  ;;  %5002 = vmatprep.mubr.bf16.mxu0 %v3026_v35 }
 0x429   : > { %5327 = vpow.bf16 %v4672_v43  ;;  %5003 = vmatmul.mubr.bf16.gmra.mrb[116].mxu0 %v3027_v6  ;;  %v6706_v33 = vrot.slane %v6365_v30, %v1535_v54 }
 0x42a   : > { %5329 = vpow.bf16 %v4671_v61 }
 0x42b   : > { %v2043_v35 = vadd.f32 %v6408_v58, %v6706_v33  ;;  %v2047_v30 = vadd.f32 %v6414_v22, %v6706_v33 }
 0x432   : > { %v5324_v57 = vpop.eup %5323 }
 0x433   : > { %v5326_v40 = vpop.eup %5325  ;;  %v3019_v18 = vmul.bf16 1065369472, %v5324_v57 }
 0x434   : > { %v5328_v44 = vpop.eup %5327  ;;  %v3017_v46 = vmul.bf16 1065369472, %v5326_v40 }
 0x435   : > { %v5330_v60 = vpop.eup %5329  ;;  %v3007_v4 = vadd.bf16 1065369472, %v5328_v44  ;;  %v3029_v24 = vmul.bf16 %v3019_v18, %v2965_v62  ;;  %v6711_v62 = vld [vmem:[%s7467_s15] ss:$0 sm:$0xff]  ;;  %v2037_v44 = vadd.f32 %v6396_v10, %v6706_v33 }
 0x436   : > { %v3006_v20 = vadd.bf16 1065369472, %v5330_v60  ;;  %v3028_v8 = vmul.bf16 %v3017_v46, %v2964_v36 }
 0x437   : > { %5331 = vrcp.bf16 %v3007_v4 }
 0x438   : > { %5333 = vrcp.bf16 %v3006_v20  ;;  %5006 = vmatprep.mubr.bf16.mxu0 %v3028_v8 }
 0x439   : > { %5007 = vmatmul.mubr.bf16.gmra.mrb[120].mxu0 %v3029_v24 }
 0x442   : > { %v5332_v37 = vpop.eup %5331 }
 0x443   : > { %v5334_v28 = vpop.eup %5333  ;;  %v3023_v26 = vmul.bf16 1065369472, %v5332_v37  ;;  %v2053_v37 = vadd.f32 %v6426_v0, %v6706_v33 }
 0x444   : > { %v3021_v34 = vmul.bf16 1065369472, %v5334_v28 }
 0x445   : > { %v3031_v52 = vmul.bf16 %v3023_v26, %v2967_v14  ;;  %v2033_v14 = vadd.f32 %v6379_v5, %v6706_v33  ;;  %v2067_v26 = vadd.f32 %v6450_v47, %v6706_v33 }
 0x446   : > { %v3030_v45 = vmul.bf16 %v3021_v34, %v2966_v1 }
 0x448   : > { %5010 = vmatprep.mubr.bf16.mxu0 %v3030_v45 }
 0x449   : > { %5011 = vmatmul.mubr.bf16.gmra.mrb[124].mxu0 %v3031_v52  ;;  %v2057_v52 = vadd.f32 %v6432_v12, %v6706_v33 }
 0x4eb   : > { %v5000_v36 = vpop.f32.mrb[112].mxu0 }
 0x4ec   : > { %v3146_v43 = vadd.f32 %v5000_v36, %v6711_v62  ;;  %v3137_v1 = vpop.f32.mrb[113].mxu0 }
 0x4ed   : > { %v3138_v6 = vadd.f32 %v6711_v62, %v3137_v1  ;;  %v5001_v61 = vpop.f32.mrb[114].mxu0 }
 0x4ee   : > { %v3202_v57 = vmul.f32 %v3146_v43, %v2043_v35  ;;  %v3149_v40 = vadd.f32 %v5001_v61, %v6711_v62  ;;  %v3140_v18 = vpop.f32.mrb[115].mxu0 }
 0x4ef   : > { %v3200_v58 = vmul.f32 %v3138_v6, %v2033_v14  ;;  %v3141_v46 = vadd.f32 %v6711_v62, %v3140_v18  ;;  %v2073_v6 = vadd.f32 %v6462_v21, %v6706_v33  ;;  %v2077_v18 = vadd.f32 %v6468_v31, %v6706_v33  ;;  %v7574_v31 = vld [vmem:[#allocation5_spill] sm:$0xff] }
 0x4f0   : > { %v3203_v60 = vmul.f32 %v3149_v40, %v2047_v30  ;;  %v6734_v22 = vadd.f32 %v3202_v57, %v5773_v9  ;;  %v2087_v30 = vadd.f32 %v6485_v2, %v6706_v33  ;;  %v7573_v2 = vld [vmem:[#allocation4_spill] sm:$0xff] }
 0x4f1   : > { %v3201_v4 = vmul.f32 %v3141_v46, %v2037_v44  ;;  %v6726_v5 = vadd.f32 %v3200_v58, %v5752_v56  ;;  %v2063_v56 = vadd.f32 %v6444_v53, %v6706_v33 }
 0x4f2   : > { %v6738_v10 = vadd.f32 %v3203_v60, %v5780_v17  ;;  %v7572_v60 = vld [vmem:[#allocation3_spill] sm:$0xff] }
 0x4f3   : > { %3284 = vadd.xlane.f32.xlu0 %v6726_v5  ;;  %v6730_v20 = vadd.f32 %v3201_v4, %v5758_v63 }
 0x4f5   : > { %3286 = vadd.xlane.f32.xlu1 %v6730_v20 }
 0x4f7   : > { %3288 = vadd.xlane.f32.xlu0 %v6734_v22 }
 0x4f9   : > { %3290 = vadd.xlane.f32.xlu1 %v6738_v10 }
 0x4fc   : > { %v5004_v8 = vpop.f32.mrb[116].mxu0 }
 0x4fd   : > { %v3162_v24 = vadd.f32 %v5004_v8, %v6711_v62  ;;  %v3153_v63 = vpop.f32.mrb[117].mxu0 }
 0x4fe   : > { %v3154_v9 = vadd.f32 %v6711_v62, %v3153_v63  ;;  %v5005_v28 = vpop.f32.mrb[118].mxu0 }
 0x4ff   : > { %v3206_v17 = vmul.f32 %v3162_v24, %v2063_v56  ;;  %v3165_v34 = vadd.f32 %v5005_v28, %v6711_v62  ;;  %v3156_v45 = vpop.f32.mrb[119].mxu0 }
 0x500   : > { %v3204_v53 = vmul.f32 %v3154_v9, %v2053_v37  ;;  %v3157_v54 = vadd.f32 %v6711_v62, %v3156_v45  ;;  %v2093_v9 = vadd.f32 %v6498_v38, %v6706_v33 }
 0x501   : > { %v3207_v36 = vmul.f32 %v3165_v34, %v2067_v26  ;;  %v6762_v47 = vadd.f32 %v3206_v17, %v5807_v42  ;;  %v2107_v17 = vadd.f32 %v6521_v29, %v6706_v33  ;;  %v7577_v29 = vld [vmem:[#allocation8_spill] sm:$0xff] }
 0x502   : > { %v3205_v35 = vmul.f32 %v3157_v54, %v2057_v52  ;;  %v6754_v0 = vadd.f32 %v3204_v53, %v5790_v25  ;;  %v2083_v25 = vadd.f32 %v6479_v41, %v6706_v33  ;;  %v2097_v53 = vadd.f32 %v6504_v23, %v6706_v33  ;;  %v7579_v23 = vld [vmem:[#allocation9_spill] sm:$0xff] }
 0x503   : > { %v6766_v12 = vadd.f32 %v3207_v36, %v5813_v50 }
 0x504   : > { %3292 = vadd.xlane.f32.xlu0 %v6754_v0  ;;  %v6758_v43 = vadd.f32 %v3205_v35, %v5796_v32 }
 0x506   : > { %3294 = vadd.xlane.f32.xlu1 %v6758_v43 }
 0x508   : > { %3296 = vadd.xlane.f32.xlu0 %v6762_v47 }
 0x50a   : > { %3298 = vadd.xlane.f32.xlu1 %v6766_v12 }
 0x50c   : > { %v5008_v1 = vpop.f32.mrb[120].mxu0 }
 0x50d   : > { %v3178_v14 = vadd.f32 %v5008_v1, %v6711_v62  ;;  %v3169_v32 = vpop.f32.mrb[121].mxu0  ;;  %v7575_v1 = vld [vmem:[#allocation6_spill] sm:$0xff] }
 0x50e   : > { %v3170_v42 = vadd.f32 %v6711_v62, %v3169_v32  ;;  %v5009_v61 = vpop.f32.mrb[122].mxu0 }
 0x50f   : > { %v3210_v50 = vmul.f32 %v3178_v14, %v2083_v25  ;;  %v3181_v57 = vadd.f32 %v5009_v61, %v6711_v62  ;;  %v3172_v40 = vpop.f32.mrb[123].mxu0  ;;  %v7576_v25 = vld [vmem:[#allocation7_spill] sm:$0xff] }
 0x510   : > { %v3208_v41 = vmul.f32 %v3170_v42, %v2073_v6  ;;  %v3173_v44 = vadd.f32 %v6711_v62, %v3172_v40 }
 0x511   : > { %v3211_v58 = vmul.f32 %v3181_v57, %v2087_v30  ;;  %v6790_v8 = vadd.f32 %v3210_v50, %v7573_v2 }
 0x512   : > { %v3209_v46 = vmul.f32 %v3173_v44, %v2077_v18  ;;  %v6782_v21 = vadd.f32 %v3208_v41, %v5824_v7  ;;  %v2103_v7 = vadd.f32 %v6515_v16, %v6706_v33 }
 0x513   : > { %v6794_v56 = vadd.f32 %v3211_v58, %v7574_v31 }
 0x514   : > { %3300 = vadd.xlane.f32.xlu0 %v6782_v21  ;;  %v6786_v4 = vadd.f32 %v3209_v46, %v7572_v60 }
 0x516   : > { %3302 = vadd.xlane.f32.xlu1 %v6786_v4 }
 0x518   : > { %3304 = vadd.xlane.f32.xlu0 %v6790_v8 }
 0x51a   : > { %3306 = vadd.xlane.f32.xlu1 %v6794_v56 }
 0x51c   : > { %v5012_v24 = vpop.f32.mrb[124].mxu0 }
 0x51d   : > { %v3194_v63 = vadd.f32 %v5012_v24, %v6711_v62  ;;  %v3185_v37 = vpop.f32.mrb[125].mxu0 }
 0x51e   : > { %v3186_v28 = vadd.f32 %v6711_v62, %v3185_v37  ;;  %v5013_v26 = vpop.f32.mrb[126].mxu0 }
 0x51f   : > { %v3214_v34 = vmul.f32 %v3194_v63, %v2103_v7  ;;  %v3197_v45 = vadd.f32 %v5013_v26, %v6711_v62  ;;  %v3188_v52 = vpop.f32.mrb[127].mxu0 }
 0x520   : > { %v3212_v16 = vmul.f32 %v3186_v28, %v2093_v9  ;;  %v3189_v54 = vadd.f32 %v6711_v62, %v3188_v52 }
 0x521   : > { %v3215_v36 = vmul.f32 %v3197_v45, %v2107_v17  ;;  %v6818_v32 = vadd.f32 %v3214_v34, %v7577_v29  ;;  %v5183_v45 = vld [vmem:[%s7464_s12 + $0x40] sm:$0xff]   ;;  %v5185_v29 = vld [vmem:[%s7464_s12 + $0x50] sm:$0xff]  }
 0x522   : > { %v3213_v35 = vmul.f32 %v3189_v54, %v2097_v53  ;;  %v6810_v38 = vadd.f32 %v3212_v16, %v7575_v1  ;;  %5014 = vmatprep.subr.bf16.mxu1 %v5183_v45  ;;  %v5184_v1 = vld [vmem:[%s7464_s12 + $0x48] sm:$0xff]  }
 0x523   : > { %7578 = vst [vmem:[#allocation3_spill] sm:$0xff] %v6818_v32  ;;  %v6822_v33 = vadd.f32 %v3215_v36, %v7579_v23  ;;  %5015 = vmatpush3.bf16.msra.mxu1 %v5183_v45 }
 0x524   : > { %3308 = vadd.xlane.f32.xlu0 %v6810_v38  ;;  %v6814_v14 = vadd.f32 %v3213_v35, %v7576_v25  ;;  %5016 = vmatprep.subr.bf16.mxu1 %v5184_v1 }
 0x525   : > { %7580 = vst [vmem:[#allocation4_spill] sm:$0xff] %v6822_v33 }
 0x526   : > { %3310 = vadd.xlane.f32.xlu1 %v6814_v14 }
 0x527   : > { %5017 = vmatpush3.bf16.msra.mxu1 %v5184_v1 }
 0x528   : > { %3312 = vadd.xlane.f32.xlu0 %v6818_v32  ;;  %5018 = vmatprep.subr.bf16.mxu1 %v5185_v29 }
 0x52a   : > { %3314 = vadd.xlane.f32.xlu1 %v6822_v33 }
 0x52b   : > { %5019 = vmatpush3.bf16.msra.mxu1 %v5185_v29 }
 0x580   : > { %v3285_v62 = vpop.xlane.xlu0 %3284 }
 0x581   : > { %v3316_v6 = vmul.f32 0.0078125, %v3285_v62 }
 0x582   : > { %v3287_v42 = vpop.xlane.xlu1 %3286 }
 0x583   : > { %v6826_v61 = vsub.f32 %v6726_v5, %v3316_v6  ;;  %v3317_v30 = vmul.f32 0.0078125, %v3287_v42  ;;  %v5186_v6 = vld [vmem:[%s7464_s12 + $0x58] sm:$0xff]  }
 0x584   : > { %v3289_v50 = vpop.xlane.xlu0 %3288  ;;  %5020 = vmatprep.subr.bf16.mxu1 %v5186_v6 }
 0x585   : > { %v6829_v57 = vsub.f32 %v6730_v20, %v3317_v30  ;;  %v3318_v40 = vmul.f32 0.0078125, %v3289_v50  ;;  %v3348_v18 = vmul.f32 %v6826_v61, %v6826_v61  ;;  %5021 = vmatpush3.bf16.msra.mxu1 %v5186_v6 }
 0x586   : > { %v3291_v41 = vpop.xlane.xlu1 %3290 }
 0x587   : > { %v6834_v44 = vsub.f32 %v6734_v22, %v3318_v40  ;;  %v3319_v58 = vmul.f32 0.0078125, %v3291_v41  ;;  %3364 = vadd.xlane.f32.xlu0 %v3348_v18  ;;  %v3349_v46 = vmul.f32 %v6829_v57, %v6829_v57 }
 0x589   : > { %v6839_v60 = vsub.f32 %v6738_v10, %v3319_v58  ;;  %3366 = vadd.xlane.f32.xlu1 %v3349_v46  ;;  %v3350_v2 = vmul.f32 %v6834_v44, %v6834_v44  ;;  %v5187_v46 = vld [vmem:[%s7464_s12 + $0x60] sm:$0xff]  }
 0x58a   : > { %5022 = vmatprep.subr.bf16.mxu1 %v5187_v46 }
 0x58b   : > { %3368 = vadd.xlane.f32.xlu0 %v3350_v2  ;;  %v3351_v31 = vmul.f32 %v6839_v60, %v6839_v60  ;;  %5023 = vmatpush3.bf16.msra.mxu1 %v5187_v46 }
 0x58d   : > { %3370 = vadd.xlane.f32.xlu1 %v3351_v31 }
 0x591   : > { %v3293_v24 = vpop.xlane.xlu0 %3292 }
 0x592   : > { %v3320_v7 = vmul.f32 0.0078125, %v3293_v24 }
 0x593   : > { %v3295_v63 = vpop.xlane.xlu1 %3294 }
 0x594   : > { %v6846_v37 = vsub.f32 %v6754_v0, %v3320_v7  ;;  %v3321_v9 = vmul.f32 0.0078125, %v3295_v63 }
 0x595   : > { %v3297_v28 = vpop.xlane.xlu0 %3296 }
 0x596   : > { %v6849_v26 = vsub.f32 %v6758_v43, %v3321_v9  ;;  %v3322_v17 = vmul.f32 0.0078125, %v3297_v28  ;;  %v3352_v34 = vmul.f32 %v6846_v37, %v6846_v37  ;;  %v5188_v28 = vld [vmem:[%s7464_s12 + $0x68] sm:$0xff]  }
 0x597   : > { %v3299_v52 = vpop.xlane.xlu1 %3298  ;;  %5024 = vmatprep.subr.bf16.mxu1 %v5188_v28 }
 0x598   : > { %v6857_v53 = vsub.f32 %v6762_v47, %v3322_v17  ;;  %v3323_v16 = vmul.f32 0.0078125, %v3299_v52  ;;  %3372 = vadd.xlane.f32.xlu0 %v3352_v34  ;;  %v3353_v54 = vmul.f32 %v6849_v26, %v6849_v26  ;;  %5025 = vmatpush3.bf16.msra.mxu1 %v5188_v28  ;;  %v5189_v34 = vld [vmem:[%s7464_s12 + $0x70] sm:$0xff]  }
 0x599   : > { %5026 = vmatprep.subr.bf16.mxu1 %v5189_v34 }
 0x59a   : > { %v6862_v36 = vsub.f32 %v6766_v12, %v3323_v16  ;;  %3374 = vadd.xlane.f32.xlu1 %v3353_v54  ;;  %v3354_v35 = vmul.f32 %v6857_v53, %v6857_v53  ;;  %v5190_v16 = vld [vmem:[%s7464_s12 + $0x78] sm:$0xff]  }
 0x59c   : > { %3376 = vadd.xlane.f32.xlu0 %v3354_v35  ;;  %v3355_v25 = vmul.f32 %v6862_v36, %v6862_v36  ;;  %5027 = vmatpush3.bf16.msra.mxu1 %v5189_v34 }
 0x59d   : > { %5028 = vmatprep.subr.bf16.mxu1 %v5190_v16 }
 0x59e   : > { %3378 = vadd.xlane.f32.xlu1 %v3355_v25 }
 0x5a0   : > { %5029 = vmatpush3.bf16.msra.mxu1 %v5190_v16  ;;  %v1543_v16 = vsub.s32 4, %v5738_v51 }
 0x5a1   : > { %v3301_v23 = vpop.xlane.xlu0 %3300 }
 0x5a2   : > { %v3324_v62 = vmul.f32 0.0078125, %v3301_v23 }
 0x5a3   : > { %v3303_v42 = vpop.xlane.xlu1 %3302 }
 0x5a4   : > { %v6878_v30 = vsub.f32 %v6782_v21, %v3324_v62  ;;  %v3325_v50 = vmul.f32 0.0078125, %v3303_v42 }
 0x5a5   : > { %v3305_v40 = vpop.xlane.xlu0 %3304 }
 0x5a6   : > { %v6881_v18 = vsub.f32 %v6786_v4, %v3325_v50  ;;  %v3326_v41 = vmul.f32 0.0078125, %v3305_v40  ;;  %v3356_v58 = vmul.f32 %v6878_v30, %v6878_v30 }
 0x5a7   : > { %v3307_v2 = vpop.xlane.xlu1 %3306 }
 0x5a8   : > { %v6889_v31 = vsub.f32 %v6790_v8, %v3326_v41  ;;  %v3327_v24 = vmul.f32 0.0078125, %v3307_v2  ;;  %3380 = vadd.xlane.f32.xlu0 %v3356_v58  ;;  %v3357_v7 = vmul.f32 %v6881_v18, %v6881_v18 }
 0x5aa   : > { %v6894_v63 = vsub.f32 %v6794_v56, %v3327_v24  ;;  %3382 = vadd.xlane.f32.xlu1 %v3357_v7  ;;  %v3358_v9 = vmul.f32 %v6889_v31, %v6889_v31 }
 0x5ac   : > { %3384 = vadd.xlane.f32.xlu0 %v3358_v9  ;;  %v3359_v17 = vmul.f32 %v6894_v63, %v6894_v63 }
 0x5ae   : > { %3386 = vadd.xlane.f32.xlu1 %v3359_v17 }
 0x5b1   : > { %v3309_v45 = vpop.xlane.xlu0 %3308 }
 0x5b2   : > { %v3328_v52 = vmul.f32 0.0078125, %v3309_v45 }
 0x5b3   : > { %v3311_v54 = vpop.xlane.xlu1 %3310 }
 0x5b4   : > { %v6910_v35 = vsub.f32 %v6810_v38, %v3328_v52  ;;  %v3329_v1 = vmul.f32 0.0078125, %v3311_v54 }
 0x5b5   : > { %v3313_v25 = vpop.xlane.xlu0 %3312 }
 0x5b6   : > { %v6913_v29 = vsub.f32 %v6814_v14, %v3329_v1  ;;  %v3330_v23 = vmul.f32 0.0078125, %v3313_v25  ;;  %v3360_v62 = vmul.f32 %v6910_v35, %v6910_v35 }
 0x5b7   : > { %v3315_v6 = vpop.xlane.xlu1 %3314 }
 0x5b8   : > { %v6918_v42 = vsub.f32 %v6818_v32, %v3330_v23  ;;  %v3331_v50 = vmul.f32 0.0078125, %v3315_v6  ;;  %3388 = vadd.xlane.f32.xlu0 %v3360_v62  ;;  %v3361_v40 = vmul.f32 %v6913_v29, %v6913_v29  ;;  %v1539_v23 = vsub.s32 3, %v5738_v51  ;;  %v6934_v62 = vld [vmem:[%s7461_s9] sm:$0xff] }
 0x5b9   : > { %v6937_v6 = vrot.slane %v6934_v62, %v1543_v16 }
 0x5ba   : > { %v6923_v41 = vsub.f32 %v6822_v33, %v3331_v50  ;;  %3390 = vadd.xlane.f32.xlu1 %v3361_v40  ;;  %v3362_v58 = vmul.f32 %v6918_v42, %v6918_v42  ;;  %v6940_v50 = vrot.slane %v6934_v62, %v1539_v23 }
 0x5bc   : > { %3392 = vadd.xlane.f32.xlu0 %v3362_v58  ;;  %v3363_v46 = vmul.f32 %v6923_v41, %v6923_v41  ;;  %v2146_v58 = vadd.f32 %v6531_v15, %v6937_v6  ;;  %v2035_v15 = vadd.f32 %v6387_v27, %v6940_v50 }
 0x5be   : > { %3394 = vadd.xlane.f32.xlu1 %v3363_v46  ;;  %v6947_v46 = vld [vmem:[%s7462_s10 + $0x1] ss:$0 sm:$0xff]  ;;  %v3504_v16 = vadd.f32 1.0, %v2146_v58 }
 0x614   : > { %v3365_v2 = vpop.xlane.xlu0 %3364 }
 0x615   : > { %v3396_v24 = vmul.f32 0.0078125, %v3365_v2  ;;  %v2150_v2 = vadd.f32 %v6539_v55, %v6937_v6 }
 0x616   : > { %v3367_v7 = vpop.xlane.xlu1 %3366 }
 0x617   : > { %v3412_v9 = vadd.f32 1e-06, %v3396_v24  ;;  %v3397_v28 = vmul.f32 0.0078125, %v3367_v7  ;;  %v3505_v23 = vadd.f32 1.0, %v2150_v2 }
 0x618   : > { %v3369_v17 = vpop.xlane.xlu0 %3368 }
 0x619   : > { %5335 = vrsqrt.f32 %v3412_v9  ;;  %v3413_v34 = vadd.f32 1e-06, %v3397_v28  ;;  %v3398_v45 = vmul.f32 0.0078125, %v3369_v17  ;;  %v6955_v28 = vld [vmem:[%s7463_s11 + $0x1] ss:$0 sm:$0xff] }
 0x61a   : > { %v3371_v52 = vpop.xlane.xlu1 %3370 }
 0x61b   : > { %5337 = vrsqrt.f32 %v3413_v34  ;;  %v3414_v54 = vadd.f32 1e-06, %v3398_v45  ;;  %v3399_v1 = vmul.f32 0.0078125, %v3371_v52  ;;  %v2039_v34 = vadd.f32 %v6398_v48, %v6940_v50 }
 0x61d   : > { %5339 = vrsqrt.f32 %v3414_v54  ;;  %v3415_v25 = vadd.f32 1e-06, %v3399_v1  ;;  %v2156_v54 = vadd.f32 %v6547_v49, %v6937_v6 }
 0x61f   : > { %5341 = vrsqrt.f32 %v3415_v25 }
 0x623   : > { %v5336_v40 = vpop.eup %5335 }
 0x624   : > { %v3444_v24 = vmul.f32 %v5336_v40, %v6826_v61 }
 0x625   : > { %v3373_v7 = vpop.xlane.xlu0 %3372  ;;  %v5338_v9 = vpop.eup %5337 }
 0x626   : > { %v3400_v17 = vmul.f32 0.0078125, %v3373_v7  ;;  %v3445_v45 = vmul.f32 %v5338_v9, %v6829_v57  ;;  %v3466_v55 = vmul.f32 %v6947_v46, %v3444_v24  ;;  %v2160_v57 = vadd.f32 %v6555_v19, %v6937_v6 }
 0x627   : > { %v3375_v52 = vpop.xlane.xlu1 %3374  ;;  %v5340_v61 = vpop.eup %5339 }
 0x628   : > { %v3416_v1 = vadd.f32 1e-06, %v3400_v17  ;;  %v3401_v25 = vmul.f32 0.0078125, %v3375_v52  ;;  %v3446_v40 = vmul.f32 %v5340_v61, %v6834_v44  ;;  %v3467_v27 = vmul.f32 %v6947_v46, %v3445_v45 }
 0x629   : > { %v3377_v7 = vpop.xlane.xlu0 %3376  ;;  %v3488_v48 = vadd.f32 %v6955_v28, %v3466_v55  ;;  %v5342_v33 = vpop.eup %5341  ;;  %v3506_v52 = vadd.f32 1.0, %v2156_v54  ;;  %v2049_v54 = vadd.f32 %v6417_v13, %v6940_v50  ;;  %v2055_v13 = vadd.f32 %v6428_v11, %v6940_v50 }
 0x62a   : > { %5343 = vrsqrt.f32 %v3416_v1  ;;  %v3417_v24 = vadd.f32 1e-06, %v3401_v25  ;;  %v3402_v58 = vmul.f32 0.0078125, %v3377_v7  ;;  %v3468_v9 = vmul.f32 %v6947_v46, %v3446_v40 }
 0x62b   : > { %v3447_v49 = vmul.f32 %v5342_v33, %v6839_v60  ;;  %v3379_v17 = vpop.xlane.xlu1 %3378  ;;  %v3489_v2 = vadd.f32 %v6955_v28, %v3467_v27  ;;  %v3520_v44 = vmul.f32 %v3504_v16, %v3488_v48  ;;  %v2045_v25 = vadd.f32 %v6410_v3, %v6940_v50 }
 0x62c   : > { %5345 = vrsqrt.f32 %v3417_v24  ;;  %v3418_v45 = vadd.f32 1e-06, %v3402_v58  ;;  %v3403_v61 = vmul.f32 0.0078125, %v3379_v17  ;;  %v3490_v55 = vadd.f32 %v6955_v28, %v3468_v9  ;;  %v7581_v17 = vld [vmem:[#allocation10_spill] sm:$0xff] }
 0x62d   : > { %v3469_v32 = vmul.f32 %v6947_v46, %v3447_v49  ;;  %v3521_v19 = vmul.f32 %v3505_v23, %v3489_v2  ;;  %v3536_v1 = vadd.f32 %v3520_v44, %v2035_v15  ;;  %v3507_v33 = vadd.f32 1.0, %v2160_v57 }
 0x62e   : > { %5347 = vrsqrt.f32 %v3418_v45  ;;  %v3419_v40 = vadd.f32 1e-06, %v3403_v61  ;;  %v3522_v16 = vmul.f32 %v3506_v52, %v3490_v55  ;;  %v2166_v3 = vadd.f32 %v6563_v39, %v6937_v6 }
 0x62f   : > { %v3491_v60 = vadd.f32 %v6955_v28, %v3469_v32  ;;  %v3537_v7 = vadd.f32 %v3521_v19, %v2039_v34  ;;  %v2170_v57 = vadd.f32 %v6571_v59, %v6937_v6  ;;  %v2059_v2 = vadd.f32 %v7581_v17, %v6940_v50 }
 0x630   : > { %5349 = vrsqrt.f32 %v3419_v40  ;;  %v3538_v24 = vadd.f32 %v3522_v16, %v2045_v25  ;;  %v3508_v59 = vadd.f32 1.0, %v2166_v3 }
 0x631   : > { %v3569_v27 = vpack.c.bf16 %v3537_v7, %v3536_v1  ;;  %v3523_v48 = vmul.f32 %v3507_v33, %v3491_v60  ;;  %v3509_v1 = vadd.f32 1.0, %v2170_v57  ;;  %v7583_v60 = vld [vmem:[#allocation43_spill] sm:$0xff] }
 0x632   : > { %v2180_v7 = vadd.f32 %v7583_v60, %v6937_v6 }
 0x633   : > { %5030 = vmatprep.mubr.bf16.mxu1 %v3569_v27  ;;  %v3539_v23 = vadd.f32 %v3523_v48, %v2049_v54 }
 0x634   : > { %v5344_v15 = vpop.eup %5343 }
 0x635   : > { %v3448_v32 = vmul.f32 %v5344_v15, %v6846_v37  ;;  %v3381_v34 = vpop.xlane.xlu0 %3380  ;;  %v3570_v58 = vpack.c.bf16 %v3539_v23, %v3538_v24  ;;  %v7582_v37 = vld [vmem:[#allocation39_spill] sm:$0xff] }
 0x636   : > { %v5346_v9 = vpop.eup %5345  ;;  %v3404_v49 = vmul.f32 0.0078125, %v3381_v34  ;;  %v2176_v61 = vadd.f32 %v7582_v37, %v6937_v6 }
 0x637   : > { %v3449_v44 = vmul.f32 %v5346_v9, %v6849_v26  ;;  %v3383_v52 = vpop.xlane.xlu1 %3382  ;;  %5031 = vmatmul.mubr.bf16.vlgmr.msra.gmra.mrb[112].mxu1 %v3570_v58  ;;  %v3470_v39 = vmul.f32 %v6947_v46, %v3448_v32 }
 0x638   : > { %v5348_v45 = vpop.eup %5347  ;;  %v3420_v55 = vadd.f32 1e-06, %v3404_v49  ;;  %v3405_v19 = vmul.f32 0.0078125, %v3383_v52  ;;  %v3510_v15 = vadd.f32 1.0, %v2176_v61  ;;  %v7584_v49 = vld [vmem:[#allocation11_spill] sm:$0xff] }
 0x639   : > { %v3450_v25 = vmul.f32 %v5348_v45, %v6857_v53  ;;  %v3385_v11 = vpop.xlane.xlu0 %3384  ;;  %v3471_v40 = vmul.f32 %v6947_v46, %v3449_v44  ;;  %v3492_v33 = vadd.f32 %v6955_v28, %v3470_v39  ;;  %v2065_v17 = vadd.f32 %v7584_v49, %v6940_v50 }
 0x63a   : > { %v5350_v26 = vpop.eup %5349  ;;  %5351 = vrsqrt.f32 %v3420_v55  ;;  %v3421_v16 = vadd.f32 1e-06, %v3405_v19  ;;  %v3406_v54 = vmul.f32 0.0078125, %v3385_v11  ;;  %v3511_v44 = vadd.f32 1.0, %v2180_v7 }
 0x63b   : > { %v3451_v27 = vmul.f32 %v5350_v26, %v6862_v36  ;;  %v3387_v48 = vpop.xlane.xlu1 %3386  ;;  %v3493_v24 = vadd.f32 %v6955_v28, %v3471_v40  ;;  %v3524_v23 = vmul.f32 %v3508_v59, %v3492_v33  ;;  %v3472_v53 = vmul.f32 %v6947_v46, %v3450_v25  ;;  %v7585_v59 = vld [vmem:[#allocation12_spill] sm:$0xff]  ;;  %v7586_v25 = vld [vmem:[#allocation47_spill] sm:$0xff] }
 0x63c   : > { %5353 = vrsqrt.f32 %v3421_v16  ;;  %v3422_v3 = vadd.f32 1e-06, %v3406_v54  ;;  %v3407_v57 = vmul.f32 0.0078125, %v3387_v48  ;;  %v2069_v37 = vadd.f32 %v7585_v59, %v6940_v50  ;;  %v7587_v40 = vld [vmem:[#allocation51_spill] sm:$0xff]  ;;  %v7588_v54 = vld [vmem:[#allocation13_spill] sm:$0xff]  ;;  %v7589_v48 = vld [vmem:[#allocation14_spill] sm:$0xff] }
 0x63d   : > { %v3525_v32 = vmul.f32 %v3509_v1, %v3493_v24  ;;  %v3540_v34 = vadd.f32 %v3524_v23, %v2055_v13  ;;  %v3473_v58 = vmul.f32 %v6947_v46, %v3451_v27  ;;  %v3494_v9 = vadd.f32 %v6955_v28, %v3472_v53 }
 0x63e   : > { %5355 = vrsqrt.f32 %v3422_v3  ;;  %v3423_v36 = vadd.f32 1e-06, %v3407_v57  ;;  %v2186_v11 = vadd.f32 %v7586_v25, %v6937_v6  ;;  %v2190_v33 = vadd.f32 %v7587_v40, %v6937_v6 }
 0x63f   : > { %v3541_v52 = vadd.f32 %v3525_v32, %v2059_v2  ;;  %v3495_v39 = vadd.f32 %v6955_v28, %v3473_v58  ;;  %v3526_v45 = vmul.f32 %v3510_v15, %v3494_v9  ;;  %v2075_v27 = vadd.f32 %v7588_v54, %v6940_v50 }
 0x640   : > { %5357 = vrsqrt.f32 %v3423_v36  ;;  %v2079_v24 = vadd.f32 %v7589_v48, %v6940_v50  ;;  %v3512_v57 = vadd.f32 1.0, %v2186_v11  ;;  %v3513_v9 = vadd.f32 1.0, %v2190_v33 }
 0x641   : > { %v3571_v61 = vpack.c.bf16 %v3541_v52, %v3540_v34  ;;  %v3527_v13 = vmul.f32 %v3511_v44, %v3495_v39  ;;  %v3542_v55 = vadd.f32 %v3526_v45, %v2065_v17  ;;  %v7591_v52 = vld [vmem:[#allocation59_spill] sm:$0xff] }
 0x642   : > { %v2200_v39 = vadd.f32 %v7591_v52, %v6937_v6  ;;  %v7596_v52 = vld [vmem:[#allocation71_spill] sm:$0xff] }
 0x643   : > { %5034 = vmatprep.mubr.bf16.mxu1 %v3571_v61  ;;  %v3543_v19 = vadd.f32 %v3527_v13, %v2069_v37 }
 0x644   : > { %v5352_v1 = vpop.eup %5351 }
 0x645   : > { %v3452_v2 = vmul.f32 %v5352_v1, %v6878_v30  ;;  %v3389_v26 = vpop.xlane.xlu0 %3388  ;;  %v3572_v60 = vpack.c.bf16 %v3543_v19, %v3542_v55  ;;  %v7590_v30 = vld [vmem:[#allocation55_spill] sm:$0xff] }
 0x646   : > { %v5354_v7 = vpop.eup %5353  ;;  %v3408_v16 = vmul.f32 0.0078125, %v3389_v26  ;;  %v2196_v32 = vadd.f32 %v7590_v30, %v6937_v6  ;;  %v7592_v26 = vld [vmem:[#allocation15_spill] sm:$0xff] }
 0x647   : > { %v3453_v23 = vmul.f32 %v5354_v7, %v6881_v18  ;;  %v3391_v53 = vpop.xlane.xlu1 %3390  ;;  %5035 = vmatmul.mubr.bf16.gmra.mrb[116].mxu1 %v3572_v60  ;;  %v3474_v15 = vmul.f32 %v6947_v46, %v3452_v2  ;;  %v2085_v60 = vadd.f32 %v7592_v26, %v6940_v50  ;;  %v3515_v7 = vadd.f32 1.0, %v2200_v39 }
 0x648   : > { %v5356_v3 = vpop.eup %5355  ;;  %v3424_v34 = vadd.f32 1e-06, %v3408_v16  ;;  %v3409_v58 = vmul.f32 0.0078125, %v3391_v53  ;;  %v3514_v19 = vadd.f32 1.0, %v2196_v32  ;;  %v7594_v32 = vld [vmem:[#allocation63_spill] sm:$0xff]  ;;  %v2216_v39 = vadd.f32 %v7596_v52, %v6937_v6 }
 0x649   : > { %v3454_v49 = vmul.f32 %v5356_v3, %v6889_v31  ;;  %v3393_v17 = vpop.xlane.xlu0 %3392  ;;  %v3475_v36 = vmul.f32 %v6947_v46, %v3453_v23  ;;  %v3496_v44 = vadd.f32 %v6955_v28, %v3474_v15  ;;  %v7593_v23 = vld [vmem:[#allocation16_spill] sm:$0xff] }
 0x64a   : > { %v5358_v18 = vpop.eup %5357  ;;  %5359 = vrsqrt.f32 %v3424_v34  ;;  %v3425_v45 = vadd.f32 1e-06, %v3409_v58  ;;  %v3410_v59 = vmul.f32 0.0078125, %v3393_v17  ;;  %v2089_v53 = vadd.f32 %v7593_v23, %v6940_v50 }
 0x64b   : > { %v3455_v37 = vmul.f32 %v5358_v18, %v6894_v63  ;;  %v3395_v61 = vpop.xlane.xlu1 %3394  ;;  %v3497_v13 = vadd.f32 %v6955_v28, %v3475_v36  ;;  %v3528_v55 = vmul.f32 %v3512_v57, %v3496_v44  ;;  %v3476_v31 = vmul.f32 %v6947_v46, %v3454_v49  ;;  %v7595_v49 = vld [vmem:[#allocation67_spill] sm:$0xff] }
 0x64c   : > { %5361 = vrsqrt.f32 %v3425_v45  ;;  %v3426_v1 = vadd.f32 1e-06, %v3410_v59  ;;  %v3411_v25 = vmul.f32 0.0078125, %v3395_v61  ;;  %v2206_v34 = vadd.f32 %v7594_v32, %v6937_v6 }
 0x64d   : > { %v3529_v11 = vmul.f32 %v3513_v9, %v3497_v13  ;;  %v3544_v40 = vadd.f32 %v3528_v55, %v2075_v27  ;;  %v3477_v33 = vmul.f32 %v6947_v46, %v3455_v37  ;;  %v3498_v2 = vadd.f32 %v6955_v28, %v3476_v31  ;;  %v7597_v13 = vld [vmem:[#allocation17_spill] sm:$0xff] }
 0x64e   : > { %5363 = vrsqrt.f32 %v3426_v1  ;;  %v3427_v63 = vadd.f32 1e-06, %v3411_v25  ;;  %v2210_v17 = vadd.f32 %v7595_v49, %v6937_v6  ;;  %v3516_v45 = vadd.f32 1.0, %v2206_v34  ;;  %v5194_v34 = vld [vmem:[%s7466_s14 + $0x58] sm:$0xff]  }
 0x64f   : > { %v3545_v16 = vadd.f32 %v3529_v11, %v2079_v24  ;;  %v3499_v54 = vadd.f32 %v6955_v28, %v3477_v33  ;;  %v3530_v48 = vmul.f32 %v3514_v19, %v3498_v2  ;;  %v2095_v55 = vadd.f32 %v7597_v13, %v6940_v50  ;;  %v5198_v49 = vld [vmem:[%s7466_s14 + $0x78] sm:$0xff]  }
 0x650   : > { %5365 = vrsqrt.f32 %v3427_v63  ;;  %v3517_v31 = vadd.f32 1.0, %v2210_v17  ;;  %v3518_v2 = vadd.f32 1.0, %v2216_v39 }
 0x651   : > { %v3573_v15 = vpack.c.bf16 %v3545_v16, %v3544_v40  ;;  %v3531_v27 = vmul.f32 %v3515_v7, %v3499_v54  ;;  %v3546_v3 = vadd.f32 %v3530_v48, %v2085_v60  ;;  %v7600_v16 = vld [vmem:[#allocation19_spill] sm:$0xff] }
 0x653   : > { %5038 = vmatprep.mubr.bf16.mxu1 %v3573_v15  ;;  %v3547_v57 = vadd.f32 %v3531_v27, %v2089_v53  ;;  %v7601_v53 = vld [vmem:[#allocation20_spill] sm:$0xff] }
 0x654   : > { %v5360_v30 = vpop.eup %5359  ;;  %v2109_v15 = vadd.f32 %v7601_v53, %v6940_v50 }
 0x655   : > { %v3456_v58 = vmul.f32 %v5360_v30, %v6910_v35  ;;  %v3574_v9 = vpack.c.bf16 %v3547_v57, %v3546_v3 }
 0x656   : > { %v5362_v24 = vpop.eup %5361 }
 0x657   : > { %v3457_v36 = vmul.f32 %v5362_v24, %v6913_v29  ;;  %5039 = vmatmul.mubr.bf16.gmra.mrb[120].mxu1 %v3574_v9  ;;  %v3478_v44 = vmul.f32 %v6947_v46, %v3456_v58  ;;  %v7598_v29 = vld [vmem:[#allocation75_spill] sm:$0xff]  ;;  %v5196_v9 = vld [vmem:[%s7466_s14 + $0x68] sm:$0xff]   ;;  %v5197_v24 = vld [vmem:[%s7466_s14 + $0x70] sm:$0xff]  }
 0x658   : > { %v5364_v18 = vpop.eup %5363  ;;  %v2220_v19 = vadd.f32 %v7598_v29, %v6937_v6  ;;  %v2105_v6 = vadd.f32 %v7600_v16, %v6940_v50  ;;  %v5195_v58 = vld [vmem:[%s7466_s14 + $0x60] sm:$0xff]  }
 0x659   : > { %v3458_v59 = vmul.f32 %v5364_v18, %v6918_v42  ;;  %v3479_v37 = vmul.f32 %v6947_v46, %v3457_v36  ;;  %v3500_v35 = vadd.f32 %v6955_v28, %v3478_v44  ;;  %v7599_v42 = vld [vmem:[#allocation18_spill] sm:$0xff]  ;;  %v7091_v36 = vld [vmem:[%s7465_s13 + $0x1] ss:$0 sm:$0xff] }
 0x65a   : > { %v5366_v61 = vpop.eup %5365  ;;  %v2099_v33 = vadd.f32 %v7599_v42, %v6940_v50  ;;  %v3519_v54 = vadd.f32 1.0, %v2220_v19  ;;  %v5193_v50 = vld [vmem:[%s7466_s14 + $0x50] sm:$0xff]  }
 0x65b   : > { %v3459_v1 = vmul.f32 %v5366_v61, %v6923_v41  ;;  %v3501_v25 = vadd.f32 %v6955_v28, %v3479_v37  ;;  %v3532_v11 = vmul.f32 %v3516_v45, %v3500_v35  ;;  %v3480_v40 = vmul.f32 %v6947_v46, %v3458_v59 }
 0x65d   : > { %v3533_v26 = vmul.f32 %v3517_v31, %v3501_v25  ;;  %v3548_v60 = vadd.f32 %v3532_v11, %v2095_v55  ;;  %v3481_v63 = vmul.f32 %v6947_v46, %v3459_v1  ;;  %v3502_v7 = vadd.f32 %v6955_v28, %v3480_v40  ;;  %v5191_v46 = vld [vmem:[%s7466_s14 + $0x40] sm:$0xff]  }
 0x65e   : > { %5046 = vmatprep.subr.bf16.mxu0 %v5191_v46 }
 0x65f   : > { %v3549_v41 = vadd.f32 %v3533_v26, %v2099_v33  ;;  %v3503_v48 = vadd.f32 %v6955_v28, %v3481_v63  ;;  %v3534_v23 = vmul.f32 %v3518_v2, %v3502_v7  ;;  %5047 = vmatpush3.bf16.msra.mxu0 %v5191_v46  ;;  %v5192_v28 = vld [vmem:[%s7466_s14 + $0x48] sm:$0xff]  }
 0x660   : > { %5048 = vmatprep.subr.bf16.mxu0 %v5192_v28 }
 0x661   : > { %v3575_v27 = vpack.c.bf16 %v3549_v41, %v3548_v60  ;;  %v3535_v3 = vmul.f32 %v3519_v54, %v3503_v48  ;;  %v3550_v57 = vadd.f32 %v3534_v23, %v2105_v6 }
 0x663   : > { %5042 = vmatprep.mubr.bf16.mxu1 %v3575_v27  ;;  %v3551_v30 = vadd.f32 %v3535_v3, %v2109_v15  ;;  %5049 = vmatpush3.bf16.msra.mxu0 %v5192_v28 }
 0x664   : > { %5050 = vmatprep.subr.bf16.mxu0 %v5193_v50 }
 0x665   : > { %v3576_v32 = vpack.c.bf16 %v3551_v30, %v3550_v57 }
 0x667   : > { %5043 = vmatmul.mubr.bf16.gmra.mrb[124].mxu1 %v3576_v32  ;;  %5051 = vmatpush3.bf16.msra.mxu0 %v5193_v50 }
 0x668   : > { %5052 = vmatprep.subr.bf16.mxu0 %v5194_v34 }
 0x66b   : > { %5053 = vmatpush3.bf16.msra.mxu0 %v5194_v34 }
 0x66c   : > { %5054 = vmatprep.subr.bf16.mxu0 %v5195_v58 }
 0x66f   : > { %5055 = vmatpush3.bf16.msra.mxu0 %v5195_v58 }
 0x670   : > { %5056 = vmatprep.subr.bf16.mxu0 %v5196_v9 }
 0x673   : > { %5057 = vmatpush3.bf16.msra.mxu0 %v5196_v9 }
 0x674   : > { %5058 = vmatprep.subr.bf16.mxu0 %v5197_v24 }
 0x677   : > { %5059 = vmatpush3.bf16.msra.mxu0 %v5197_v24 }
 0x678   : > { %5060 = vmatprep.subr.bf16.mxu0 %v5198_v49 }
 0x67b   : > { %5061 = vmatpush3.bf16.msra.mxu0 %v5198_v49 }
 0x70a   : > { %v5032_v17 = vpop.f32.mrb[112].mxu1 }
 0x70b   : > { %v3667_v44 = vpop.f32.mrb[113].mxu1  ;;  %v3676_v52 = vadd.f32 %v5032_v17, %v7091_v36 }
 0x70c   : > { %v5033_v18 = vpop.f32.mrb[114].mxu1  ;;  %v3668_v59 = vadd.f32 %v7091_v36, %v3667_v44 }
 0x70d   : > { %v3679_v39 = vadd.f32 %v5033_v18, %v7091_v36  ;;  %v3670_v45 = vpop.f32.mrb[115].mxu1 }
 0x70e   : > { %v3671_v37 = vadd.f32 %v7091_v36, %v3670_v45 }
 0x70f   : > { %v3731_v35 = vpack.c.bf16 %v3679_v39, %v3676_v52 }
 0x710   : > { %v3730_v61 = vpack.c.bf16 %v3671_v37, %v3668_v59 }
 0x711   : > { %v4713_v13 = vmul.bf16 3216621497, %v3731_v35 }
 0x712   : > { %v4712_v55 = vmul.bf16 3216621497, %v3730_v61 }
 0x713   : > { %5367 = vpow.bf16 %v4713_v13 }
 0x714   : > { %5369 = vpow.bf16 %v4712_v55 }
 0x71a   : > { %v5036_v31 = vpop.f32.mrb[116].mxu1 }
 0x71b   : > { %v3683_v29 = vpop.f32.mrb[117].mxu1  ;;  %v3692_v1 = vadd.f32 %v5036_v31, %v7091_v36 }
 0x71c   : > { %v5037_v19 = vpop.f32.mrb[118].mxu1  ;;  %v3684_v42 = vadd.f32 %v7091_v36, %v3683_v29 }
 0x71d   : > { %v3695_v25 = vadd.f32 %v5037_v19, %v7091_v36  ;;  %v3686_v11 = vpop.f32.mrb[119].mxu1 }
 0x71e   : > { %v5368_v40 = vpop.eup %5367  ;;  %v3687_v33 = vadd.f32 %v7091_v36, %v3686_v11 }
 0x71f   : > { %v5370_v2 = vpop.eup %5369  ;;  %v3771_v26 = vadd.bf16 1065369472, %v5368_v40  ;;  %v3733_v60 = vpack.c.bf16 %v3695_v25, %v3692_v1 }
 0x720   : > { %v3770_v63 = vadd.bf16 1065369472, %v5370_v2  ;;  %v3732_v7 = vpack.c.bf16 %v3687_v33, %v3684_v42 }
 0x721   : > { %5371 = vrcp.bf16 %v3771_v26  ;;  %v4715_v16 = vmul.bf16 3216621497, %v3733_v60 }
 0x722   : > { %5373 = vrcp.bf16 %v3770_v63  ;;  %v4714_v6 = vmul.bf16 3216621497, %v3732_v7 }
 0x723   : > { %5375 = vpow.bf16 %v4715_v16 }
 0x724   : > { %5377 = vpow.bf16 %v4714_v6 }
 0x72a   : > { %v5040_v54 = vpop.f32.mrb[120].mxu1 }
 0x72b   : > { %v3699_v41 = vpop.f32.mrb[121].mxu1  ;;  %v3708_v27 = vadd.f32 %v5040_v54, %v7091_v36 }
 0x72c   : > { %v5372_v48 = vpop.eup %5371  ;;  %v5041_v23 = vpop.f32.mrb[122].mxu1  ;;  %v3700_v32 = vadd.f32 %v7091_v36, %v3699_v41 }
 0x72d   : > { %v5374_v53 = vpop.eup %5373  ;;  %v3781_v15 = vmul.bf16 1065369472, %v5372_v48  ;;  %v3711_v3 = vadd.f32 %v5041_v23, %v7091_v36  ;;  %v3702_v57 = vpop.f32.mrb[123].mxu1 }
 0x72e   : > { %v5376_v30 = vpop.eup %5375  ;;  %v3703_v46 = vadd.f32 %v7091_v36, %v3702_v57  ;;  %v3779_v28 = vmul.bf16 1065369472, %v5374_v53 }
 0x72f   : > { %v5378_v50 = vpop.eup %5377  ;;  %v3773_v34 = vadd.bf16 1065369472, %v5376_v30  ;;  %v3735_v58 = vpack.c.bf16 %v3711_v3, %v3708_v27  ;;  %v3795_v17 = vmul.bf16 %v3781_v15, %v3731_v35 }
 0x730   : > { %v3772_v9 = vadd.bf16 1065369472, %v5378_v50  ;;  %v3734_v24 = vpack.c.bf16 %v3703_v46, %v3700_v32  ;;  %v3794_v49 = vmul.bf16 %v3779_v28, %v3730_v61  ;;  %v1547_v28 = vsub.s32 5, %v5738_v51 }
 0x731   : > { %5379 = vrcp.bf16 %v3773_v34  ;;  %v4717_v44 = vmul.bf16 3216621497, %v3735_v58  ;;  %v7116_v34 = vld [vmem:[%s7467_s15 + $0x1] ss:$0 sm:$0xff] }
 0x732   : > { %5381 = vrcp.bf16 %v3772_v9  ;;  %v4716_v18 = vmul.bf16 3216621497, %v3734_v24  ;;  %5062 = vmatprep.mubr.bf16.mxu0 %v3794_v49  ;;  %v7111_v50 = vrot.slane %v6934_v62, %v1547_v28  ;;  %v7602_v9 = vld [vmem:[#allocation28_spill] sm:$0xff]  ;;  %v7604_v62 = vld [vmem:[#allocation31_spill] sm:$0xff] }
 0x733   : > { %5383 = vpow.bf16 %v4717_v44  ;;  %5063 = vmatmul.mubr.bf16.vlgmr.msra.gmra.mrb[128].mxu0 %v3795_v17  ;;  %v7603_v44 = vld [vmem:[#allocation22_spill] sm:$0xff] }
 0x734   : > { %5385 = vpow.bf16 %v4716_v18  ;;  %v2148_v18 = vadd.f32 %v7603_v44, %v7111_v50 }
 0x73a   : > { %v5044_v52 = vpop.f32.mrb[124].mxu1 }
 0x73b   : > { %v3715_v39 = vpop.f32.mrb[125].mxu1  ;;  %v3724_v13 = vadd.f32 %v5044_v52, %v7091_v36 }
 0x73c   : > { %v5380_v45 = vpop.eup %5379  ;;  %v5045_v59 = vpop.f32.mrb[126].mxu1  ;;  %v3716_v29 = vadd.f32 %v7091_v36, %v3715_v39 }
 0x73d   : > { %v5382_v37 = vpop.eup %5381  ;;  %v3727_v55 = vadd.f32 %v5045_v59, %v7091_v36  ;;  %v3718_v31 = vpop.f32.mrb[127].mxu1  ;;  %v3785_v61 = vmul.bf16 1065369472, %v5380_v45  ;;  %v2162_v45 = vadd.f32 %v7604_v62, %v7111_v50 }
 0x73e   : > { %v5384_v35 = vpop.eup %5383  ;;  %v3719_v19 = vadd.f32 %v7091_v36, %v3718_v31  ;;  %v3783_v1 = vmul.bf16 1065369472, %v5382_v37 }
 0x73f   : > { %v5386_v25 = vpop.eup %5385  ;;  %v3775_v11 = vadd.bf16 1065369472, %v5384_v35  ;;  %v3737_v40 = vpack.c.bf16 %v3727_v55, %v3724_v13  ;;  %v3797_v63 = vmul.bf16 %v3785_v61, %v3733_v60  ;;  %v7605_v55 = vld [vmem:[#allocation25_spill] sm:$0xff] }
 0x740   : > { %v3774_v42 = vadd.bf16 1065369472, %v5386_v25  ;;  %v3736_v33 = vpack.c.bf16 %v3719_v19, %v3716_v29  ;;  %v3796_v2 = vmul.bf16 %v3783_v1, %v3732_v7  ;;  %v2152_v31 = vadd.f32 %v7605_v55, %v7111_v50 }
 0x741   : > { %5387 = vrcp.bf16 %v3775_v11  ;;  %v4719_v26 = vmul.bf16 3216621497, %v3737_v40 }
 0x742   : > { %5389 = vrcp.bf16 %v3774_v42  ;;  %v4718_v16 = vmul.bf16 3216621497, %v3736_v33  ;;  %5066 = vmatprep.mubr.bf16.mxu0 %v3796_v2 }
 0x743   : > { %5391 = vpow.bf16 %v4719_v26  ;;  %5067 = vmatmul.mubr.bf16.gmra.mrb[132].mxu0 %v3797_v63  ;;  %v7607_v26 = vld [vmem:[#allocation34_spill] sm:$0xff] }
 0x744   : > { %5393 = vpow.bf16 %v4718_v16  ;;  %v2168_v63 = vadd.f32 %v7607_v26, %v7111_v50 }
 0x74c   : > { %v5388_v6 = vpop.eup %5387 }
 0x74d   : > { %v5390_v54 = vpop.eup %5389  ;;  %v3789_v41 = vmul.bf16 1065369472, %v5388_v6  ;;  %v7608_v6 = vld [vmem:[#allocation45_spill] sm:$0xff] }
 0x74e   : > { %v5392_v36 = vpop.eup %5391  ;;  %v3787_v48 = vmul.bf16 1065369472, %v5390_v54  ;;  %v2182_v54 = vadd.f32 %v7608_v6, %v7111_v50 }
 0x74f   : > { %v5394_v23 = vpop.eup %5393  ;;  %v3777_v53 = vadd.bf16 1065369472, %v5392_v36  ;;  %v3799_v7 = vmul.bf16 %v3789_v41, %v3735_v58 }
 0x750   : > { %v3776_v15 = vadd.bf16 1065369472, %v5394_v23  ;;  %v3798_v27 = vmul.bf16 %v3787_v48, %v3734_v24  ;;  %v2158_v24 = vadd.f32 %v7602_v9, %v7111_v50  ;;  %v7609_v48 = vld [vmem:[#allocation37_spill] sm:$0xff] }
 0x751   : > { %5395 = vrcp.bf16 %v3777_v53  ;;  %v2172_v23 = vadd.f32 %v7609_v48, %v7111_v50 }
 0x752   : > { %5397 = vrcp.bf16 %v3776_v15  ;;  %5070 = vmatprep.mubr.bf16.mxu0 %v3798_v27 }
 0x753   : > { %5071 = vmatmul.mubr.bf16.gmra.mrb[136].mxu0 %v3799_v7 }
 0x75c   : > { %v5396_v60 = vpop.eup %5395 }
 0x75d   : > { %v5398_v3 = vpop.eup %5397  ;;  %v3793_v57 = vmul.bf16 1065369472, %v5396_v60 }
 0x75e   : > { %v3791_v30 = vmul.bf16 1065369472, %v5398_v3 }
 0x75f   : > { %v3801_v46 = vmul.bf16 %v3793_v57, %v3737_v40 }
 0x760   : > { %v3800_v32 = vmul.bf16 %v3791_v30, %v3736_v33 }
 0x762   : > { %5074 = vmatprep.mubr.bf16.mxu0 %v3800_v32 }
 0x763   : > { %5075 = vmatmul.mubr.bf16.gmra.mrb[140].mxu0 %v3801_v46 }
 0x806   : > { %v5064_v58 = vpop.f32.mrb[128].mxu0 }
 0x807   : > { %v3918_v49 = vadd.f32 %v5064_v58, %v7116_v34  ;;  %v3909_v17 = vpop.f32.mrb[129].mxu0  ;;  %v7611_v58 = vld [vmem:[#allocation49_spill] sm:$0xff] }
 0x808   : > { %v3910_v52 = vadd.f32 %v7116_v34, %v3909_v17  ;;  %v5065_v39 = vpop.f32.mrb[130].mxu0  ;;  %v2188_v9 = vadd.f32 %v7611_v58, %v7111_v50 }
 0x809   : > { %v3974_v59 = vmul.f32 %v3918_v49, %v2158_v24  ;;  %v3921_v37 = vadd.f32 %v5065_v39, %v7116_v34  ;;  %v3912_v13 = vpop.f32.mrb[131].mxu0  ;;  %v7612_v49 = vld [vmem:[#allocation61_spill] sm:$0xff] }
 0x80a   : > { %v3972_v61 = vmul.f32 %v3910_v52, %v2148_v18  ;;  %v3913_v35 = vadd.f32 %v7116_v34, %v3912_v13  ;;  %v2202_v17 = vadd.f32 %v7612_v49, %v7111_v50  ;;  %v7613_v52 = vld [vmem:[#allocation53_spill] sm:$0xff] }
 0x80b   : > { %v3975_v29 = vmul.f32 %v3921_v37, %v2162_v45  ;;  %v7139_v11 = vadd.f32 %v3974_v59, %v6734_v22  ;;  %v2192_v39 = vadd.f32 %v7613_v52, %v7111_v50 }
 0x80c   : > { %v3973_v19 = vmul.f32 %v3913_v35, %v2152_v31  ;;  %v7131_v1 = vadd.f32 %v3972_v61, %v6726_v5  ;;  %v7606_v5 = vld [vmem:[#allocation41_spill] sm:$0xff] }
 0x80d   : > { %v7143_v40 = vadd.f32 %v3975_v29, %v6738_v10  ;;  %v2178_v33 = vadd.f32 %v7606_v5, %v7111_v50 }
 0x80e   : > { %4036 = vadd.xlane.f32.xlu0 %v7131_v1  ;;  %v7135_v25 = vadd.f32 %v3973_v19, %v6730_v20 }
 0x810   : > { %4038 = vadd.xlane.f32.xlu1 %v7135_v25 }
 0x812   : > { %4040 = vadd.xlane.f32.xlu0 %v7139_v11 }
 0x814   : > { %4042 = vadd.xlane.f32.xlu1 %v7143_v40 }
 0x816   : > { %v5068_v42 = vpop.f32.mrb[132].mxu0 }
 0x817   : > { %v3934_v2 = vadd.f32 %v5068_v42, %v7116_v34  ;;  %v3925_v20 = vpop.f32.mrb[133].mxu0  ;;  %v7615_v42 = vld [vmem:[#allocation65_spill] sm:$0xff] }
 0x818   : > { %v3926_v22 = vadd.f32 %v7116_v34, %v3925_v20  ;;  %v5069_v16 = vpop.f32.mrb[134].mxu0  ;;  %v2208_v5 = vadd.f32 %v7615_v42, %v7111_v50  ;;  %v5203_v42 = vld [vmem:[%s7468_s16 + $0x20] sm:$0xff]  }
 0x819   : > { %v3978_v10 = vmul.f32 %v3934_v2, %v2178_v33  ;;  %v3937_v41 = vadd.f32 %v5069_v16, %v7116_v34  ;;  %v3928_v36 = vpop.f32.mrb[135].mxu0  ;;  %v7616_v2 = vld [vmem:[#allocation77_spill] sm:$0xff] }
 0x81a   : > { %v3976_v53 = vmul.f32 %v3926_v22, %v2168_v63  ;;  %v3929_v15 = vadd.f32 %v7116_v34, %v3928_v36  ;;  %v2222_v20 = vadd.f32 %v7616_v2, %v7111_v50  ;;  %v7617_v22 = vld [vmem:[#allocation69_spill] sm:$0xff] }
 0x81b   : > { %v3979_v27 = vmul.f32 %v3937_v41, %v2182_v54  ;;  %v7167_v57 = vadd.f32 %v3978_v10, %v6762_v47  ;;  %v2212_v16 = vadd.f32 %v7617_v22, %v7111_v50 }
 0x81c   : > { %v3977_v7 = vmul.f32 %v3929_v15, %v2172_v23  ;;  %v7159_v60 = vadd.f32 %v3976_v53, %v6754_v0  ;;  %v7610_v0 = vld [vmem:[#allocation57_spill] sm:$0xff]  ;;  %v7618_v23 = vld [vmem:[#allocation3_spill] sm:$0xff] }
 0x81d   : > { %v7171_v30 = vadd.f32 %v3979_v27, %v6766_v12  ;;  %v2198_v46 = vadd.f32 %v7610_v0, %v7111_v50 }
 0x81e   : > { %4044 = vadd.xlane.f32.xlu0 %v7159_v60  ;;  %v7163_v3 = vadd.f32 %v3977_v7, %v6758_v43 }
 0x820   : > { %4046 = vadd.xlane.f32.xlu1 %v7163_v3 }
 0x822   : > { %4048 = vadd.xlane.f32.xlu0 %v7167_v57 }
 0x824   : > { %4050 = vadd.xlane.f32.xlu1 %v7171_v30 }
 0x826   : > { %v5072_v32 = vpop.f32.mrb[136].mxu0 }
 0x827   : > { %v3950_v28 = vadd.f32 %v5072_v32, %v7116_v34  ;;  %v3941_v43 = vpop.f32.mrb[137].mxu0 }
 0x828   : > { %v3942_v47 = vadd.f32 %v7116_v34, %v3941_v43  ;;  %v5073_v24 = vpop.f32.mrb[138].mxu0 }
 0x829   : > { %v3982_v12 = vmul.f32 %v3950_v28, %v2198_v46  ;;  %v3953_v44 = vadd.f32 %v5073_v24, %v7116_v34  ;;  %v3944_v18 = vpop.f32.mrb[139].mxu0 }
 0x82a   : > { %v3980_v62 = vmul.f32 %v3942_v47, %v2188_v9  ;;  %v3945_v45 = vadd.f32 %v7116_v34, %v3944_v18 }
 0x82b   : > { %v3983_v59 = vmul.f32 %v3953_v44, %v2202_v17  ;;  %v7195_v31 = vadd.f32 %v3982_v12, %v6790_v8 }
 0x82c   : > { %v3981_v37 = vmul.f32 %v3945_v45, %v2192_v39  ;;  %v7187_v13 = vadd.f32 %v3980_v62, %v6782_v21  ;;  %v7614_v21 = vld [vmem:[#allocation73_spill] sm:$0xff]  ;;  %v5200_v45 = vld [vmem:[%s7468_s16 + $0x8] sm:$0xff]  }
 0x82d   : > { %v7199_v61 = vadd.f32 %v3983_v59, %v6794_v56  ;;  %v2218_v29 = vadd.f32 %v7614_v21, %v7111_v50  ;;  %v7619_v50 = vld [vmem:[#allocation4_spill] sm:$0xff] }
 0x82e   : > { %4052 = vadd.xlane.f32.xlu0 %v7187_v13  ;;  %v7191_v55 = vadd.f32 %v3981_v37, %v6786_v4 }
 0x830   : > { %4054 = vadd.xlane.f32.xlu1 %v7191_v55 }
 0x832   : > { %4056 = vadd.xlane.f32.xlu0 %v7195_v31 }
 0x834   : > { %4058 = vadd.xlane.f32.xlu1 %v7199_v61 }
 0x836   : > { %v5076_v35 = vpop.f32.mrb[140].mxu0 }
 0x837   : > { %v3966_v19 = vadd.f32 %v5076_v35, %v7116_v34  ;;  %v3957_v4 = vpop.f32.mrb[141].mxu0 }
 0x838   : > { %v3958_v8 = vadd.f32 %v7116_v34, %v3957_v4  ;;  %v5077_v33 = vpop.f32.mrb[142].mxu0 }
 0x839   : > { %v3986_v56 = vmul.f32 %v3966_v19, %v2218_v29  ;;  %v3969_v26 = vadd.f32 %v5077_v33, %v7116_v34  ;;  %v3960_v63 = vpop.f32.mrb[143].mxu0  ;;  %v5201_v29 = vld [vmem:[%s7468_s16 + $0x10] sm:$0xff]  }
 0x83a   : > { %v3984_v6 = vmul.f32 %v3958_v8, %v2208_v5  ;;  %v3961_v54 = vadd.f32 %v7116_v34, %v3960_v63  ;;  %v5204_v63 = vld [vmem:[%s7468_s16 + $0x28] sm:$0xff]  }
 0x83b   : > { %v3987_v10 = vmul.f32 %v3969_v26, %v2222_v20  ;;  %v7223_v53 = vadd.f32 %v3986_v56, %v7618_v23 }
 0x83c   : > { %v3985_v41 = vmul.f32 %v3961_v54, %v2212_v16  ;;  %v7215_v36 = vadd.f32 %v3984_v6, %v6810_v38  ;;  %v5199_v38 = vld [vmem:[%s7468_s16] sm:$0xff]  }
 0x83d   : > { %v7227_v15 = vadd.f32 %v3987_v10, %v7619_v50  ;;  %5078 = vmatprep.subr.bf16.mxu1 %v5199_v38  ;;  %v5205_v10 = vld [vmem:[%s7468_s16 + $0x30] sm:$0xff]  }
 0x83e   : > { %4060 = vadd.xlane.f32.xlu0 %v7215_v36  ;;  %v7219_v48 = vadd.f32 %v3985_v41, %v6814_v14  ;;  %5079 = vmatpush3.bf16.msra.mxu1 %v5199_v38 }
 0x83f   : > { %5080 = vmatprep.subr.bf16.mxu1 %v5200_v45 }
 0x840   : > { %4062 = vadd.xlane.f32.xlu1 %v7219_v48 }
 0x842   : > { %4064 = vadd.xlane.f32.xlu0 %v7223_v53  ;;  %5081 = vmatpush3.bf16.msra.mxu1 %v5200_v45 }
 0x843   : > { %5082 = vmatprep.subr.bf16.mxu1 %v5201_v29 }
 0x844   : > { %4066 = vadd.xlane.f32.xlu1 %v7227_v15 }
 0x846   : > { %5083 = vmatpush3.bf16.msra.mxu1 %v5201_v29  ;;  %v7620_v29 = vld [vmem:[#allocation23_spill] sm:$0xff] }
 0x89b   : > { %v4037_v14 = vpop.xlane.xlu0 %4036 }
 0x89c   : > { %v4068_v34 = vmul.f32 0.0078125, %v4037_v14 }
 0x89d   : > { %v4039_v27 = vpop.xlane.xlu1 %4038 }
 0x89e   : > { %v7234_v7 = vsub.f32 %v7131_v1, %v4068_v34  ;;  %v4069_v32 = vmul.f32 0.0078125, %v4039_v27 }
 0x89f   : > { %v4041_v0 = vpop.xlane.xlu0 %4040 }
 0x8a0   : > { %v7237_v46 = vsub.f32 %v7135_v25, %v4069_v32  ;;  %v4070_v28 = vmul.f32 0.0078125, %v4041_v0  ;;  %v4100_v43 = vmul.f32 %v7234_v7, %v7234_v7 }
 0x8a1   : > { %v4043_v58 = vpop.xlane.xlu1 %4042 }
 0x8a2   : > { %v7242_v9 = vsub.f32 %v7139_v11, %v4070_v28  ;;  %v4071_v47 = vmul.f32 0.0078125, %v4043_v58  ;;  %4116 = vadd.xlane.f32.xlu0 %v4100_v43  ;;  %v4101_v24 = vmul.f32 %v7237_v46, %v7237_v46 }
 0x8a4   : > { %v7247_v1 = vsub.f32 %v7143_v40, %v4071_v47  ;;  %4118 = vadd.xlane.f32.xlu1 %v4101_v24  ;;  %v4102_v25 = vmul.f32 %v7242_v9, %v7242_v9 }
 0x8a6   : > { %4120 = vadd.xlane.f32.xlu0 %v4102_v25  ;;  %v4103_v49 = vmul.f32 %v7247_v1, %v7247_v1 }
 0x8a8   : > { %4122 = vadd.xlane.f32.xlu1 %v4103_v49 }
 0x8ab   : > { %v4045_v17 = vpop.xlane.xlu0 %4044 }
 0x8ac   : > { %v4072_v11 = vmul.f32 0.0078125, %v4045_v17 }
 0x8ad   : > { %v4047_v12 = vpop.xlane.xlu1 %4046 }
 0x8ae   : > { %v7254_v44 = vsub.f32 %v7159_v60, %v4072_v11  ;;  %v4073_v18 = vmul.f32 0.0078125, %v4047_v12  ;;  %v1555_v12 = vsub.s32 7, %v5738_v51 }
 0x8af   : > { %v4049_v52 = vpop.xlane.xlu0 %4048 }
 0x8b0   : > { %v7257_v40 = vsub.f32 %v7163_v3, %v4073_v18  ;;  %v4074_v39 = vmul.f32 0.0078125, %v4049_v52  ;;  %v4104_v62 = vmul.f32 %v7254_v44, %v7254_v44 }
 0x8b1   : > { %v4051_v59 = vpop.xlane.xlu1 %4050 }
 0x8b2   : > { %v7265_v37 = vsub.f32 %v7167_v57, %v4074_v39  ;;  %v4075_v35 = vmul.f32 0.0078125, %v4051_v59  ;;  %4124 = vadd.xlane.f32.xlu0 %v4104_v62  ;;  %v4105_v60 = vmul.f32 %v7257_v40, %v7257_v40  ;;  %v5432_v59 = vld [vmem:[%s7461_s9] sm:$0xff] }
 0x8b4   : > { %v7270_v3 = vsub.f32 %v7171_v30, %v4075_v35  ;;  %4126 = vadd.xlane.f32.xlu1 %v4105_v60  ;;  %v4106_v21 = vmul.f32 %v7265_v37, %v7265_v37  ;;  %v5202_v30 = vld [vmem:[%s7468_s16 + $0x18] sm:$0xff]   ;;  %v7338_v35 = vrot.slane %v5432_v59, %v1555_v12  ;;  %v1551_v60 = vsub.s32 6, %v5738_v51 }
 0x8b5   : > { %5084 = vmatprep.subr.bf16.mxu1 %v5202_v30 }
 0x8b6   : > { %4128 = vadd.xlane.f32.xlu0 %v4106_v21  ;;  %v4107_v57 = vmul.f32 %v7270_v3, %v7270_v3  ;;  %5085 = vmatpush3.bf16.msra.mxu1 %v5202_v30  ;;  %v7343_v30 = vrot.slane %v5432_v59, %v1551_v60 }
 0x8b7   : > { %5086 = vmatprep.subr.bf16.mxu1 %v5203_v42 }
 0x8b8   : > { %4130 = vadd.xlane.f32.xlu1 %v4107_v57  ;;  %v2261_v57 = vadd.f32 %v7620_v29, %v7338_v35  ;;  %v7628_v29 = vld [vmem:[#allocation35_spill] sm:$0xff] }
 0x8ba   : > { %5087 = vmatpush3.bf16.msra.mxu1 %v5203_v42 }
 0x8bb   : > { %v4053_v19 = vpop.xlane.xlu0 %4052  ;;  %5088 = vmatprep.subr.bf16.mxu1 %v5204_v63 }
 0x8bc   : > { %v4076_v4 = vmul.f32 0.0078125, %v4053_v19  ;;  %v7621_v19 = vld [vmem:[#allocation26_spill] sm:$0xff] }
 0x8bd   : > { %v4055_v5 = vpop.xlane.xlu1 %4054 }
 0x8be   : > { %v7286_v8 = vsub.f32 %v7187_v13, %v4076_v4  ;;  %v4077_v33 = vmul.f32 0.0078125, %v4055_v5  ;;  %5089 = vmatpush3.bf16.msra.mxu1 %v5204_v63  ;;  %v2265_v4 = vadd.f32 %v7621_v19, %v7338_v35  ;;  %v4212_v5 = vadd.f32 1.0, %v2261_v57  ;;  %v7623_v63 = vld [vmem:[#allocation21_spill] sm:$0xff]  ;;  %v7629_v19 = vld [vmem:[#allocation38_spill] sm:$0xff] }
 0x8bf   : > { %v4057_v2 = vpop.xlane.xlu0 %4056  ;;  %5090 = vmatprep.subr.bf16.mxu1 %v5205_v10  ;;  %v2281_v57 = vadd.f32 %v7628_v29, %v7338_v35 }
 0x8c0   : > { %v7289_v20 = vsub.f32 %v7191_v55, %v4077_v33  ;;  %v4078_v56 = vmul.f32 0.0078125, %v4057_v2  ;;  %v4108_v26 = vmul.f32 %v7286_v8, %v7286_v8  ;;  %v7622_v33 = vld [vmem:[#allocation29_spill] sm:$0xff] }
 0x8c1   : > { %v4059_v22 = vpop.xlane.xlu1 %4058  ;;  %v2271_v2 = vadd.f32 %v7622_v33, %v7338_v35  ;;  %v7630_v33 = vld [vmem:[#allocation42_spill] sm:$0xff] }
 0x8c2   : > { %v7297_v16 = vsub.f32 %v7195_v31, %v4078_v56  ;;  %v4079_v13 = vmul.f32 0.0078125, %v4059_v22  ;;  %4132 = vadd.xlane.f32.xlu0 %v4108_v26  ;;  %v4109_v6 = vmul.f32 %v7289_v20, %v7289_v20  ;;  %5091 = vmatpush3.bf16.msra.mxu1 %v5205_v10  ;;  %v2259_v22 = vadd.f32 %v7623_v63, %v7343_v30  ;;  %v7631_v63 = vld [vmem:[#allocation33_spill] sm:$0xff] }
 0x8c4   : > { %v7302_v55 = vsub.f32 %v7199_v61, %v4079_v13  ;;  %4134 = vadd.xlane.f32.xlu1 %v4109_v6  ;;  %v4110_v54 = vmul.f32 %v7297_v16, %v7297_v16  ;;  %v5206_v61 = vld [vmem:[%s7468_s16 + $0x38] sm:$0xff]   ;;  %v4213_v6 = vadd.f32 1.0, %v2265_v4  ;;  %v2285_v4 = vadd.f32 %v7629_v19, %v7338_v35 }
 0x8c5   : > { %5092 = vmatprep.subr.bf16.mxu1 %v5206_v61  ;;  %v7638_v19 = vld [vmem:[#allocation58_spill] sm:$0xff] }
 0x8c6   : > { %4136 = vadd.xlane.f32.xlu0 %v4110_v54  ;;  %v4111_v31 = vmul.f32 %v7302_v55, %v7302_v55  ;;  %5093 = vmatpush3.bf16.msra.mxu1 %v5206_v61  ;;  %v7624_v54 = vld [vmem:[#allocation32_spill] sm:$0xff] }
 0x8c7   : > { %v2275_v10 = vadd.f32 %v7624_v54, %v7338_v35  ;;  %v7632_v54 = vld [vmem:[#allocation46_spill] sm:$0xff] }
 0x8c8   : > { %4138 = vadd.xlane.f32.xlu1 %v4111_v31 }
 0x8cb   : > { %v4061_v41 = vpop.xlane.xlu0 %4060 }
 0x8cc   : > { %v4080_v23 = vmul.f32 0.0078125, %v4061_v41 }
 0x8cd   : > { %v4063_v50 = vpop.xlane.xlu1 %4062 }
 0x8ce   : > { %v7315_v38 = vsub.f32 %v7215_v36, %v4080_v23  ;;  %v4081_v14 = vmul.f32 0.0078125, %v4063_v50  ;;  %v7625_v50 = vld [vmem:[#allocation24_spill] sm:$0xff] }
 0x8cf   : > { %v4065_v34 = vpop.xlane.xlu0 %4064 }
 0x8d0   : > { %v7318_v27 = vsub.f32 %v7219_v48, %v4081_v14  ;;  %v4082_v32 = vmul.f32 0.0078125, %v4065_v34  ;;  %v4112_v0 = vmul.f32 %v7315_v38, %v7315_v38  ;;  %v2263_v14 = vadd.f32 %v7625_v50, %v7343_v30  ;;  %v7633_v50 = vld [vmem:[#allocation36_spill] sm:$0xff] }
 0x8d1   : > { %v4067_v28 = vpop.xlane.xlu1 %4066 }
 0x8d2   : > { %v7323_v43 = vsub.f32 %v7223_v53, %v4082_v32  ;;  %v4083_v58 = vmul.f32 0.0078125, %v4067_v28  ;;  %4140 = vadd.xlane.f32.xlu0 %v4112_v0  ;;  %v4113_v47 = vmul.f32 %v7318_v27, %v7318_v27 }
 0x8d4   : > { %v7328_v36 = vsub.f32 %v7227_v15, %v4083_v58  ;;  %4142 = vadd.xlane.f32.xlu1 %v4113_v47  ;;  %v4114_v48 = vmul.f32 %v7323_v43, %v7323_v43 }
 0x8d6   : > { %4144 = vadd.xlane.f32.xlu0 %v4114_v48  ;;  %v4115_v24 = vmul.f32 %v7328_v36, %v7328_v36 }
 0x8d8   : > { %4146 = vadd.xlane.f32.xlu1 %v4115_v24  ;;  %v7626_v24 = vld [vmem:[#allocation27_spill] sm:$0xff] }
 0x92f   : > { %v4117_v25 = vpop.xlane.xlu0 %4116 }
 0x930   : > { %v4148_v53 = vmul.f32 0.0078125, %v4117_v25  ;;  %v2269_v25 = vadd.f32 %v7626_v24, %v7343_v30 }
 0x931   : > { %v4119_v49 = vpop.xlane.xlu1 %4118 }
 0x932   : > { %v4164_v17 = vadd.f32 1e-06, %v4148_v53  ;;  %v4149_v11 = vmul.f32 0.0078125, %v4119_v49  ;;  %v4215_v49 = vadd.f32 1.0, %v2275_v10  ;;  %v2295_v10 = vadd.f32 %v7632_v54, %v7338_v35 }
 0x933   : > { %v4121_v18 = vpop.xlane.xlu0 %4120 }
 0x934   : > { %5399 = vrsqrt.f32 %v4164_v17  ;;  %v4165_v15 = vadd.f32 1e-06, %v4149_v11  ;;  %v4150_v52 = vmul.f32 0.0078125, %v4121_v18 }
 0x935   : > { %v4123_v39 = vpop.xlane.xlu1 %4122 }
 0x936   : > { %5401 = vrsqrt.f32 %v4165_v15  ;;  %v4166_v62 = vadd.f32 1e-06, %v4150_v52  ;;  %v4151_v45 = vmul.f32 0.0078125, %v4123_v39 }
 0x938   : > { %5403 = vrsqrt.f32 %v4166_v62  ;;  %v4167_v21 = vadd.f32 1e-06, %v4151_v45 }
 0x93a   : > { %5405 = vrsqrt.f32 %v4167_v21 }
 0x93e   : > { %v5400_v42 = vpop.eup %5399 }
 0x93f   : > { %v4125_v56 = vpop.xlane.xlu0 %4124  ;;  %v4196_v26 = vmul.f32 %v5400_v42, %v7234_v7  ;;  %v4214_v7 = vadd.f32 1.0, %v2271_v2  ;;  %v2291_v2 = vadd.f32 %v7630_v33, %v7338_v35 }
 0x940   : > { %v5402_v51 = vpop.eup %5401  ;;  %v4152_v13 = vmul.f32 0.0078125, %v4125_v56 }
 0x941   : > { %v4127_v31 = vpop.xlane.xlu1 %4126  ;;  %v4197_v61 = vmul.f32 %v5402_v51, %v7237_v46  ;;  %v4228_v41 = vmul.f32 %v4212_v5, %v4196_v26  ;;  %v4216_v5 = vadd.f32 1.0, %v2281_v57 }
 0x942   : > { %v5404_v23 = vpop.eup %5403  ;;  %v4168_v34 = vadd.f32 1e-06, %v4152_v13  ;;  %v4153_v32 = vmul.f32 0.0078125, %v4127_v31 }
 0x943   : > { %v4198_v0 = vmul.f32 %v5404_v23, %v7242_v9  ;;  %v4129_v28 = vpop.xlane.xlu0 %4128  ;;  %v4229_v58 = vmul.f32 %v4213_v6, %v4197_v61  ;;  %v4244_v47 = vadd.f32 %v4228_v41, %v2259_v22  ;;  %v7627_v9 = vld [vmem:[#allocation30_spill] sm:$0xff]  ;;  %v2279_v22 = vadd.f32 %v7631_v63, %v7343_v30 }
 0x944   : > { %v5406_v48 = vpop.eup %5405  ;;  %5407 = vrsqrt.f32 %v4168_v34  ;;  %v4169_v53 = vadd.f32 1e-06, %v4153_v32  ;;  %v4154_v46 = vmul.f32 0.0078125, %v4129_v28  ;;  %v2273_v39 = vadd.f32 %v7627_v9, %v7343_v30  ;;  %v7640_v63 = vld [vmem:[#allocation62_spill] sm:$0xff] }
 0x945   : > { %v4230_v17 = vmul.f32 %v4214_v7, %v4198_v0  ;;  %v4199_v11 = vmul.f32 %v5406_v48, %v7247_v1  ;;  %v4131_v12 = vpop.xlane.xlu1 %4130  ;;  %v4245_v18 = vadd.f32 %v4229_v58, %v2263_v14  ;;  %v4217_v6 = vadd.f32 1.0, %v2285_v4  ;;  %v7634_v48 = vld [vmem:[#allocation40_spill] sm:$0xff] }
 0x946   : > { %5409 = vrsqrt.f32 %v4169_v53  ;;  %v4170_v15 = vadd.f32 1e-06, %v4154_v46  ;;  %v4155_v52 = vmul.f32 0.0078125, %v4131_v12  ;;  %v2283_v14 = vadd.f32 %v7633_v50, %v7343_v30 }
 0x947   : > { %v4231_v62 = vmul.f32 %v4215_v49, %v4199_v11  ;;  %v4276_v45 = vpack.c.bf16 %v4245_v18, %v4244_v47  ;;  %v4246_v59 = vadd.f32 %v4230_v17, %v2269_v25  ;;  %v2289_v24 = vadd.f32 %v7634_v48, %v7343_v30 }
 0x948   : > { %5411 = vrsqrt.f32 %v4170_v15  ;;  %v4171_v60 = vadd.f32 1e-06, %v4155_v52  ;;  %v4219_v53 = vadd.f32 1.0, %v2295_v10  ;;  %v7635_v15 = vld [vmem:[#allocation44_spill] sm:$0xff]  ;;  %v2311_v4 = vadd.f32 %v7638_v19, %v7338_v35 }
 0x949   : > { %5094 = vmatprep.mubr.bf16.mxu1 %v4276_v45  ;;  %v4247_v21 = vadd.f32 %v4231_v62, %v2273_v39  ;;  %v2293_v52 = vadd.f32 %v7635_v15, %v7343_v30  ;;  %v7644_v15 = vld [vmem:[#allocation66_spill] sm:$0xff] }
 0x94a   : > { %5413 = vrsqrt.f32 %v4171_v60 }
 0x94b   : > { %v4277_v1 = vpack.c.bf16 %v4247_v21, %v4246_v59  ;;  %v7636_v59 = vld [vmem:[#allocation50_spill] sm:$0xff] }
 0x94c   : > { %v2301_v60 = vadd.f32 %v7636_v59, %v7338_v35 }
 0x94d   : > { %5095 = vmatmul.mubr.bf16.vlgmr.msra.gmra.mrb[128].mxu1 %v4277_v1 }
 0x94e   : > { %v5408_v42 = vpop.eup %5407  ;;  %v4220_v1 = vadd.f32 1.0, %v2301_v60 }
 0x94f   : > { %v4133_v56 = vpop.xlane.xlu0 %4132  ;;  %v4200_v26 = vmul.f32 %v5408_v42, %v7254_v44  ;;  %v4218_v44 = vadd.f32 1.0, %v2291_v2  ;;  %v7639_v2 = vld [vmem:[#allocation48_spill] sm:$0xff] }
 0x950   : > { %v5410_v51 = vpop.eup %5409  ;;  %v4156_v13 = vmul.f32 0.0078125, %v4133_v56  ;;  %v2299_v56 = vadd.f32 %v7639_v2, %v7343_v30 }
 0x951   : > { %v4135_v31 = vpop.xlane.xlu1 %4134  ;;  %v4201_v61 = vmul.f32 %v5410_v51, %v7257_v40  ;;  %v4232_v41 = vmul.f32 %v4216_v5, %v4200_v26 }
 0x952   : > { %v5412_v23 = vpop.eup %5411  ;;  %v4172_v34 = vadd.f32 1e-06, %v4156_v13  ;;  %v4157_v32 = vmul.f32 0.0078125, %v4135_v31  ;;  %v7641_v31 = vld [vmem:[#allocation52_spill] sm:$0xff] }
 0x953   : > { %v4137_v7 = vpop.xlane.xlu0 %4136  ;;  %v4233_v0 = vmul.f32 %v4217_v6, %v4201_v61  ;;  %v4248_v28 = vadd.f32 %v4232_v41, %v2279_v22  ;;  %v4202_v58 = vmul.f32 %v5412_v23, %v7265_v37  ;;  %v2315_v22 = vadd.f32 %v7640_v63, %v7338_v35 }
 0x954   : > { %v5414_v47 = vpop.eup %5413  ;;  %5415 = vrsqrt.f32 %v4172_v34  ;;  %v4173_v25 = vadd.f32 1e-06, %v4157_v32  ;;  %v4158_v40 = vmul.f32 0.0078125, %v4137_v7  ;;  %v2303_v61 = vadd.f32 %v7641_v31, %v7343_v30  ;;  %v7642_v7 = vld [vmem:[#allocation56_spill] sm:$0xff] }
 0x955   : > { %v4139_v46 = vpop.xlane.xlu1 %4138  ;;  %v4249_v49 = vadd.f32 %v4233_v0, %v2283_v14  ;;  %v4203_v17 = vmul.f32 %v5414_v47, %v7270_v3  ;;  %v4234_v11 = vmul.f32 %v4218_v44, %v4202_v58  ;;  %v7637_v3 = vld [vmem:[#allocation54_spill] sm:$0xff]  ;;  %v2309_v0 = vadd.f32 %v7642_v7, %v7343_v30 }
 0x956   : > { %5417 = vrsqrt.f32 %v4173_v25  ;;  %v4174_v12 = vadd.f32 1e-06, %v4158_v40  ;;  %v4159_v18 = vmul.f32 0.0078125, %v4139_v46  ;;  %v2305_v29 = vadd.f32 %v7637_v3, %v7338_v35  ;;  %v7643_v46 = vld [vmem:[#allocation60_spill] sm:$0xff] }
 0x957   : > { %v4278_v37 = vpack.c.bf16 %v4249_v49, %v4248_v28  ;;  %v4235_v9 = vmul.f32 %v4219_v53, %v4203_v17  ;;  %v4250_v39 = vadd.f32 %v4234_v11, %v2289_v24  ;;  %v4223_v58 = vadd.f32 1.0, %v2315_v22  ;;  %v7647_v3 = vld [vmem:[#allocation64_spill] sm:$0xff] }
 0x958   : > { %5419 = vrsqrt.f32 %v4174_v12  ;;  %v4175_v62 = vadd.f32 1e-06, %v4159_v18  ;;  %v4221_v51 = vadd.f32 1.0, %v2305_v29  ;;  %v2313_v49 = vadd.f32 %v7643_v46, %v7343_v30  ;;  %v7650_v22 = vld [vmem:[#allocation72_spill] sm:$0xff] }
 0x959   : > { %5098 = vmatprep.mubr.bf16.mxu1 %v4278_v37  ;;  %v4251_v45 = vadd.f32 %v4235_v9, %v2293_v52  ;;  %v2321_v52 = vadd.f32 %v7644_v15, %v7338_v35  ;;  %v2319_v29 = vadd.f32 %v7647_v3, %v7343_v30 }
 0x95a   : > { %5421 = vrsqrt.f32 %v4175_v62 }
 0x95b   : > { %v4279_v21 = vpack.c.bf16 %v4251_v45, %v4250_v39  ;;  %v4224_v62 = vadd.f32 1.0, %v2321_v52  ;;  %v7646_v45 = vld [vmem:[#allocation74_spill] sm:$0xff] }
 0x95c   : > { %v2331_v59 = vadd.f32 %v7646_v45, %v7338_v35 }
 0x95d   : > { %5099 = vmatmul.mubr.bf16.gmra.mrb[132].mxu1 %v4279_v21 }
 0x95e   : > { %v5416_v57 = vpop.eup %5415 }
 0x95f   : > { %v4141_v42 = vpop.xlane.xlu0 %4140  ;;  %v4204_v5 = vmul.f32 %v5416_v57, %v7286_v8  ;;  %v4222_v8 = vadd.f32 1.0, %v2311_v4 }
 0x960   : > { %v5418_v33 = vpop.eup %5417  ;;  %v4160_v26 = vmul.f32 0.0078125, %v4141_v42 }
 0x961   : > { %v4143_v13 = vpop.xlane.xlu1 %4142  ;;  %v4205_v6 = vmul.f32 %v5418_v33, %v7289_v20  ;;  %v4236_v54 = vmul.f32 %v4220_v1, %v4204_v5  ;;  %v7648_v1 = vld [vmem:[#allocation78_spill] sm:$0xff]  ;;  %v7649_v33 = vld [vmem:[#allocation68_spill] sm:$0xff] }
 0x962   : > { %v5420_v10 = vpop.eup %5419  ;;  %v4176_v41 = vadd.f32 1e-06, %v4160_v26  ;;  %v4161_v23 = vmul.f32 0.0078125, %v4143_v13  ;;  %v2335_v19 = vadd.f32 %v7648_v1, %v7338_v35  ;;  %v2323_v2 = vadd.f32 %v7649_v33, %v7343_v30 }
 0x963   : > { %v4145_v50 = vpop.xlane.xlu0 %4144  ;;  %v4237_v14 = vmul.f32 %v4221_v51, %v4205_v6  ;;  %v4252_v34 = vadd.f32 %v4236_v54, %v2299_v56  ;;  %v4206_v32 = vmul.f32 %v5420_v10, %v7297_v16  ;;  %v4226_v56 = vadd.f32 1.0, %v2331_v59  ;;  %v7651_v10 = vld [vmem:[#allocation76_spill] sm:$0xff] }
 0x964   : > { %v5422_v44 = vpop.eup %5421  ;;  %5423 = vrsqrt.f32 %v4176_v41  ;;  %v4177_v28 = vadd.f32 1e-06, %v4161_v23  ;;  %v4162_v20 = vmul.f32 0.0078125, %v4145_v50  ;;  %v2329_v13 = vadd.f32 %v7650_v22, %v7343_v30 }
 0x965   : > { %v4147_v47 = vpop.xlane.xlu1 %4146  ;;  %v4253_v48 = vadd.f32 %v4237_v14, %v2303_v61  ;;  %v4207_v24 = vmul.f32 %v5422_v44, %v7302_v55  ;;  %v4238_v25 = vmul.f32 %v4222_v8, %v4206_v32  ;;  %v7645_v55 = vld [vmem:[#allocation70_spill] sm:$0xff]  ;;  %v4227_v6 = vadd.f32 1.0, %v2335_v19 }
 0x966   : > { %5425 = vrsqrt.f32 %v4177_v28  ;;  %v4178_v40 = vadd.f32 1e-06, %v4162_v20  ;;  %v4163_v53 = vmul.f32 0.0078125, %v4147_v47  ;;  %v2325_v9 = vadd.f32 %v7645_v55, %v7338_v35 }
 0x967   : > { %v4280_v16 = vpack.c.bf16 %v4253_v48, %v4252_v34  ;;  %v4239_v17 = vmul.f32 %v4223_v58, %v4207_v24  ;;  %v4254_v11 = vadd.f32 %v4238_v25, %v2309_v0  ;;  %v2333_v31 = vadd.f32 %v7651_v10, %v7343_v30 }
 0x968   : > { %5427 = vrsqrt.f32 %v4178_v40  ;;  %v4179_v12 = vadd.f32 1e-06, %v4163_v53  ;;  %v4225_v57 = vadd.f32 1.0, %v2325_v9 }
 0x969   : > { %5102 = vmatprep.mubr.bf16.mxu1 %v4280_v16  ;;  %v4255_v18 = vadd.f32 %v4239_v17, %v2313_v49 }
 0x96a   : > { %5429 = vrsqrt.f32 %v4179_v12 }
 0x96b   : > { %v4281_v37 = vpack.c.bf16 %v4255_v18, %v4254_v11 }
 0x96d   : > { %5103 = vmatmul.mubr.bf16.gmra.mrb[136].mxu1 %v4281_v37 }
 0x96e   : > { %v5424_v39 = vpop.eup %5423 }
 0x96f   : > { %v4208_v60 = vmul.f32 %v5424_v39, %v7315_v38 }
 0x970   : > { %v5426_v21 = vpop.eup %5425 }
 0x971   : > { %v4209_v4 = vmul.f32 %v5426_v21, %v7318_v27  ;;  %v4240_v42 = vmul.f32 %v4224_v62, %v4208_v60 }
 0x972   : > { %v5428_v5 = vpop.eup %5427 }
 0x973   : > { %v4241_v26 = vmul.f32 %v4225_v57, %v4209_v4  ;;  %v4256_v51 = vadd.f32 %v4240_v42, %v2319_v29  ;;  %v4210_v38 = vmul.f32 %v5428_v5, %v7323_v43  ;;  %v4746_v43 = vld [vmem:[%s7469_s17] ss:$0 sm:$0xff] }
 0x974   : > { %v5430_v63 = vpop.eup %5429 }
 0x975   : > { %v4257_v54 = vadd.f32 %v4241_v26, %v2323_v2  ;;  %v4211_v35 = vmul.f32 %v5430_v63, %v7328_v36  ;;  %v4242_v27 = vmul.f32 %v4226_v56, %v4210_v38 }
 0x977   : > { %v4282_v61 = vpack.c.bf16 %v4257_v54, %v4256_v51  ;;  %v4243_v41 = vmul.f32 %v4227_v6, %v4211_v35  ;;  %v4258_v23 = vadd.f32 %v4242_v27, %v2329_v13 }
 0x979   : > { %5106 = vmatprep.mubr.bf16.mxu1 %v4282_v61  ;;  %v4259_v8 = vadd.f32 %v4243_v41, %v2333_v31 }
 0x97b   : > { %v4283_v50 = vpack.c.bf16 %v4259_v8, %v4258_v23 }
 0x97d   : > { %5107 = vmatmul.mubr.bf16.gmra.mrb[140].mxu1 %v4283_v50 }
 0xa20   : > { %v5096_v36 = vpop.f32.mrb[128].mxu1 }
 0xa21   : > { %v4382_v30 = vadd.f32 %v5096_v36, %v4746_v43  ;;  %v4373_v14 = vpop.f32.mrb[129].mxu1 }
 0xa22   : > { %v4374_v34 = vadd.f32 %v4746_v43, %v4373_v14  ;;  %v5097_v32 = vpop.f32.mrb[130].mxu1 }
 0xa23   : > { %4438 = vst [vmem:[%s7431_s26 + $0x10] sm:$0xff] %v4382_v30  ;;  %v4385_v44 = vadd.f32 %v5097_v32, %v4746_v43  ;;  %v4376_v7 = vpop.f32.mrb[131].mxu1 }
 0xa24   : > { %4436 = vst [vmem:[%s7431_s26] sm:$0xff] %v4374_v34  ;;  %v4377_v0 = vadd.f32 %v4746_v43, %v4376_v7 }
 0xa25   : > { %4439 = vst [vmem:[%s7431_s26 + $0x18] sm:$0xff] %v4385_v44 }
 0xa26   : > { %4437 = vst [vmem:[%s7431_s26 + $0x8] sm:$0xff] %v4377_v0 }
 0xa30   : > { %v5100_v28 = vpop.f32.mrb[132].mxu1 }
 0xa31   : > { %v4398_v20 = vadd.f32 %v5100_v28, %v4746_v43  ;;  %v4389_v58 = vpop.f32.mrb[133].mxu1 }
 0xa32   : > { %v4390_v47 = vadd.f32 %v4746_v43, %v4389_v58  ;;  %v5101_v48 = vpop.f32.mrb[134].mxu1 }
 0xa33   : > { %4442 = vst [vmem:[%s7431_s26 + $0x30] sm:$0xff] %v4398_v20  ;;  %v4401_v24 = vadd.f32 %v5101_v48, %v4746_v43  ;;  %v4392_v25 = vpop.f32.mrb[135].mxu1 }
 0xa34   : > { %4440 = vst [vmem:[%s7431_s26 + $0x20] sm:$0xff] %v4390_v47  ;;  %v4393_v40 = vadd.f32 %v4746_v43, %v4392_v25 }
 0xa35   : > { %4443 = vst [vmem:[%s7431_s26 + $0x38] sm:$0xff] %v4401_v24 }
 0xa36   : > { %4441 = vst [vmem:[%s7431_s26 + $0x28] sm:$0xff] %v4393_v40 }
 0xa40   : > { %v5104_v53 = vpop.f32.mrb[136].mxu1 }
 0xa41   : > { %v4414_v46 = vadd.f32 %v5104_v53, %v4746_v43  ;;  %v4405_v49 = vpop.f32.mrb[137].mxu1 }
 0xa42   : > { %v4406_v16 = vadd.f32 %v4746_v43, %v4405_v49  ;;  %v5105_v17 = vpop.f32.mrb[138].mxu1 }
 0xa43   : > { %4446 = vst [vmem:[%s7431_s26 + $0x50] sm:$0xff] %v4414_v46  ;;  %v4417_v11 = vadd.f32 %v5105_v17, %v4746_v43  ;;  %v4408_v12 = vpop.f32.mrb[139].mxu1 }
 0xa44   : > { %4444 = vst [vmem:[%s7431_s26 + $0x40] sm:$0xff] %v4406_v16  ;;  %v4409_v18 = vadd.f32 %v4746_v43, %v4408_v12 }
 0xa45   : > { %4447 = vst [vmem:[%s7431_s26 + $0x58] sm:$0xff] %v4417_v11 }
 0xa46   : > { %4445 = vst [vmem:[%s7431_s26 + $0x48] sm:$0xff] %v4409_v18 }
 0xa50   : > { %v5108_v15 = vpop.f32.mrb[140].mxu1 }
 0xa51   : > { %v4430_v52 = vadd.f32 %v5108_v15, %v4746_v43  ;;  %v4421_v37 = vpop.f32.mrb[141].mxu1 }
 0xa52   : > { %v4422_v55 = vadd.f32 %v4746_v43, %v4421_v37  ;;  %v5109_v9 = vpop.f32.mrb[142].mxu1 }
 0xa53   : > { %4450 = vst [vmem:[%s7431_s26 + $0x70] sm:$0xff] %v4430_v52  ;;  %v4433_v39 = vadd.f32 %v5109_v9, %v4746_v43  ;;  %v4424_v62 = vpop.f32.mrb[143].mxu1 }
 0xa54   : > { %4448 = vst [vmem:[%s7431_s26 + $0x60] sm:$0xff] %v4422_v55  ;;  %v4425_v45 = vadd.f32 %v4746_v43, %v4424_v62 }
 0xa55   : > { %4451 = vst [vmem:[%s7431_s26 + $0x78] sm:$0xff] %v4433_v39 }
 0xa56   : > { %4449 = vst [vmem:[%s7431_s26 + $0x68] sm:$0xff] %v4425_v45 }
 0xa57 PF: > { %s28_s27 = sadd.s32 1, %s5439_s27  }
 0xa58   : > { %p25_p4 = scmp.ge.s32.totalorder %s28_s27, 4  }
 0xa5a   :  { %27 = sbr.rel (!%p25_p4) target bundleno = 4 (0x4), region = 131 }

</bundles_post_ra>
